<compile_context>
chip_gen: v6e
topology: v6e:2x2x1
jax: 0.10.0
libtpu: 0.0.40
codegen_flags: <defaults>
</compile_context>

<pallas_src>
import functools
import math

import jax
import jax.numpy as jnp
from jax.experimental import pallas as pl


# ----------------------------------------------------------------------------------
# shared math helpers (pure jnp -> usable both inside kernels and in the reference)
# ----------------------------------------------------------------------------------
def _layer_norm(x, gamma, beta, eps=1e-5):
    mu = jnp.mean(x, axis=-1, keepdims=True)
    xc = x - mu
    var = jnp.mean(xc * xc, axis=-1, keepdims=True)
    return xc * jax.lax.rsqrt(var + eps) * gamma + beta


def sinusoidal_pos_emb(seq_len, dim):
    # TODO(synk): exact fairseq SinusoidalPositionalEmbedding convention (padding_idx
    # handling on real-valued inputs) is external to the spec; standard sin/cos with
    # positions 1..T is used here.
    half = dim // 2
    freq = jnp.exp(jnp.arange(half, dtype=jnp.float32) * -(math.log(10000.0) / (half - 1)))
    pos = jnp.arange(1, seq_len + 1, dtype=jnp.float32)
    ang = pos[:, None] * freq[None, :]
    return jnp.concatenate([jnp.sin(ang), jnp.cos(ang)], axis=1)  # (T, dim), dim even


# ----------------------------------------------------------------------------------
# Single fused kernel: conv proj + pos emb + L pre-LN transformer layers + final LN
#                      + activate/mean-pool.  All refs are full-array VMEM blocks.
#
#   ac:    (B*T, A)      flattened acoustic input (batch folded onto sublanes)
#   wconv: (3, A, D)     conv taps k=0,1,2
#   pos:   (T, D)        positional embedding
#   smask: (B*T, 2)      [:,0]=1 if a "previous" row exists, [:,1]=1 if a "next" row
#   bias:  (B*T, B*T)    0 within a batch element, -1e9 across (block-diagonal)
#   wqkvo: (L, 4, D, D)  q/k/v/out projection weights
#   vecs:  (L, 9, D)     rows: ln1_g, ln1_b, bq, bk, bv, bo, ln2_g, ln2_b, b_fc2
#   w1:    (L, D, 4D)    fc1 ; b1: (L, 1, 4D) ; w2: (L, 4D, D)
#   lnf:   (2, D)        final LayerNorm gamma/beta
# outputs:
#   pooled: (B, D)       mean_t activate(outputa)
#   outa:   (T, B, D)    final-LN output, written directly in PyTorch layout
# ----------------------------------------------------------------------------------
def a_encoder_kernel(ac_ref, wconv_ref, pos_ref, smask_ref, bias_ref,
                     wqkvo_ref, vecs_ref, w1_ref, b1_ref, w2_ref, lnf_ref,
                     pooled_ref, outa_ref, *, num_heads, embed_scale):
    f32 = jnp.float32
    BT, A = ac_ref.shape
    T, B, D = outa_ref.shape
    L = wqkvo_ref.shape[0]
    hd = D // num_heads
    scale = 1.0 / math.sqrt(hd)

    x_in = ac_ref[...]                                # (BT, A)
    prev_ok = smask_ref[:, 0:1]                       # (BT, 1)
    next_ok = smask_ref[:, 1:2]                       # (BT, 1)

    # --- Conv1d(k=3, stride=1, pad=1, no bias) on the folded (B*T, A) layout ---
    # Shifted copies built with sublane concat of static slices; the 0/1 masks both
    # implement the zero padding and kill cross-batch leakage at sequence boundaries.
    x_prev = jnp.concatenate([x_in[0:1, :], x_in[:BT - 1, :]], axis=0) * prev_ok
    x_next = jnp.concatenate([x_in[1:, :], x_in[BT - 1:, :]], axis=0) * next_ok
    proj = (jnp.dot(x_prev, wconv_ref[0], preferred_element_type=f32)
            + jnp.dot(x_in, wconv_ref[1], preferred_element_type=f32)
            + jnp.dot(x_next, wconv_ref[2], preferred_element_type=f32))

    pos_all = jnp.concatenate([pos_ref[...]] * B, axis=0)        # (BT, D)
    x = embed_scale * proj + pos_all

    attn_bias = bias_ref[...]                                    # (BT, BT)
    lane = jax.lax.broadcasted_iota(jnp.int32, (BT, D), 1)       # head-mask lane ids

    # --- L pre-LN transformer encoder layers (MulT style), statically unrolled ---
    for l in range(L):
        def vrow(i, _l=l):
            return vecs_ref[_l, i:i + 1, :]                      # (1, D)

        # self attention (pre-LN)
        y = _layer_norm(x, vrow(0), vrow(1))
        q = jnp.dot(y, wqkvo_ref[l, 0], preferred_element_type=f32) + vrow(2)
        k = jnp.dot(y, wqkvo_ref[l, 1], preferred_element_type=f32) + vrow(3)
        v = jnp.dot(y, wqkvo_ref[l, 2], preferred_element_type=f32) + vrow(4)
        qs = q * scale

        attn = jnp.zeros((BT, D), f32)
        for h in range(num_heads):                               # 5 heads, lane masks
            in_h = (lane >= h * hd) & (lane < (h + 1) * hd)
            kh = jnp.where(in_h, k, 0.0)
            vh = jnp.where(in_h, v, 0.0)
            s = jax.lax.dot_general(qs, kh, (((1,), (1,)), ((), ())),
                                    preferred_element_type=f32) + attn_bias
            s = s - jnp.max(s, axis=-1, keepdims=True)
            p = jnp.exp(s)
            p = p * pl.reciprocal(jnp.sum(p, axis=-1, keepdims=True), approx=True)
            attn = attn + jnp.dot(p, vh, preferred_element_type=f32)
        attn = jnp.dot(attn, wqkvo_ref[l, 3], preferred_element_type=f32) + vrow(5)
        x = x + attn

        # feed-forward (pre-LN, 4x expansion, relu)
        z = _layer_norm(x, vrow(6), vrow(7))
        hdn = jnp.maximum(
            jnp.dot(z, w1_ref[l], preferred_element_type=f32) + b1_ref[l], 0.0)
        x = x + jnp.dot(hdn, w2_ref[l], preferred_element_type=f32) + vrow(8)

    # --- final LayerNorm -> outputa ; activate + mean-pool over time -> pooled ---
    y = _layer_norm(x, lnf_ref[0:1, :], lnf_ref[1:2, :])
    # TODO(synk): config1.activate is external to the spec; tanh assumed.
    act = jnp.tanh(y)
    for b in range(B):                                           # static, B=2
        yb = y[b * T:(b + 1) * T, :]                             # (T, D)
        outa_ref[:, b, :] = yb                                   # direct (T, B, D) write
        pooled_ref[b:b + 1, :] = jnp.mean(act[b * T:(b + 1) * T, :],
                                          axis=0, keepdims=True)


# ----------------------------------------------------------------------------------
# wrapper: one pallas_call, no grid, everything VMEM-resident
# ----------------------------------------------------------------------------------
def a_encoder_forward(acoustic, params, *, num_heads):
    B, T, A = acoustic.shape
    D = params["wconv"].shape[-1]
    BT = B * T

    acoustic_flat = acoustic.reshape(BT, A)          # contiguous reshape, no HBM pass

    # Tiny static masks (constant-folded under jit): conv boundary masks and the
    # block-diagonal attention bias that keeps batch elements separate after folding.
    t_in = jnp.arange(BT) % T
    shift_mask = jnp.stack([t_in > 0, t_in < (T - 1)], axis=1).astype(jnp.float32)
    bid = jnp.arange(BT) // T
    attn_bias = jnp.where(bid[:, None] == bid[None, :], 0.0, -1e9).astype(jnp.float32)

    kern = functools.partial(a_encoder_kernel,
                             num_heads=num_heads, embed_scale=math.sqrt(D))
    pooled, outputa = pl.pallas_call(
        kern,
        out_shape=(jax.ShapeDtypeStruct((B, D), jnp.float32),
                   jax.ShapeDtypeStruct((T, B, D), jnp.float32)),
    )(acoustic_flat, params["wconv"], params["pos"], shift_mask, attn_bias,
      params["wqkvo"], params["vecs"], params["w1"], params["b1"], params["w2"],
      params["lnf"])

    return pooled, outputa                            # (B, d_l), (T, B, d_l)


# ----------------------------------------------------------------------------------
# pure-JAX reference (mirrors the kernel math exactly; high-precision matmuls)
# ----------------------------------------------------------------------------------
def reference_forward(acoustic, params, *, num_heads):
    mm = functools.partial(jnp.dot, precision=jax.lax.Precision.HIGHEST)
    B, T, A = acoustic.shape
    D = params["wconv"].shape[-1]
    L = params["wqkvo"].shape[0]
    hd = D // num_heads
    scale = 1.0 / math.sqrt(hd)
    embed_scale = math.sqrt(D)
    xpad = jnp.pad(acoustic, ((0, 0), (1, 1), (0, 0)))

    pooled_all, outa_all = [], []
    for b in range(B):
        xp = xpad[b]
        proj = (mm(xp[0:T], params["wconv"][0])
                + mm(xp[1:T + 1], params["wconv"][1])
                + mm(xp[2:T + 2], params["wconv"][2]))
        x = embed_scale * proj + params["pos"]
        for l in range(L):
            vec = params["vecs"][l]
            wqkvo = params["wqkvo"][l]
            y = _layer_norm(x, vec[0:1], vec[1:2])
            q = mm(y, wqkvo[0]) + vec[2:3]
            k = mm(y, wqkvo[1]) + vec[3:4]
            v = mm(y, wqkvo[2]) + vec[4:5]
            heads = []
            for h in range(num_heads):
                sl = slice(h * hd, (h + 1) * hd)
                s = mm(q[:, sl] * scale, k[:, sl].T)
                s = s - jnp.max(s, axis=-1, keepdims=True)
                p = jnp.exp(s)
                p = p / jnp.sum(p, axis=-1, keepdims=True)
                heads.append(mm(p, v[:, sl]))
            attn = mm(jnp.concatenate(heads, axis=-1), wqkvo[3]) + vec[5:6]
            x = x + attn
            z = _layer_norm(x, vec[6:7], vec[7:8])
            hdn = jnp.maximum(mm(z, params["w1"][l]) + params["b1"][l], 0.0)
            x = x + mm(hdn, params["w2"][l]) + vec[8:9]
        y = _layer_norm(x, params["lnf"][0:1], params["lnf"][1:2])
        pooled_all.append(jnp.mean(jnp.tanh(y), axis=0))
        outa_all.append(y)
    pooled = jnp.stack(pooled_all, axis=0)            # (B, D)
    outputa = jnp.stack(outa_all, axis=1)             # (T, B, D)
    return pooled, outputa


# ----------------------------------------------------------------------------------
# deterministic parameter construction (weights stacked across layers)
# ----------------------------------------------------------------------------------
def init_params(key, *, acoustic_dim, d_l, num_layers, seq_len):
    d_ff = 4 * d_l
    keys = jax.random.split(key, 1 + num_layers)
    bnd_conv = 1.0 / math.sqrt(3 * acoustic_dim)
    wconv = jax.random.uniform(keys[0], (3, acoustic_dim, d_l), jnp.float32,
                               -bnd_conv, bnd_conv)
    bnd = 1.0 / math.sqrt(d_l)
    bnd_ff = 1.0 / math.sqrt(d_ff)
    wqkvo_l, vecs_l, w1_l, b1_l, w2_l = [], [], [], [], []
    for i in range(num_layers):
        kk = jax.random.split(keys[1 + i], 6)
        wqkvo_l.append(jax.random.uniform(kk[0], (4, d_l, d_l), jnp.float32, -bnd, bnd))
        attn_b = jax.random.uniform(kk[1], (4, d_l), jnp.float32, -bnd, bnd)
        b2 = jax.random.uniform(kk[2], (1, d_l), jnp.float32, -bnd_ff, bnd_ff)
        vecs_l.append(jnp.concatenate([
            jnp.ones((1, d_l), jnp.float32),    # ln1 gamma
            jnp.zeros((1, d_l), jnp.float32),   # ln1 beta
            attn_b,                             # bq, bk, bv, bo
            jnp.ones((1, d_l), jnp.float32),    # ln2 gamma
            jnp.zeros((1, d_l), jnp.float32),   # ln2 beta
            b2,                                 # fc2 bias
        ], axis=0))                             # (9, d_l)
        w1_l.append(jax.random.uniform(kk[3], (d_l, d_ff), jnp.float32, -bnd, bnd))
        b1_l.append(jax.random.uniform(kk[4], (1, d_ff), jnp.float32, -bnd, bnd))
        w2_l.append(jax.random.uniform(kk[5], (d_ff, d_l), jnp.float32, -bnd_ff, bnd_ff))
    lnf = jnp.concatenate([jnp.ones((1, d_l), jnp.float32),
                           jnp.zeros((1, d_l), jnp.float32)], axis=0)
    pos = sinusoidal_pos_emb(seq_len, d_l)
    return dict(wconv=wconv, pos=pos, lnf=lnf,
                wqkvo=jnp.stack(wqkvo_l), vecs=jnp.stack(vecs_l),
                w1=jnp.stack(w1_l), b1=jnp.stack(b1_l), w2=jnp.stack(w2_l))


if __name__ == "__main__":
    # Small shapes consistent with the module: num_heads=5 requires d_l % 5 == 0.
    B, T, A, D, H, L = 2, 8, 74, 40, 5, 3   # batch, seq, ACOUSTIC_DIM, d_l, heads, layers
    assert D % H == 0

    key = jax.random.PRNGKey(0)
    kx, kp = jax.random.split(key)
    acoustic = jax.random.normal(kx, (B, T, A), dtype=jnp.float32)
    params = init_params(kp, acoustic_dim=A, d_l=D, num_layers=L, seq_len=T)

    fwd = jax.jit(functools.partial(a_encoder_forward, num_heads=H))
    pooled, outputa = fwd(acoustic, params)
    jax.block_until_ready((pooled, outputa))

    pooled_ref, outputa_ref = reference_forward(acoustic, params, num_heads=H)
    assert pooled.shape == (B, D)
    assert outputa.shape == (T, B, D)
    # tolerance slightly relaxed vs f32 epsilon: softmax uses the EUP approx reciprocal
    assert jnp.allclose(pooled, pooled_ref, atol=2e-3, rtol=2e-3), "pooled mismatch"
    assert jnp.allclose(outputa, outputa_ref, atol=2e-3, rtol=2e-3), "outputa mismatch"

    print("KERNEL_OK")
</pallas_src>

<mosaic_0001>
module attributes {stable_mosaic.version = 11 : i64} {
  func.func @a_encoder_kernel(%arg0: memref<16x74xf32, #tpu.memory_space<vmem>>, %arg1: memref<3x74x40xf32, #tpu.memory_space<vmem>>, %arg2: memref<8x40xf32, #tpu.memory_space<vmem>>, %arg3: memref<16x2xf32, #tpu.memory_space<vmem>>, %arg4: memref<16x16xf32, #tpu.memory_space<vmem>>, %arg5: memref<3x4x40x40xf32, #tpu.memory_space<vmem>>, %arg6: memref<3x9x40xf32, #tpu.memory_space<vmem>>, %arg7: memref<3x40x160xf32, #tpu.memory_space<vmem>>, %arg8: memref<3x1x160xf32, #tpu.memory_space<vmem>>, %arg9: memref<3x160x40xf32, #tpu.memory_space<vmem>>, %arg10: memref<2x40xf32, #tpu.memory_space<vmem>>, %arg11: memref<2x40xf32, #tpu.memory_space<vmem>>, %arg12: memref<8x2x40xf32, #tpu.memory_space<vmem>>) attributes {dimension_semantics = [], scalar_prefetch = 0 : i64, scratch_operands = 0 : i64, tpu.core_type = #tpu.core_type<tc>} {
    %c0 = arith.constant 0 : index
    %c0_0 = arith.constant 0 : index
    %0 = vector.load %arg0[%c0, %c0_0] : memref<16x74xf32, #tpu.memory_space<vmem>>, vector<16x74xf32>
    %c0_1 = arith.constant 0 : index
    %c0_2 = arith.constant 0 : index
    %1 = vector.load %arg3[%c0_1, %c0_2] : memref<16x2xf32, #tpu.memory_space<vmem>>, vector<16x1xf32>
    %c0_3 = arith.constant 0 : index
    %c1 = arith.constant 1 : index
    %2 = vector.load %arg3[%c0_3, %c1] : memref<16x2xf32, #tpu.memory_space<vmem>>, vector<16x1xf32>
    %3 = vector.extract_strided_slice %0 {offsets = [0, 0], sizes = [1, 74], strides = [1, 1]} : vector<16x74xf32> to vector<1x74xf32>
    %4 = vector.extract_strided_slice %0 {offsets = [0, 0], sizes = [15, 74], strides = [1, 1]} : vector<16x74xf32> to vector<15x74xf32>
    %5 = tpu.concatenate %3, %4 in 0 : vector<1x74xf32>, vector<15x74xf32> -> vector<16x74xf32>
    %6 = vector.broadcast %1 : vector<16x1xf32> to vector<16x74xf32>
    %7 = arith.mulf %5, %6 : vector<16x74xf32>
    %8 = vector.extract_strided_slice %0 {offsets = [1, 0], sizes = [15, 74], strides = [1, 1]} : vector<16x74xf32> to vector<15x74xf32>
    %9 = vector.extract_strided_slice %0 {offsets = [15, 0], sizes = [1, 74], strides = [1, 1]} : vector<16x74xf32> to vector<1x74xf32>
    %10 = tpu.concatenate %8, %9 in 0 : vector<15x74xf32>, vector<1x74xf32> -> vector<16x74xf32>
    %11 = vector.broadcast %2 : vector<16x1xf32> to vector<16x74xf32>
    %12 = arith.mulf %10, %11 : vector<16x74xf32>
    %c0_4 = arith.constant 0 : index
    %c0_5 = arith.constant 0 : index
    %c0_6 = arith.constant 0 : index
    %13 = vector.load %arg1[%c0_4, %c0_5, %c0_6] : memref<3x74x40xf32, #tpu.memory_space<vmem>>, vector<1x74x40xf32>
    %14 = vector.shape_cast %13 : vector<1x74x40xf32> to vector<74x40xf32>
    %cst = arith.constant dense<0.000000e+00> : vector<16x40xf32>
    %15 = tpu.matmul %7, %14, %cst {dimension_numbers = #tpu.dot_dimension_numbers<[1], [0], [0], [1], [0, 0, 1, 1], [], []>} : vector<16x74xf32>, vector<74x40xf32>, vector<16x40xf32> -> vector<16x40xf32>
    %c1_7 = arith.constant 1 : index
    %c0_8 = arith.constant 0 : index
    %c0_9 = arith.constant 0 : index
    %16 = vector.load %arg1[%c1_7, %c0_8, %c0_9] : memref<3x74x40xf32, #tpu.memory_space<vmem>>, vector<1x74x40xf32>
    %17 = vector.shape_cast %16 : vector<1x74x40xf32> to vector<74x40xf32>
    %cst_10 = arith.constant dense<0.000000e+00> : vector<16x40xf32>
    %18 = tpu.matmul %0, %17, %cst_10 {dimension_numbers = #tpu.dot_dimension_numbers<[1], [0], [0], [1], [0, 0, 1, 1], [], []>} : vector<16x74xf32>, vector<74x40xf32>, vector<16x40xf32> -> vector<16x40xf32>
    %19 = arith.addf %15, %18 : vector<16x40xf32>
    %c2 = arith.constant 2 : index
    %c0_11 = arith.constant 0 : index
    %c0_12 = arith.constant 0 : index
    %20 = vector.load %arg1[%c2, %c0_11, %c0_12] : memref<3x74x40xf32, #tpu.memory_space<vmem>>, vector<1x74x40xf32>
    %21 = vector.shape_cast %20 : vector<1x74x40xf32> to vector<74x40xf32>
    %cst_13 = arith.constant dense<0.000000e+00> : vector<16x40xf32>
    %22 = tpu.matmul %12, %21, %cst_13 {dimension_numbers = #tpu.dot_dimension_numbers<[1], [0], [0], [1], [0, 0, 1, 1], [], []>} : vector<16x74xf32>, vector<74x40xf32>, vector<16x40xf32> -> vector<16x40xf32>
    %23 = arith.addf %19, %22 : vector<16x40xf32>
    %c0_14 = arith.constant 0 : index
    %c0_15 = arith.constant 0 : index
    %24 = vector.load %arg2[%c0_14, %c0_15] : memref<8x40xf32, #tpu.memory_space<vmem>>, vector<8x40xf32>
    %25 = tpu.concatenate %24, %24 in 0 : vector<8x40xf32>, vector<8x40xf32> -> vector<16x40xf32>
    %cst_16 = arith.constant 6.32455539 : f32
    %26 = vector.broadcast %cst_16 : f32 to vector<16x40xf32>
    %27 = arith.mulf %26, %23 : vector<16x40xf32>
    %28 = arith.addf %27, %25 : vector<16x40xf32>
    %c0_17 = arith.constant 0 : index
    %c0_18 = arith.constant 0 : index
    %29 = vector.load %arg4[%c0_17, %c0_18] : memref<16x16xf32, #tpu.memory_space<vmem>>, vector<16x16xf32>
    %30 = tpu.iota {dimensions = array<i32: 1>} : vector<16x40xi32>
    %c0_19 = arith.constant 0 : index
    %c0_20 = arith.constant 0 : index
    %c0_21 = arith.constant 0 : index
    %31 = vector.load %arg6[%c0_19, %c0_20, %c0_21] : memref<3x9x40xf32, #tpu.memory_space<vmem>>, vector<1x1x40xf32>
    %32 = vector.shape_cast %31 : vector<1x1x40xf32> to vector<1x40xf32>
    %c0_22 = arith.constant 0 : index
    %c1_23 = arith.constant 1 : index
    %c0_24 = arith.constant 0 : index
    %33 = vector.load %arg6[%c0_22, %c1_23, %c0_24] : memref<3x9x40xf32, #tpu.memory_space<vmem>>, vector<1x1x40xf32>
    %34 = vector.shape_cast %33 : vector<1x1x40xf32> to vector<1x40xf32>
    %cst_25 = arith.constant dense<0.000000e+00> : vector<16xf32>
    %35 = vector.multi_reduction <add>, %28, %cst_25 [1] : vector<16x40xf32> to vector<16xf32>
    %36 = vector.shape_cast %35 : vector<16xf32> to vector<16x1xf32>
    %cst_26 = arith.constant 4.000000e+01 : f32
    %37 = vector.broadcast %cst_26 : f32 to vector<16x1xf32>
    %38 = arith.divf %36, %37 : vector<16x1xf32>
    %39 = vector.broadcast %38 : vector<16x1xf32> to vector<16x40xf32>
    %40 = arith.subf %28, %39 : vector<16x40xf32>
    %41 = arith.mulf %40, %40 : vector<16x40xf32>
    %cst_27 = arith.constant dense<0.000000e+00> : vector<16xf32>
    %42 = vector.multi_reduction <add>, %41, %cst_27 [1] : vector<16x40xf32> to vector<16xf32>
    %43 = vector.shape_cast %42 : vector<16xf32> to vector<16x1xf32>
    %cst_28 = arith.constant 4.000000e+01 : f32
    %44 = vector.broadcast %cst_28 : f32 to vector<16x1xf32>
    %45 = arith.divf %43, %44 : vector<16x1xf32>
    %cst_29 = arith.constant 9.99999974E-6 : f32
    %46 = vector.broadcast %cst_29 : f32 to vector<16x1xf32>
    %47 = arith.addf %45, %46 : vector<16x1xf32>
    %48 = math.rsqrt %47 : vector<16x1xf32>
    %49 = vector.broadcast %48 : vector<16x1xf32> to vector<16x40xf32>
    %50 = arith.mulf %40, %49 : vector<16x40xf32>
    %51 = vector.broadcast %32 : vector<1x40xf32> to vector<16x40xf32>
    %52 = arith.mulf %50, %51 : vector<16x40xf32>
    %53 = vector.broadcast %34 : vector<1x40xf32> to vector<16x40xf32>
    %54 = arith.addf %52, %53 : vector<16x40xf32>
    %c0_30 = arith.constant 0 : index
    %c0_31 = arith.constant 0 : index
    %c0_32 = arith.constant 0 : index
    %c0_33 = arith.constant 0 : index
    %55 = vector.load %arg5[%c0_30, %c0_31, %c0_32, %c0_33] : memref<3x4x40x40xf32, #tpu.memory_space<vmem>>, vector<1x1x40x40xf32>
    %56 = vector.shape_cast %55 : vector<1x1x40x40xf32> to vector<40x40xf32>
    %cst_34 = arith.constant dense<0.000000e+00> : vector<16x40xf32>
    %57 = tpu.matmul %54, %56, %cst_34 {dimension_numbers = #tpu.dot_dimension_numbers<[1], [0], [0], [1], [0, 0, 1, 1], [], []>} : vector<16x40xf32>, vector<40x40xf32>, vector<16x40xf32> -> vector<16x40xf32>
    %c0_35 = arith.constant 0 : index
    %c2_36 = arith.constant 2 : index
    %c0_37 = arith.constant 0 : index
    %58 = vector.load %arg6[%c0_35, %c2_36, %c0_37] : memref<3x9x40xf32, #tpu.memory_space<vmem>>, vector<1x1x40xf32>
    %59 = vector.shape_cast %58 : vector<1x1x40xf32> to vector<1x40xf32>
    %60 = vector.broadcast %59 : vector<1x40xf32> to vector<16x40xf32>
    %61 = arith.addf %57, %60 : vector<16x40xf32>
    %c0_38 = arith.constant 0 : index
    %c1_39 = arith.constant 1 : index
    %c0_40 = arith.constant 0 : index
    %c0_41 = arith.constant 0 : index
    %62 = vector.load %arg5[%c0_38, %c1_39, %c0_40, %c0_41] : memref<3x4x40x40xf32, #tpu.memory_space<vmem>>, vector<1x1x40x40xf32>
    %63 = vector.shape_cast %62 : vector<1x1x40x40xf32> to vector<40x40xf32>
    %cst_42 = arith.constant dense<0.000000e+00> : vector<16x40xf32>
    %64 = tpu.matmul %54, %63, %cst_42 {dimension_numbers = #tpu.dot_dimension_numbers<[1], [0], [0], [1], [0, 0, 1, 1], [], []>} : vector<16x40xf32>, vector<40x40xf32>, vector<16x40xf32> -> vector<16x40xf32>
    %c0_43 = arith.constant 0 : index
    %c3 = arith.constant 3 : index
    %c0_44 = arith.constant 0 : index
    %65 = vector.load %arg6[%c0_43, %c3, %c0_44] : memref<3x9x40xf32, #tpu.memory_space<vmem>>, vector<1x1x40xf32>
    %66 = vector.shape_cast %65 : vector<1x1x40xf32> to vector<1x40xf32>
    %67 = vector.broadcast %66 : vector<1x40xf32> to vector<16x40xf32>
    %68 = arith.addf %64, %67 : vector<16x40xf32>
    %c0_45 = arith.constant 0 : index
    %c2_46 = arith.constant 2 : index
    %c0_47 = arith.constant 0 : index
    %c0_48 = arith.constant 0 : index
    %69 = vector.load %arg5[%c0_45, %c2_46, %c0_47, %c0_48] : memref<3x4x40x40xf32, #tpu.memory_space<vmem>>, vector<1x1x40x40xf32>
    %70 = vector.shape_cast %69 : vector<1x1x40x40xf32> to vector<40x40xf32>
    %cst_49 = arith.constant dense<0.000000e+00> : vector<16x40xf32>
    %71 = tpu.matmul %54, %70, %cst_49 {dimension_numbers = #tpu.dot_dimension_numbers<[1], [0], [0], [1], [0, 0, 1, 1], [], []>} : vector<16x40xf32>, vector<40x40xf32>, vector<16x40xf32> -> vector<16x40xf32>
    %c0_50 = arith.constant 0 : index
    %c4 = arith.constant 4 : index
    %c0_51 = arith.constant 0 : index
    %72 = vector.load %arg6[%c0_50, %c4, %c0_51] : memref<3x9x40xf32, #tpu.memory_space<vmem>>, vector<1x1x40xf32>
    %73 = vector.shape_cast %72 : vector<1x1x40xf32> to vector<1x40xf32>
    %74 = vector.broadcast %73 : vector<1x40xf32> to vector<16x40xf32>
    %75 = arith.addf %71, %74 : vector<16x40xf32>
    %cst_52 = arith.constant 0.353553385 : f32
    %76 = vector.broadcast %cst_52 : f32 to vector<16x40xf32>
    %77 = arith.mulf %61, %76 : vector<16x40xf32>
    %cst_53 = arith.constant 0.000000e+00 : f32
    %78 = vector.broadcast %cst_53 : f32 to vector<16x40xf32>
    %c0_i32 = arith.constant 0 : i32
    %79 = vector.broadcast %c0_i32 : i32 to vector<16x40xi32>
    %80 = arith.cmpi sge, %30, %79 : vector<16x40xi32>
    %c8_i32 = arith.constant 8 : i32
    %81 = vector.broadcast %c8_i32 : i32 to vector<16x40xi32>
    %82 = arith.cmpi slt, %30, %81 : vector<16x40xi32>
    %83 = arith.andi %80, %82 : vector<16x40xi1>
    %cst_54 = arith.constant 0.000000e+00 : f32
    %84 = vector.broadcast %cst_54 : f32 to vector<16x40xf32>
    %85 = arith.select %83, %68, %84 : vector<16x40xi1>, vector<16x40xf32>
    %cst_55 = arith.constant 0.000000e+00 : f32
    %86 = vector.broadcast %cst_55 : f32 to vector<16x40xf32>
    %87 = arith.select %83, %75, %86 : vector<16x40xi1>, vector<16x40xf32>
    %cst_56 = arith.constant dense<0.000000e+00> : vector<16x16xf32>
    %88 = tpu.matmul %77, %85, %cst_56 {dimension_numbers = #tpu.dot_dimension_numbers<[1], [1], [0], [0], [0, 0, 1, 0], [], []>} : vector<16x40xf32>, vector<16x40xf32>, vector<16x16xf32> -> vector<16x16xf32>
    %89 = arith.addf %88, %29 : vector<16x16xf32>
    %cst_57 = arith.constant dense<0xFF800000> : vector<16xf32>
    %90 = vector.multi_reduction <maximumf>, %89, %cst_57 [1] : vector<16x16xf32> to vector<16xf32>
    %91 = vector.shape_cast %90 : vector<16xf32> to vector<16x1xf32>
    %92 = vector.broadcast %91 : vector<16x1xf32> to vector<16x16xf32>
    %93 = arith.subf %89, %92 : vector<16x16xf32>
    %94 = math.exp %93 : vector<16x16xf32>
    %cst_58 = arith.constant dense<0.000000e+00> : vector<16xf32>
    %95 = vector.multi_reduction <add>, %94, %cst_58 [1] : vector<16x16xf32> to vector<16xf32>
    %96 = vector.shape_cast %95 : vector<16xf32> to vector<16x1xf32>
    %97 = tpu.reciprocal %96 {approx = true} : vector<16x1xf32> -> vector<16x1xf32>
    %98 = vector.broadcast %97 : vector<16x1xf32> to vector<16x16xf32>
    %99 = arith.mulf %94, %98 : vector<16x16xf32>
    %cst_59 = arith.constant dense<0.000000e+00> : vector<16x40xf32>
    %100 = tpu.matmul %99, %87, %cst_59 {dimension_numbers = #tpu.dot_dimension_numbers<[1], [0], [0], [1], [0, 0, 1, 1], [], []>} : vector<16x16xf32>, vector<16x40xf32>, vector<16x40xf32> -> vector<16x40xf32>
    %101 = arith.addf %78, %100 : vector<16x40xf32>
    %c8_i32_60 = arith.constant 8 : i32
    %102 = vector.broadcast %c8_i32_60 : i32 to vector<16x40xi32>
    %103 = arith.cmpi sge, %30, %102 : vector<16x40xi32>
    %c16_i32 = arith.constant 16 : i32
    %104 = vector.broadcast %c16_i32 : i32 to vector<16x40xi32>
    %105 = arith.cmpi slt, %30, %104 : vector<16x40xi32>
    %106 = arith.andi %103, %105 : vector<16x40xi1>
    %cst_61 = arith.constant 0.000000e+00 : f32
    %107 = vector.broadcast %cst_61 : f32 to vector<16x40xf32>
    %108 = arith.select %106, %68, %107 : vector<16x40xi1>, vector<16x40xf32>
    %cst_62 = arith.constant 0.000000e+00 : f32
    %109 = vector.broadcast %cst_62 : f32 to vector<16x40xf32>
    %110 = arith.select %106, %75, %109 : vector<16x40xi1>, vector<16x40xf32>
    %cst_63 = arith.constant dense<0.000000e+00> : vector<16x16xf32>
    %111 = tpu.matmul %77, %108, %cst_63 {dimension_numbers = #tpu.dot_dimension_numbers<[1], [1], [0], [0], [0, 0, 1, 0], [], []>} : vector<16x40xf32>, vector<16x40xf32>, vector<16x16xf32> -> vector<16x16xf32>
    %112 = arith.addf %111, %29 : vector<16x16xf32>
    %cst_64 = arith.constant dense<0xFF800000> : vector<16xf32>
    %113 = vector.multi_reduction <maximumf>, %112, %cst_64 [1] : vector<16x16xf32> to vector<16xf32>
    %114 = vector.shape_cast %113 : vector<16xf32> to vector<16x1xf32>
    %115 = vector.broadcast %114 : vector<16x1xf32> to vector<16x16xf32>
    %116 = arith.subf %112, %115 : vector<16x16xf32>
    %117 = math.exp %116 : vector<16x16xf32>
    %cst_65 = arith.constant dense<0.000000e+00> : vector<16xf32>
    %118 = vector.multi_reduction <add>, %117, %cst_65 [1] : vector<16x16xf32> to vector<16xf32>
    %119 = vector.shape_cast %118 : vector<16xf32> to vector<16x1xf32>
    %120 = tpu.reciprocal %119 {approx = true} : vector<16x1xf32> -> vector<16x1xf32>
    %121 = vector.broadcast %120 : vector<16x1xf32> to vector<16x16xf32>
    %122 = arith.mulf %117, %121 : vector<16x16xf32>
    %cst_66 = arith.constant dense<0.000000e+00> : vector<16x40xf32>
    %123 = tpu.matmul %122, %110, %cst_66 {dimension_numbers = #tpu.dot_dimension_numbers<[1], [0], [0], [1], [0, 0, 1, 1], [], []>} : vector<16x16xf32>, vector<16x40xf32>, vector<16x40xf32> -> vector<16x40xf32>
    %124 = arith.addf %101, %123 : vector<16x40xf32>
    %c16_i32_67 = arith.constant 16 : i32
    %125 = vector.broadcast %c16_i32_67 : i32 to vector<16x40xi32>
    %126 = arith.cmpi sge, %30, %125 : vector<16x40xi32>
    %c24_i32 = arith.constant 24 : i32
    %127 = vector.broadcast %c24_i32 : i32 to vector<16x40xi32>
    %128 = arith.cmpi slt, %30, %127 : vector<16x40xi32>
    %129 = arith.andi %126, %128 : vector<16x40xi1>
    %cst_68 = arith.constant 0.000000e+00 : f32
    %130 = vector.broadcast %cst_68 : f32 to vector<16x40xf32>
    %131 = arith.select %129, %68, %130 : vector<16x40xi1>, vector<16x40xf32>
    %cst_69 = arith.constant 0.000000e+00 : f32
    %132 = vector.broadcast %cst_69 : f32 to vector<16x40xf32>
    %133 = arith.select %129, %75, %132 : vector<16x40xi1>, vector<16x40xf32>
    %cst_70 = arith.constant dense<0.000000e+00> : vector<16x16xf32>
    %134 = tpu.matmul %77, %131, %cst_70 {dimension_numbers = #tpu.dot_dimension_numbers<[1], [1], [0], [0], [0, 0, 1, 0], [], []>} : vector<16x40xf32>, vector<16x40xf32>, vector<16x16xf32> -> vector<16x16xf32>
    %135 = arith.addf %134, %29 : vector<16x16xf32>
    %cst_71 = arith.constant dense<0xFF800000> : vector<16xf32>
    %136 = vector.multi_reduction <maximumf>, %135, %cst_71 [1] : vector<16x16xf32> to vector<16xf32>
    %137 = vector.shape_cast %136 : vector<16xf32> to vector<16x1xf32>
    %138 = vector.broadcast %137 : vector<16x1xf32> to vector<16x16xf32>
    %139 = arith.subf %135, %138 : vector<16x16xf32>
    %140 = math.exp %139 : vector<16x16xf32>
    %cst_72 = arith.constant dense<0.000000e+00> : vector<16xf32>
    %141 = vector.multi_reduction <add>, %140, %cst_72 [1] : vector<16x16xf32> to vector<16xf32>
    %142 = vector.shape_cast %141 : vector<16xf32> to vector<16x1xf32>
    %143 = tpu.reciprocal %142 {approx = true} : vector<16x1xf32> -> vector<16x1xf32>
    %144 = vector.broadcast %143 : vector<16x1xf32> to vector<16x16xf32>
    %145 = arith.mulf %140, %144 : vector<16x16xf32>
    %cst_73 = arith.constant dense<0.000000e+00> : vector<16x40xf32>
    %146 = tpu.matmul %145, %133, %cst_73 {dimension_numbers = #tpu.dot_dimension_numbers<[1], [0], [0], [1], [0, 0, 1, 1], [], []>} : vector<16x16xf32>, vector<16x40xf32>, vector<16x40xf32> -> vector<16x40xf32>
    %147 = arith.addf %124, %146 : vector<16x40xf32>
    %c24_i32_74 = arith.constant 24 : i32
    %148 = vector.broadcast %c24_i32_74 : i32 to vector<16x40xi32>
    %149 = arith.cmpi sge, %30, %148 : vector<16x40xi32>
    %c32_i32 = arith.constant 32 : i32
    %150 = vector.broadcast %c32_i32 : i32 to vector<16x40xi32>
    %151 = arith.cmpi slt, %30, %150 : vector<16x40xi32>
    %152 = arith.andi %149, %151 : vector<16x40xi1>
    %cst_75 = arith.constant 0.000000e+00 : f32
    %153 = vector.broadcast %cst_75 : f32 to vector<16x40xf32>
    %154 = arith.select %152, %68, %153 : vector<16x40xi1>, vector<16x40xf32>
    %cst_76 = arith.constant 0.000000e+00 : f32
    %155 = vector.broadcast %cst_76 : f32 to vector<16x40xf32>
    %156 = arith.select %152, %75, %155 : vector<16x40xi1>, vector<16x40xf32>
    %cst_77 = arith.constant dense<0.000000e+00> : vector<16x16xf32>
    %157 = tpu.matmul %77, %154, %cst_77 {dimension_numbers = #tpu.dot_dimension_numbers<[1], [1], [0], [0], [0, 0, 1, 0], [], []>} : vector<16x40xf32>, vector<16x40xf32>, vector<16x16xf32> -> vector<16x16xf32>
    %158 = arith.addf %157, %29 : vector<16x16xf32>
    %cst_78 = arith.constant dense<0xFF800000> : vector<16xf32>
    %159 = vector.multi_reduction <maximumf>, %158, %cst_78 [1] : vector<16x16xf32> to vector<16xf32>
    %160 = vector.shape_cast %159 : vector<16xf32> to vector<16x1xf32>
    %161 = vector.broadcast %160 : vector<16x1xf32> to vector<16x16xf32>
    %162 = arith.subf %158, %161 : vector<16x16xf32>
    %163 = math.exp %162 : vector<16x16xf32>
    %cst_79 = arith.constant dense<0.000000e+00> : vector<16xf32>
    %164 = vector.multi_reduction <add>, %163, %cst_79 [1] : vector<16x16xf32> to vector<16xf32>
    %165 = vector.shape_cast %164 : vector<16xf32> to vector<16x1xf32>
    %166 = tpu.reciprocal %165 {approx = true} : vector<16x1xf32> -> vector<16x1xf32>
    %167 = vector.broadcast %166 : vector<16x1xf32> to vector<16x16xf32>
    %168 = arith.mulf %163, %167 : vector<16x16xf32>
    %cst_80 = arith.constant dense<0.000000e+00> : vector<16x40xf32>
    %169 = tpu.matmul %168, %156, %cst_80 {dimension_numbers = #tpu.dot_dimension_numbers<[1], [0], [0], [1], [0, 0, 1, 1], [], []>} : vector<16x16xf32>, vector<16x40xf32>, vector<16x40xf32> -> vector<16x40xf32>
    %170 = arith.addf %147, %169 : vector<16x40xf32>
    %c32_i32_81 = arith.constant 32 : i32
    %171 = vector.broadcast %c32_i32_81 : i32 to vector<16x40xi32>
    %172 = arith.cmpi sge, %30, %171 : vector<16x40xi32>
    %c40_i32 = arith.constant 40 : i32
    %173 = vector.broadcast %c40_i32 : i32 to vector<16x40xi32>
    %174 = arith.cmpi slt, %30, %173 : vector<16x40xi32>
    %175 = arith.andi %172, %174 : vector<16x40xi1>
    %cst_82 = arith.constant 0.000000e+00 : f32
    %176 = vector.broadcast %cst_82 : f32 to vector<16x40xf32>
    %177 = arith.select %175, %68, %176 : vector<16x40xi1>, vector<16x40xf32>
    %cst_83 = arith.constant 0.000000e+00 : f32
    %178 = vector.broadcast %cst_83 : f32 to vector<16x40xf32>
    %179 = arith.select %175, %75, %178 : vector<16x40xi1>, vector<16x40xf32>
    %cst_84 = arith.constant dense<0.000000e+00> : vector<16x16xf32>
    %180 = tpu.matmul %77, %177, %cst_84 {dimension_numbers = #tpu.dot_dimension_numbers<[1], [1], [0], [0], [0, 0, 1, 0], [], []>} : vector<16x40xf32>, vector<16x40xf32>, vector<16x16xf32> -> vector<16x16xf32>
    %181 = arith.addf %180, %29 : vector<16x16xf32>
    %cst_85 = arith.constant dense<0xFF800000> : vector<16xf32>
    %182 = vector.multi_reduction <maximumf>, %181, %cst_85 [1] : vector<16x16xf32> to vector<16xf32>
    %183 = vector.shape_cast %182 : vector<16xf32> to vector<16x1xf32>
    %184 = vector.broadcast %183 : vector<16x1xf32> to vector<16x16xf32>
    %185 = arith.subf %181, %184 : vector<16x16xf32>
    %186 = math.exp %185 : vector<16x16xf32>
    %cst_86 = arith.constant dense<0.000000e+00> : vector<16xf32>
    %187 = vector.multi_reduction <add>, %186, %cst_86 [1] : vector<16x16xf32> to vector<16xf32>
    %188 = vector.shape_cast %187 : vector<16xf32> to vector<16x1xf32>
    %189 = tpu.reciprocal %188 {approx = true} : vector<16x1xf32> -> vector<16x1xf32>
    %190 = vector.broadcast %189 : vector<16x1xf32> to vector<16x16xf32>
    %191 = arith.mulf %186, %190 : vector<16x16xf32>
    %cst_87 = arith.constant dense<0.000000e+00> : vector<16x40xf32>
    %192 = tpu.matmul %191, %179, %cst_87 {dimension_numbers = #tpu.dot_dimension_numbers<[1], [0], [0], [1], [0, 0, 1, 1], [], []>} : vector<16x16xf32>, vector<16x40xf32>, vector<16x40xf32> -> vector<16x40xf32>
    %193 = arith.addf %170, %192 : vector<16x40xf32>
    %c0_88 = arith.constant 0 : index
    %c3_89 = arith.constant 3 : index
    %c0_90 = arith.constant 0 : index
    %c0_91 = arith.constant 0 : index
    %194 = vector.load %arg5[%c0_88, %c3_89, %c0_90, %c0_91] : memref<3x4x40x40xf32, #tpu.memory_space<vmem>>, vector<1x1x40x40xf32>
    %195 = vector.shape_cast %194 : vector<1x1x40x40xf32> to vector<40x40xf32>
    %cst_92 = arith.constant dense<0.000000e+00> : vector<16x40xf32>
    %196 = tpu.matmul %193, %195, %cst_92 {dimension_numbers = #tpu.dot_dimension_numbers<[1], [0], [0], [1], [0, 0, 1, 1], [], []>} : vector<16x40xf32>, vector<40x40xf32>, vector<16x40xf32> -> vector<16x40xf32>
    %c0_93 = arith.constant 0 : index
    %c5 = arith.constant 5 : index
    %c0_94 = arith.constant 0 : index
    %197 = vector.load %arg6[%c0_93, %c5, %c0_94] : memref<3x9x40xf32, #tpu.memory_space<vmem>>, vector<1x1x40xf32>
    %198 = vector.shape_cast %197 : vector<1x1x40xf32> to vector<1x40xf32>
    %199 = vector.broadcast %198 : vector<1x40xf32> to vector<16x40xf32>
    %200 = arith.addf %196, %199 : vector<16x40xf32>
    %201 = arith.addf %28, %200 : vector<16x40xf32>
    %c0_95 = arith.constant 0 : index
    %c6 = arith.constant 6 : index
    %c0_96 = arith.constant 0 : index
    %202 = vector.load %arg6[%c0_95, %c6, %c0_96] : memref<3x9x40xf32, #tpu.memory_space<vmem>>, vector<1x1x40xf32>
    %203 = vector.shape_cast %202 : vector<1x1x40xf32> to vector<1x40xf32>
    %c0_97 = arith.constant 0 : index
    %c7 = arith.constant 7 : index
    %c0_98 = arith.constant 0 : index
    %204 = vector.load %arg6[%c0_97, %c7, %c0_98] : memref<3x9x40xf32, #tpu.memory_space<vmem>>, vector<1x1x40xf32>
    %205 = vector.shape_cast %204 : vector<1x1x40xf32> to vector<1x40xf32>
    %cst_99 = arith.constant dense<0.000000e+00> : vector<16xf32>
    %206 = vector.multi_reduction <add>, %201, %cst_99 [1] : vector<16x40xf32> to vector<16xf32>
    %207 = vector.shape_cast %206 : vector<16xf32> to vector<16x1xf32>
    %cst_100 = arith.constant 4.000000e+01 : f32
    %208 = vector.broadcast %cst_100 : f32 to vector<16x1xf32>
    %209 = arith.divf %207, %208 : vector<16x1xf32>
    %210 = vector.broadcast %209 : vector<16x1xf32> to vector<16x40xf32>
    %211 = arith.subf %201, %210 : vector<16x40xf32>
    %212 = arith.mulf %211, %211 : vector<16x40xf32>
    %cst_101 = arith.constant dense<0.000000e+00> : vector<16xf32>
    %213 = vector.multi_reduction <add>, %212, %cst_101 [1] : vector<16x40xf32> to vector<16xf32>
    %214 = vector.shape_cast %213 : vector<16xf32> to vector<16x1xf32>
    %cst_102 = arith.constant 4.000000e+01 : f32
    %215 = vector.broadcast %cst_102 : f32 to vector<16x1xf32>
    %216 = arith.divf %214, %215 : vector<16x1xf32>
    %cst_103 = arith.constant 9.99999974E-6 : f32
    %217 = vector.broadcast %cst_103 : f32 to vector<16x1xf32>
    %218 = arith.addf %216, %217 : vector<16x1xf32>
    %219 = math.rsqrt %218 : vector<16x1xf32>
    %220 = vector.broadcast %219 : vector<16x1xf32> to vector<16x40xf32>
    %221 = arith.mulf %211, %220 : vector<16x40xf32>
    %222 = vector.broadcast %203 : vector<1x40xf32> to vector<16x40xf32>
    %223 = arith.mulf %221, %222 : vector<16x40xf32>
    %224 = vector.broadcast %205 : vector<1x40xf32> to vector<16x40xf32>
    %225 = arith.addf %223, %224 : vector<16x40xf32>
    %c0_104 = arith.constant 0 : index
    %c0_105 = arith.constant 0 : index
    %c0_106 = arith.constant 0 : index
    %226 = vector.load %arg7[%c0_104, %c0_105, %c0_106] : memref<3x40x160xf32, #tpu.memory_space<vmem>>, vector<1x40x160xf32>
    %227 = vector.shape_cast %226 : vector<1x40x160xf32> to vector<40x160xf32>
    %cst_107 = arith.constant dense<0.000000e+00> : vector<16x160xf32>
    %228 = tpu.matmul %225, %227, %cst_107 {dimension_numbers = #tpu.dot_dimension_numbers<[1], [0], [0], [1], [0, 0, 1, 1], [], []>} : vector<16x40xf32>, vector<40x160xf32>, vector<16x160xf32> -> vector<16x160xf32>
    %c0_108 = arith.constant 0 : index
    %c0_109 = arith.constant 0 : index
    %c0_110 = arith.constant 0 : index
    %229 = vector.load %arg8[%c0_108, %c0_109, %c0_110] : memref<3x1x160xf32, #tpu.memory_space<vmem>>, vector<1x1x160xf32>
    %230 = vector.shape_cast %229 : vector<1x1x160xf32> to vector<1x160xf32>
    %231 = vector.broadcast %230 : vector<1x160xf32> to vector<16x160xf32>
    %232 = arith.addf %228, %231 : vector<16x160xf32>
    %cst_111 = arith.constant 0.000000e+00 : f32
    %233 = vector.broadcast %cst_111 : f32 to vector<16x160xf32>
    %234 = arith.maximumf %232, %233 : vector<16x160xf32>
    %c0_112 = arith.constant 0 : index
    %c0_113 = arith.constant 0 : index
    %c0_114 = arith.constant 0 : index
    %235 = vector.load %arg9[%c0_112, %c0_113, %c0_114] : memref<3x160x40xf32, #tpu.memory_space<vmem>>, vector<1x160x40xf32>
    %236 = vector.shape_cast %235 : vector<1x160x40xf32> to vector<160x40xf32>
    %cst_115 = arith.constant dense<0.000000e+00> : vector<16x40xf32>
    %237 = tpu.matmul %234, %236, %cst_115 {dimension_numbers = #tpu.dot_dimension_numbers<[1], [0], [0], [1], [0, 0, 1, 1], [], []>} : vector<16x160xf32>, vector<160x40xf32>, vector<16x40xf32> -> vector<16x40xf32>
    %238 = arith.addf %201, %237 : vector<16x40xf32>
    %c0_116 = arith.constant 0 : index
    %c8 = arith.constant 8 : index
    %c0_117 = arith.constant 0 : index
    %239 = vector.load %arg6[%c0_116, %c8, %c0_117] : memref<3x9x40xf32, #tpu.memory_space<vmem>>, vector<1x1x40xf32>
    %240 = vector.shape_cast %239 : vector<1x1x40xf32> to vector<1x40xf32>
    %241 = vector.broadcast %240 : vector<1x40xf32> to vector<16x40xf32>
    %242 = arith.addf %238, %241 : vector<16x40xf32>
    %c1_118 = arith.constant 1 : index
    %c0_119 = arith.constant 0 : index
    %c0_120 = arith.constant 0 : index
    %243 = vector.load %arg6[%c1_118, %c0_119, %c0_120] : memref<3x9x40xf32, #tpu.memory_space<vmem>>, vector<1x1x40xf32>
    %244 = vector.shape_cast %243 : vector<1x1x40xf32> to vector<1x40xf32>
    %c1_121 = arith.constant 1 : index
    %c1_122 = arith.constant 1 : index
    %c0_123 = arith.constant 0 : index
    %245 = vector.load %arg6[%c1_121, %c1_122, %c0_123] : memref<3x9x40xf32, #tpu.memory_space<vmem>>, vector<1x1x40xf32>
    %246 = vector.shape_cast %245 : vector<1x1x40xf32> to vector<1x40xf32>
    %cst_124 = arith.constant dense<0.000000e+00> : vector<16xf32>
    %247 = vector.multi_reduction <add>, %242, %cst_124 [1] : vector<16x40xf32> to vector<16xf32>
    %248 = vector.shape_cast %247 : vector<16xf32> to vector<16x1xf32>
    %cst_125 = arith.constant 4.000000e+01 : f32
    %249 = vector.broadcast %cst_125 : f32 to vector<16x1xf32>
    %250 = arith.divf %248, %249 : vector<16x1xf32>
    %251 = vector.broadcast %250 : vector<16x1xf32> to vector<16x40xf32>
    %252 = arith.subf %242, %251 : vector<16x40xf32>
    %253 = arith.mulf %252, %252 : vector<16x40xf32>
    %cst_126 = arith.constant dense<0.000000e+00> : vector<16xf32>
    %254 = vector.multi_reduction <add>, %253, %cst_126 [1] : vector<16x40xf32> to vector<16xf32>
    %255 = vector.shape_cast %254 : vector<16xf32> to vector<16x1xf32>
    %cst_127 = arith.constant 4.000000e+01 : f32
    %256 = vector.broadcast %cst_127 : f32 to vector<16x1xf32>
    %257 = arith.divf %255, %256 : vector<16x1xf32>
    %cst_128 = arith.constant 9.99999974E-6 : f32
    %258 = vector.broadcast %cst_128 : f32 to vector<16x1xf32>
    %259 = arith.addf %257, %258 : vector<16x1xf32>
    %260 = math.rsqrt %259 : vector<16x1xf32>
    %261 = vector.broadcast %260 : vector<16x1xf32> to vector<16x40xf32>
    %262 = arith.mulf %252, %261 : vector<16x40xf32>
    %263 = vector.broadcast %244 : vector<1x40xf32> to vector<16x40xf32>
    %264 = arith.mulf %262, %263 : vector<16x40xf32>
    %265 = vector.broadcast %246 : vector<1x40xf32> to vector<16x40xf32>
    %266 = arith.addf %264, %265 : vector<16x40xf32>
    %c1_129 = arith.constant 1 : index
    %c0_130 = arith.constant 0 : index
    %c0_131 = arith.constant 0 : index
    %c0_132 = arith.constant 0 : index
    %267 = vector.load %arg5[%c1_129, %c0_130, %c0_131, %c0_132] : memref<3x4x40x40xf32, #tpu.memory_space<vmem>>, vector<1x1x40x40xf32>
    %268 = vector.shape_cast %267 : vector<1x1x40x40xf32> to vector<40x40xf32>
    %cst_133 = arith.constant dense<0.000000e+00> : vector<16x40xf32>
    %269 = tpu.matmul %266, %268, %cst_133 {dimension_numbers = #tpu.dot_dimension_numbers<[1], [0], [0], [1], [0, 0, 1, 1], [], []>} : vector<16x40xf32>, vector<40x40xf32>, vector<16x40xf32> -> vector<16x40xf32>
    %c1_134 = arith.constant 1 : index
    %c2_135 = arith.constant 2 : index
    %c0_136 = arith.constant 0 : index
    %270 = vector.load %arg6[%c1_134, %c2_135, %c0_136] : memref<3x9x40xf32, #tpu.memory_space<vmem>>, vector<1x1x40xf32>
    %271 = vector.shape_cast %270 : vector<1x1x40xf32> to vector<1x40xf32>
    %272 = vector.broadcast %271 : vector<1x40xf32> to vector<16x40xf32>
    %273 = arith.addf %269, %272 : vector<16x40xf32>
    %c1_137 = arith.constant 1 : index
    %c1_138 = arith.constant 1 : index
    %c0_139 = arith.constant 0 : index
    %c0_140 = arith.constant 0 : index
    %274 = vector.load %arg5[%c1_137, %c1_138, %c0_139, %c0_140] : memref<3x4x40x40xf32, #tpu.memory_space<vmem>>, vector<1x1x40x40xf32>
    %275 = vector.shape_cast %274 : vector<1x1x40x40xf32> to vector<40x40xf32>
    %cst_141 = arith.constant dense<0.000000e+00> : vector<16x40xf32>
    %276 = tpu.matmul %266, %275, %cst_141 {dimension_numbers = #tpu.dot_dimension_numbers<[1], [0], [0], [1], [0, 0, 1, 1], [], []>} : vector<16x40xf32>, vector<40x40xf32>, vector<16x40xf32> -> vector<16x40xf32>
    %c1_142 = arith.constant 1 : index
    %c3_143 = arith.constant 3 : index
    %c0_144 = arith.constant 0 : index
    %277 = vector.load %arg6[%c1_142, %c3_143, %c0_144] : memref<3x9x40xf32, #tpu.memory_space<vmem>>, vector<1x1x40xf32>
    %278 = vector.shape_cast %277 : vector<1x1x40xf32> to vector<1x40xf32>
    %279 = vector.broadcast %278 : vector<1x40xf32> to vector<16x40xf32>
    %280 = arith.addf %276, %279 : vector<16x40xf32>
    %c1_145 = arith.constant 1 : index
    %c2_146 = arith.constant 2 : index
    %c0_147 = arith.constant 0 : index
    %c0_148 = arith.constant 0 : index
    %281 = vector.load %arg5[%c1_145, %c2_146, %c0_147, %c0_148] : memref<3x4x40x40xf32, #tpu.memory_space<vmem>>, vector<1x1x40x40xf32>
    %282 = vector.shape_cast %281 : vector<1x1x40x40xf32> to vector<40x40xf32>
    %cst_149 = arith.constant dense<0.000000e+00> : vector<16x40xf32>
    %283 = tpu.matmul %266, %282, %cst_149 {dimension_numbers = #tpu.dot_dimension_numbers<[1], [0], [0], [1], [0, 0, 1, 1], [], []>} : vector<16x40xf32>, vector<40x40xf32>, vector<16x40xf32> -> vector<16x40xf32>
    %c1_150 = arith.constant 1 : index
    %c4_151 = arith.constant 4 : index
    %c0_152 = arith.constant 0 : index
    %284 = vector.load %arg6[%c1_150, %c4_151, %c0_152] : memref<3x9x40xf32, #tpu.memory_space<vmem>>, vector<1x1x40xf32>
    %285 = vector.shape_cast %284 : vector<1x1x40xf32> to vector<1x40xf32>
    %286 = vector.broadcast %285 : vector<1x40xf32> to vector<16x40xf32>
    %287 = arith.addf %283, %286 : vector<16x40xf32>
    %cst_153 = arith.constant 0.353553385 : f32
    %288 = vector.broadcast %cst_153 : f32 to vector<16x40xf32>
    %289 = arith.mulf %273, %288 : vector<16x40xf32>
    %cst_154 = arith.constant 0.000000e+00 : f32
    %290 = vector.broadcast %cst_154 : f32 to vector<16x40xf32>
    %c0_i32_155 = arith.constant 0 : i32
    %291 = vector.broadcast %c0_i32_155 : i32 to vector<16x40xi32>
    %292 = arith.cmpi sge, %30, %291 : vector<16x40xi32>
    %c8_i32_156 = arith.constant 8 : i32
    %293 = vector.broadcast %c8_i32_156 : i32 to vector<16x40xi32>
    %294 = arith.cmpi slt, %30, %293 : vector<16x40xi32>
    %295 = arith.andi %292, %294 : vector<16x40xi1>
    %cst_157 = arith.constant 0.000000e+00 : f32
    %296 = vector.broadcast %cst_157 : f32 to vector<16x40xf32>
    %297 = arith.select %295, %280, %296 : vector<16x40xi1>, vector<16x40xf32>
    %cst_158 = arith.constant 0.000000e+00 : f32
    %298 = vector.broadcast %cst_158 : f32 to vector<16x40xf32>
    %299 = arith.select %295, %287, %298 : vector<16x40xi1>, vector<16x40xf32>
    %cst_159 = arith.constant dense<0.000000e+00> : vector<16x16xf32>
    %300 = tpu.matmul %289, %297, %cst_159 {dimension_numbers = #tpu.dot_dimension_numbers<[1], [1], [0], [0], [0, 0, 1, 0], [], []>} : vector<16x40xf32>, vector<16x40xf32>, vector<16x16xf32> -> vector<16x16xf32>
    %301 = arith.addf %300, %29 : vector<16x16xf32>
    %cst_160 = arith.constant dense<0xFF800000> : vector<16xf32>
    %302 = vector.multi_reduction <maximumf>, %301, %cst_160 [1] : vector<16x16xf32> to vector<16xf32>
    %303 = vector.shape_cast %302 : vector<16xf32> to vector<16x1xf32>
    %304 = vector.broadcast %303 : vector<16x1xf32> to vector<16x16xf32>
    %305 = arith.subf %301, %304 : vector<16x16xf32>
    %306 = math.exp %305 : vector<16x16xf32>
    %cst_161 = arith.constant dense<0.000000e+00> : vector<16xf32>
    %307 = vector.multi_reduction <add>, %306, %cst_161 [1] : vector<16x16xf32> to vector<16xf32>
    %308 = vector.shape_cast %307 : vector<16xf32> to vector<16x1xf32>
    %309 = tpu.reciprocal %308 {approx = true} : vector<16x1xf32> -> vector<16x1xf32>
    %310 = vector.broadcast %309 : vector<16x1xf32> to vector<16x16xf32>
    %311 = arith.mulf %306, %310 : vector<16x16xf32>
    %cst_162 = arith.constant dense<0.000000e+00> : vector<16x40xf32>
    %312 = tpu.matmul %311, %299, %cst_162 {dimension_numbers = #tpu.dot_dimension_numbers<[1], [0], [0], [1], [0, 0, 1, 1], [], []>} : vector<16x16xf32>, vector<16x40xf32>, vector<16x40xf32> -> vector<16x40xf32>
    %313 = arith.addf %290, %312 : vector<16x40xf32>
    %c8_i32_163 = arith.constant 8 : i32
    %314 = vector.broadcast %c8_i32_163 : i32 to vector<16x40xi32>
    %315 = arith.cmpi sge, %30, %314 : vector<16x40xi32>
    %c16_i32_164 = arith.constant 16 : i32
    %316 = vector.broadcast %c16_i32_164 : i32 to vector<16x40xi32>
    %317 = arith.cmpi slt, %30, %316 : vector<16x40xi32>
    %318 = arith.andi %315, %317 : vector<16x40xi1>
    %cst_165 = arith.constant 0.000000e+00 : f32
    %319 = vector.broadcast %cst_165 : f32 to vector<16x40xf32>
    %320 = arith.select %318, %280, %319 : vector<16x40xi1>, vector<16x40xf32>
    %cst_166 = arith.constant 0.000000e+00 : f32
    %321 = vector.broadcast %cst_166 : f32 to vector<16x40xf32>
    %322 = arith.select %318, %287, %321 : vector<16x40xi1>, vector<16x40xf32>
    %cst_167 = arith.constant dense<0.000000e+00> : vector<16x16xf32>
    %323 = tpu.matmul %289, %320, %cst_167 {dimension_numbers = #tpu.dot_dimension_numbers<[1], [1], [0], [0], [0, 0, 1, 0], [], []>} : vector<16x40xf32>, vector<16x40xf32>, vector<16x16xf32> -> vector<16x16xf32>
    %324 = arith.addf %323, %29 : vector<16x16xf32>
    %cst_168 = arith.constant dense<0xFF800000> : vector<16xf32>
    %325 = vector.multi_reduction <maximumf>, %324, %cst_168 [1] : vector<16x16xf32> to vector<16xf32>
    %326 = vector.shape_cast %325 : vector<16xf32> to vector<16x1xf32>
    %327 = vector.broadcast %326 : vector<16x1xf32> to vector<16x16xf32>
    %328 = arith.subf %324, %327 : vector<16x16xf32>
    %329 = math.exp %328 : vector<16x16xf32>
    %cst_169 = arith.constant dense<0.000000e+00> : vector<16xf32>
    %330 = vector.multi_reduction <add>, %329, %cst_169 [1] : vector<16x16xf32> to vector<16xf32>
    %331 = vector.shape_cast %330 : vector<16xf32> to vector<16x1xf32>
    %332 = tpu.reciprocal %331 {approx = true} : vector<16x1xf32> -> vector<16x1xf32>
    %333 = vector.broadcast %332 : vector<16x1xf32> to vector<16x16xf32>
    %334 = arith.mulf %329, %333 : vector<16x16xf32>
    %cst_170 = arith.constant dense<0.000000e+00> : vector<16x40xf32>
    %335 = tpu.matmul %334, %322, %cst_170 {dimension_numbers = #tpu.dot_dimension_numbers<[1], [0], [0], [1], [0, 0, 1, 1], [], []>} : vector<16x16xf32>, vector<16x40xf32>, vector<16x40xf32> -> vector<16x40xf32>
    %336 = arith.addf %313, %335 : vector<16x40xf32>
    %c16_i32_171 = arith.constant 16 : i32
    %337 = vector.broadcast %c16_i32_171 : i32 to vector<16x40xi32>
    %338 = arith.cmpi sge, %30, %337 : vector<16x40xi32>
    %c24_i32_172 = arith.constant 24 : i32
    %339 = vector.broadcast %c24_i32_172 : i32 to vector<16x40xi32>
    %340 = arith.cmpi slt, %30, %339 : vector<16x40xi32>
    %341 = arith.andi %338, %340 : vector<16x40xi1>
    %cst_173 = arith.constant 0.000000e+00 : f32
    %342 = vector.broadcast %cst_173 : f32 to vector<16x40xf32>
    %343 = arith.select %341, %280, %342 : vector<16x40xi1>, vector<16x40xf32>
    %cst_174 = arith.constant 0.000000e+00 : f32
    %344 = vector.broadcast %cst_174 : f32 to vector<16x40xf32>
    %345 = arith.select %341, %287, %344 : vector<16x40xi1>, vector<16x40xf32>
    %cst_175 = arith.constant dense<0.000000e+00> : vector<16x16xf32>
    %346 = tpu.matmul %289, %343, %cst_175 {dimension_numbers = #tpu.dot_dimension_numbers<[1], [1], [0], [0], [0, 0, 1, 0], [], []>} : vector<16x40xf32>, vector<16x40xf32>, vector<16x16xf32> -> vector<16x16xf32>
    %347 = arith.addf %346, %29 : vector<16x16xf32>
    %cst_176 = arith.constant dense<0xFF800000> : vector<16xf32>
    %348 = vector.multi_reduction <maximumf>, %347, %cst_176 [1] : vector<16x16xf32> to vector<16xf32>
    %349 = vector.shape_cast %348 : vector<16xf32> to vector<16x1xf32>
    %350 = vector.broadcast %349 : vector<16x1xf32> to vector<16x16xf32>
    %351 = arith.subf %347, %350 : vector<16x16xf32>
    %352 = math.exp %351 : vector<16x16xf32>
    %cst_177 = arith.constant dense<0.000000e+00> : vector<16xf32>
    %353 = vector.multi_reduction <add>, %352, %cst_177 [1] : vector<16x16xf32> to vector<16xf32>
    %354 = vector.shape_cast %353 : vector<16xf32> to vector<16x1xf32>
    %355 = tpu.reciprocal %354 {approx = true} : vector<16x1xf32> -> vector<16x1xf32>
    %356 = vector.broadcast %355 : vector<16x1xf32> to vector<16x16xf32>
    %357 = arith.mulf %352, %356 : vector<16x16xf32>
    %cst_178 = arith.constant dense<0.000000e+00> : vector<16x40xf32>
    %358 = tpu.matmul %357, %345, %cst_178 {dimension_numbers = #tpu.dot_dimension_numbers<[1], [0], [0], [1], [0, 0, 1, 1], [], []>} : vector<16x16xf32>, vector<16x40xf32>, vector<16x40xf32> -> vector<16x40xf32>
    %359 = arith.addf %336, %358 : vector<16x40xf32>
    %c24_i32_179 = arith.constant 24 : i32
    %360 = vector.broadcast %c24_i32_179 : i32 to vector<16x40xi32>
    %361 = arith.cmpi sge, %30, %360 : vector<16x40xi32>
    %c32_i32_180 = arith.constant 32 : i32
    %362 = vector.broadcast %c32_i32_180 : i32 to vector<16x40xi32>
    %363 = arith.cmpi slt, %30, %362 : vector<16x40xi32>
    %364 = arith.andi %361, %363 : vector<16x40xi1>
    %cst_181 = arith.constant 0.000000e+00 : f32
    %365 = vector.broadcast %cst_181 : f32 to vector<16x40xf32>
    %366 = arith.select %364, %280, %365 : vector<16x40xi1>, vector<16x40xf32>
    %cst_182 = arith.constant 0.000000e+00 : f32
    %367 = vector.broadcast %cst_182 : f32 to vector<16x40xf32>
    %368 = arith.select %364, %287, %367 : vector<16x40xi1>, vector<16x40xf32>
    %cst_183 = arith.constant dense<0.000000e+00> : vector<16x16xf32>
    %369 = tpu.matmul %289, %366, %cst_183 {dimension_numbers = #tpu.dot_dimension_numbers<[1], [1], [0], [0], [0, 0, 1, 0], [], []>} : vector<16x40xf32>, vector<16x40xf32>, vector<16x16xf32> -> vector<16x16xf32>
    %370 = arith.addf %369, %29 : vector<16x16xf32>
    %cst_184 = arith.constant dense<0xFF800000> : vector<16xf32>
    %371 = vector.multi_reduction <maximumf>, %370, %cst_184 [1] : vector<16x16xf32> to vector<16xf32>
    %372 = vector.shape_cast %371 : vector<16xf32> to vector<16x1xf32>
    %373 = vector.broadcast %372 : vector<16x1xf32> to vector<16x16xf32>
    %374 = arith.subf %370, %373 : vector<16x16xf32>
    %375 = math.exp %374 : vector<16x16xf32>
    %cst_185 = arith.constant dense<0.000000e+00> : vector<16xf32>
    %376 = vector.multi_reduction <add>, %375, %cst_185 [1] : vector<16x16xf32> to vector<16xf32>
    %377 = vector.shape_cast %376 : vector<16xf32> to vector<16x1xf32>
    %378 = tpu.reciprocal %377 {approx = true} : vector<16x1xf32> -> vector<16x1xf32>
    %379 = vector.broadcast %378 : vector<16x1xf32> to vector<16x16xf32>
    %380 = arith.mulf %375, %379 : vector<16x16xf32>
    %cst_186 = arith.constant dense<0.000000e+00> : vector<16x40xf32>
    %381 = tpu.matmul %380, %368, %cst_186 {dimension_numbers = #tpu.dot_dimension_numbers<[1], [0], [0], [1], [0, 0, 1, 1], [], []>} : vector<16x16xf32>, vector<16x40xf32>, vector<16x40xf32> -> vector<16x40xf32>
    %382 = arith.addf %359, %381 : vector<16x40xf32>
    %c32_i32_187 = arith.constant 32 : i32
    %383 = vector.broadcast %c32_i32_187 : i32 to vector<16x40xi32>
    %384 = arith.cmpi sge, %30, %383 : vector<16x40xi32>
    %c40_i32_188 = arith.constant 40 : i32
    %385 = vector.broadcast %c40_i32_188 : i32 to vector<16x40xi32>
    %386 = arith.cmpi slt, %30, %385 : vector<16x40xi32>
    %387 = arith.andi %384, %386 : vector<16x40xi1>
    %cst_189 = arith.constant 0.000000e+00 : f32
    %388 = vector.broadcast %cst_189 : f32 to vector<16x40xf32>
    %389 = arith.select %387, %280, %388 : vector<16x40xi1>, vector<16x40xf32>
    %cst_190 = arith.constant 0.000000e+00 : f32
    %390 = vector.broadcast %cst_190 : f32 to vector<16x40xf32>
    %391 = arith.select %387, %287, %390 : vector<16x40xi1>, vector<16x40xf32>
    %cst_191 = arith.constant dense<0.000000e+00> : vector<16x16xf32>
    %392 = tpu.matmul %289, %389, %cst_191 {dimension_numbers = #tpu.dot_dimension_numbers<[1], [1], [0], [0], [0, 0, 1, 0], [], []>} : vector<16x40xf32>, vector<16x40xf32>, vector<16x16xf32> -> vector<16x16xf32>
    %393 = arith.addf %392, %29 : vector<16x16xf32>
    %cst_192 = arith.constant dense<0xFF800000> : vector<16xf32>
    %394 = vector.multi_reduction <maximumf>, %393, %cst_192 [1] : vector<16x16xf32> to vector<16xf32>
    %395 = vector.shape_cast %394 : vector<16xf32> to vector<16x1xf32>
    %396 = vector.broadcast %395 : vector<16x1xf32> to vector<16x16xf32>
    %397 = arith.subf %393, %396 : vector<16x16xf32>
    %398 = math.exp %397 : vector<16x16xf32>
    %cst_193 = arith.constant dense<0.000000e+00> : vector<16xf32>
    %399 = vector.multi_reduction <add>, %398, %cst_193 [1] : vector<16x16xf32> to vector<16xf32>
    %400 = vector.shape_cast %399 : vector<16xf32> to vector<16x1xf32>
    %401 = tpu.reciprocal %400 {approx = true} : vector<16x1xf32> -> vector<16x1xf32>
    %402 = vector.broadcast %401 : vector<16x1xf32> to vector<16x16xf32>
    %403 = arith.mulf %398, %402 : vector<16x16xf32>
    %cst_194 = arith.constant dense<0.000000e+00> : vector<16x40xf32>
    %404 = tpu.matmul %403, %391, %cst_194 {dimension_numbers = #tpu.dot_dimension_numbers<[1], [0], [0], [1], [0, 0, 1, 1], [], []>} : vector<16x16xf32>, vector<16x40xf32>, vector<16x40xf32> -> vector<16x40xf32>
    %405 = arith.addf %382, %404 : vector<16x40xf32>
    %c1_195 = arith.constant 1 : index
    %c3_196 = arith.constant 3 : index
    %c0_197 = arith.constant 0 : index
    %c0_198 = arith.constant 0 : index
    %406 = vector.load %arg5[%c1_195, %c3_196, %c0_197, %c0_198] : memref<3x4x40x40xf32, #tpu.memory_space<vmem>>, vector<1x1x40x40xf32>
    %407 = vector.shape_cast %406 : vector<1x1x40x40xf32> to vector<40x40xf32>
    %cst_199 = arith.constant dense<0.000000e+00> : vector<16x40xf32>
    %408 = tpu.matmul %405, %407, %cst_199 {dimension_numbers = #tpu.dot_dimension_numbers<[1], [0], [0], [1], [0, 0, 1, 1], [], []>} : vector<16x40xf32>, vector<40x40xf32>, vector<16x40xf32> -> vector<16x40xf32>
    %c1_200 = arith.constant 1 : index
    %c5_201 = arith.constant 5 : index
    %c0_202 = arith.constant 0 : index
    %409 = vector.load %arg6[%c1_200, %c5_201, %c0_202] : memref<3x9x40xf32, #tpu.memory_space<vmem>>, vector<1x1x40xf32>
    %410 = vector.shape_cast %409 : vector<1x1x40xf32> to vector<1x40xf32>
    %411 = vector.broadcast %410 : vector<1x40xf32> to vector<16x40xf32>
    %412 = arith.addf %408, %411 : vector<16x40xf32>
    %413 = arith.addf %242, %412 : vector<16x40xf32>
    %c1_203 = arith.constant 1 : index
    %c6_204 = arith.constant 6 : index
    %c0_205 = arith.constant 0 : index
    %414 = vector.load %arg6[%c1_203, %c6_204, %c0_205] : memref<3x9x40xf32, #tpu.memory_space<vmem>>, vector<1x1x40xf32>
    %415 = vector.shape_cast %414 : vector<1x1x40xf32> to vector<1x40xf32>
    %c1_206 = arith.constant 1 : index
    %c7_207 = arith.constant 7 : index
    %c0_208 = arith.constant 0 : index
    %416 = vector.load %arg6[%c1_206, %c7_207, %c0_208] : memref<3x9x40xf32, #tpu.memory_space<vmem>>, vector<1x1x40xf32>
    %417 = vector.shape_cast %416 : vector<1x1x40xf32> to vector<1x40xf32>
    %cst_209 = arith.constant dense<0.000000e+00> : vector<16xf32>
    %418 = vector.multi_reduction <add>, %413, %cst_209 [1] : vector<16x40xf32> to vector<16xf32>
    %419 = vector.shape_cast %418 : vector<16xf32> to vector<16x1xf32>
    %cst_210 = arith.constant 4.000000e+01 : f32
    %420 = vector.broadcast %cst_210 : f32 to vector<16x1xf32>
    %421 = arith.divf %419, %420 : vector<16x1xf32>
    %422 = vector.broadcast %421 : vector<16x1xf32> to vector<16x40xf32>
    %423 = arith.subf %413, %422 : vector<16x40xf32>
    %424 = arith.mulf %423, %423 : vector<16x40xf32>
    %cst_211 = arith.constant dense<0.000000e+00> : vector<16xf32>
    %425 = vector.multi_reduction <add>, %424, %cst_211 [1] : vector<16x40xf32> to vector<16xf32>
    %426 = vector.shape_cast %425 : vector<16xf32> to vector<16x1xf32>
    %cst_212 = arith.constant 4.000000e+01 : f32
    %427 = vector.broadcast %cst_212 : f32 to vector<16x1xf32>
    %428 = arith.divf %426, %427 : vector<16x1xf32>
    %cst_213 = arith.constant 9.99999974E-6 : f32
    %429 = vector.broadcast %cst_213 : f32 to vector<16x1xf32>
    %430 = arith.addf %428, %429 : vector<16x1xf32>
    %431 = math.rsqrt %430 : vector<16x1xf32>
    %432 = vector.broadcast %431 : vector<16x1xf32> to vector<16x40xf32>
    %433 = arith.mulf %423, %432 : vector<16x40xf32>
    %434 = vector.broadcast %415 : vector<1x40xf32> to vector<16x40xf32>
    %435 = arith.mulf %433, %434 : vector<16x40xf32>
    %436 = vector.broadcast %417 : vector<1x40xf32> to vector<16x40xf32>
    %437 = arith.addf %435, %436 : vector<16x40xf32>
    %c1_214 = arith.constant 1 : index
    %c0_215 = arith.constant 0 : index
    %c0_216 = arith.constant 0 : index
    %438 = vector.load %arg7[%c1_214, %c0_215, %c0_216] : memref<3x40x160xf32, #tpu.memory_space<vmem>>, vector<1x40x160xf32>
    %439 = vector.shape_cast %438 : vector<1x40x160xf32> to vector<40x160xf32>
    %cst_217 = arith.constant dense<0.000000e+00> : vector<16x160xf32>
    %440 = tpu.matmul %437, %439, %cst_217 {dimension_numbers = #tpu.dot_dimension_numbers<[1], [0], [0], [1], [0, 0, 1, 1], [], []>} : vector<16x40xf32>, vector<40x160xf32>, vector<16x160xf32> -> vector<16x160xf32>
    %c1_218 = arith.constant 1 : index
    %c0_219 = arith.constant 0 : index
    %c0_220 = arith.constant 0 : index
    %441 = vector.load %arg8[%c1_218, %c0_219, %c0_220] : memref<3x1x160xf32, #tpu.memory_space<vmem>>, vector<1x1x160xf32>
    %442 = vector.shape_cast %441 : vector<1x1x160xf32> to vector<1x160xf32>
    %443 = vector.broadcast %442 : vector<1x160xf32> to vector<16x160xf32>
    %444 = arith.addf %440, %443 : vector<16x160xf32>
    %cst_221 = arith.constant 0.000000e+00 : f32
    %445 = vector.broadcast %cst_221 : f32 to vector<16x160xf32>
    %446 = arith.maximumf %444, %445 : vector<16x160xf32>
    %c1_222 = arith.constant 1 : index
    %c0_223 = arith.constant 0 : index
    %c0_224 = arith.constant 0 : index
    %447 = vector.load %arg9[%c1_222, %c0_223, %c0_224] : memref<3x160x40xf32, #tpu.memory_space<vmem>>, vector<1x160x40xf32>
    %448 = vector.shape_cast %447 : vector<1x160x40xf32> to vector<160x40xf32>
    %cst_225 = arith.constant dense<0.000000e+00> : vector<16x40xf32>
    %449 = tpu.matmul %446, %448, %cst_225 {dimension_numbers = #tpu.dot_dimension_numbers<[1], [0], [0], [1], [0, 0, 1, 1], [], []>} : vector<16x160xf32>, vector<160x40xf32>, vector<16x40xf32> -> vector<16x40xf32>
    %450 = arith.addf %413, %449 : vector<16x40xf32>
    %c1_226 = arith.constant 1 : index
    %c8_227 = arith.constant 8 : index
    %c0_228 = arith.constant 0 : index
    %451 = vector.load %arg6[%c1_226, %c8_227, %c0_228] : memref<3x9x40xf32, #tpu.memory_space<vmem>>, vector<1x1x40xf32>
    %452 = vector.shape_cast %451 : vector<1x1x40xf32> to vector<1x40xf32>
    %453 = vector.broadcast %452 : vector<1x40xf32> to vector<16x40xf32>
    %454 = arith.addf %450, %453 : vector<16x40xf32>
    %c2_229 = arith.constant 2 : index
    %c0_230 = arith.constant 0 : index
    %c0_231 = arith.constant 0 : index
    %455 = vector.load %arg6[%c2_229, %c0_230, %c0_231] : memref<3x9x40xf32, #tpu.memory_space<vmem>>, vector<1x1x40xf32>
    %456 = vector.shape_cast %455 : vector<1x1x40xf32> to vector<1x40xf32>
    %c2_232 = arith.constant 2 : index
    %c1_233 = arith.constant 1 : index
    %c0_234 = arith.constant 0 : index
    %457 = vector.load %arg6[%c2_232, %c1_233, %c0_234] : memref<3x9x40xf32, #tpu.memory_space<vmem>>, vector<1x1x40xf32>
    %458 = vector.shape_cast %457 : vector<1x1x40xf32> to vector<1x40xf32>
    %cst_235 = arith.constant dense<0.000000e+00> : vector<16xf32>
    %459 = vector.multi_reduction <add>, %454, %cst_235 [1] : vector<16x40xf32> to vector<16xf32>
    %460 = vector.shape_cast %459 : vector<16xf32> to vector<16x1xf32>
    %cst_236 = arith.constant 4.000000e+01 : f32
    %461 = vector.broadcast %cst_236 : f32 to vector<16x1xf32>
    %462 = arith.divf %460, %461 : vector<16x1xf32>
    %463 = vector.broadcast %462 : vector<16x1xf32> to vector<16x40xf32>
    %464 = arith.subf %454, %463 : vector<16x40xf32>
    %465 = arith.mulf %464, %464 : vector<16x40xf32>
    %cst_237 = arith.constant dense<0.000000e+00> : vector<16xf32>
    %466 = vector.multi_reduction <add>, %465, %cst_237 [1] : vector<16x40xf32> to vector<16xf32>
    %467 = vector.shape_cast %466 : vector<16xf32> to vector<16x1xf32>
    %cst_238 = arith.constant 4.000000e+01 : f32
    %468 = vector.broadcast %cst_238 : f32 to vector<16x1xf32>
    %469 = arith.divf %467, %468 : vector<16x1xf32>
    %cst_239 = arith.constant 9.99999974E-6 : f32
    %470 = vector.broadcast %cst_239 : f32 to vector<16x1xf32>
    %471 = arith.addf %469, %470 : vector<16x1xf32>
    %472 = math.rsqrt %471 : vector<16x1xf32>
    %473 = vector.broadcast %472 : vector<16x1xf32> to vector<16x40xf32>
    %474 = arith.mulf %464, %473 : vector<16x40xf32>
    %475 = vector.broadcast %456 : vector<1x40xf32> to vector<16x40xf32>
    %476 = arith.mulf %474, %475 : vector<16x40xf32>
    %477 = vector.broadcast %458 : vector<1x40xf32> to vector<16x40xf32>
    %478 = arith.addf %476, %477 : vector<16x40xf32>
    %c2_240 = arith.constant 2 : index
    %c0_241 = arith.constant 0 : index
    %c0_242 = arith.constant 0 : index
    %c0_243 = arith.constant 0 : index
    %479 = vector.load %arg5[%c2_240, %c0_241, %c0_242, %c0_243] : memref<3x4x40x40xf32, #tpu.memory_space<vmem>>, vector<1x1x40x40xf32>
    %480 = vector.shape_cast %479 : vector<1x1x40x40xf32> to vector<40x40xf32>
    %cst_244 = arith.constant dense<0.000000e+00> : vector<16x40xf32>
    %481 = tpu.matmul %478, %480, %cst_244 {dimension_numbers = #tpu.dot_dimension_numbers<[1], [0], [0], [1], [0, 0, 1, 1], [], []>} : vector<16x40xf32>, vector<40x40xf32>, vector<16x40xf32> -> vector<16x40xf32>
    %c2_245 = arith.constant 2 : index
    %c2_246 = arith.constant 2 : index
    %c0_247 = arith.constant 0 : index
    %482 = vector.load %arg6[%c2_245, %c2_246, %c0_247] : memref<3x9x40xf32, #tpu.memory_space<vmem>>, vector<1x1x40xf32>
    %483 = vector.shape_cast %482 : vector<1x1x40xf32> to vector<1x40xf32>
    %484 = vector.broadcast %483 : vector<1x40xf32> to vector<16x40xf32>
    %485 = arith.addf %481, %484 : vector<16x40xf32>
    %c2_248 = arith.constant 2 : index
    %c1_249 = arith.constant 1 : index
    %c0_250 = arith.constant 0 : index
    %c0_251 = arith.constant 0 : index
    %486 = vector.load %arg5[%c2_248, %c1_249, %c0_250, %c0_251] : memref<3x4x40x40xf32, #tpu.memory_space<vmem>>, vector<1x1x40x40xf32>
    %487 = vector.shape_cast %486 : vector<1x1x40x40xf32> to vector<40x40xf32>
    %cst_252 = arith.constant dense<0.000000e+00> : vector<16x40xf32>
    %488 = tpu.matmul %478, %487, %cst_252 {dimension_numbers = #tpu.dot_dimension_numbers<[1], [0], [0], [1], [0, 0, 1, 1], [], []>} : vector<16x40xf32>, vector<40x40xf32>, vector<16x40xf32> -> vector<16x40xf32>
    %c2_253 = arith.constant 2 : index
    %c3_254 = arith.constant 3 : index
    %c0_255 = arith.constant 0 : index
    %489 = vector.load %arg6[%c2_253, %c3_254, %c0_255] : memref<3x9x40xf32, #tpu.memory_space<vmem>>, vector<1x1x40xf32>
    %490 = vector.shape_cast %489 : vector<1x1x40xf32> to vector<1x40xf32>
    %491 = vector.broadcast %490 : vector<1x40xf32> to vector<16x40xf32>
    %492 = arith.addf %488, %491 : vector<16x40xf32>
    %c2_256 = arith.constant 2 : index
    %c2_257 = arith.constant 2 : index
    %c0_258 = arith.constant 0 : index
    %c0_259 = arith.constant 0 : index
    %493 = vector.load %arg5[%c2_256, %c2_257, %c0_258, %c0_259] : memref<3x4x40x40xf32, #tpu.memory_space<vmem>>, vector<1x1x40x40xf32>
    %494 = vector.shape_cast %493 : vector<1x1x40x40xf32> to vector<40x40xf32>
    %cst_260 = arith.constant dense<0.000000e+00> : vector<16x40xf32>
    %495 = tpu.matmul %478, %494, %cst_260 {dimension_numbers = #tpu.dot_dimension_numbers<[1], [0], [0], [1], [0, 0, 1, 1], [], []>} : vector<16x40xf32>, vector<40x40xf32>, vector<16x40xf32> -> vector<16x40xf32>
    %c2_261 = arith.constant 2 : index
    %c4_262 = arith.constant 4 : index
    %c0_263 = arith.constant 0 : index
    %496 = vector.load %arg6[%c2_261, %c4_262, %c0_263] : memref<3x9x40xf32, #tpu.memory_space<vmem>>, vector<1x1x40xf32>
    %497 = vector.shape_cast %496 : vector<1x1x40xf32> to vector<1x40xf32>
    %498 = vector.broadcast %497 : vector<1x40xf32> to vector<16x40xf32>
    %499 = arith.addf %495, %498 : vector<16x40xf32>
    %cst_264 = arith.constant 0.353553385 : f32
    %500 = vector.broadcast %cst_264 : f32 to vector<16x40xf32>
    %501 = arith.mulf %485, %500 : vector<16x40xf32>
    %cst_265 = arith.constant 0.000000e+00 : f32
    %502 = vector.broadcast %cst_265 : f32 to vector<16x40xf32>
    %c0_i32_266 = arith.constant 0 : i32
    %503 = vector.broadcast %c0_i32_266 : i32 to vector<16x40xi32>
    %504 = arith.cmpi sge, %30, %503 : vector<16x40xi32>
    %c8_i32_267 = arith.constant 8 : i32
    %505 = vector.broadcast %c8_i32_267 : i32 to vector<16x40xi32>
    %506 = arith.cmpi slt, %30, %505 : vector<16x40xi32>
    %507 = arith.andi %504, %506 : vector<16x40xi1>
    %cst_268 = arith.constant 0.000000e+00 : f32
    %508 = vector.broadcast %cst_268 : f32 to vector<16x40xf32>
    %509 = arith.select %507, %492, %508 : vector<16x40xi1>, vector<16x40xf32>
    %cst_269 = arith.constant 0.000000e+00 : f32
    %510 = vector.broadcast %cst_269 : f32 to vector<16x40xf32>
    %511 = arith.select %507, %499, %510 : vector<16x40xi1>, vector<16x40xf32>
    %cst_270 = arith.constant dense<0.000000e+00> : vector<16x16xf32>
    %512 = tpu.matmul %501, %509, %cst_270 {dimension_numbers = #tpu.dot_dimension_numbers<[1], [1], [0], [0], [0, 0, 1, 0], [], []>} : vector<16x40xf32>, vector<16x40xf32>, vector<16x16xf32> -> vector<16x16xf32>
    %513 = arith.addf %512, %29 : vector<16x16xf32>
    %cst_271 = arith.constant dense<0xFF800000> : vector<16xf32>
    %514 = vector.multi_reduction <maximumf>, %513, %cst_271 [1] : vector<16x16xf32> to vector<16xf32>
    %515 = vector.shape_cast %514 : vector<16xf32> to vector<16x1xf32>
    %516 = vector.broadcast %515 : vector<16x1xf32> to vector<16x16xf32>
    %517 = arith.subf %513, %516 : vector<16x16xf32>
    %518 = math.exp %517 : vector<16x16xf32>
    %cst_272 = arith.constant dense<0.000000e+00> : vector<16xf32>
    %519 = vector.multi_reduction <add>, %518, %cst_272 [1] : vector<16x16xf32> to vector<16xf32>
    %520 = vector.shape_cast %519 : vector<16xf32> to vector<16x1xf32>
    %521 = tpu.reciprocal %520 {approx = true} : vector<16x1xf32> -> vector<16x1xf32>
    %522 = vector.broadcast %521 : vector<16x1xf32> to vector<16x16xf32>
    %523 = arith.mulf %518, %522 : vector<16x16xf32>
    %cst_273 = arith.constant dense<0.000000e+00> : vector<16x40xf32>
    %524 = tpu.matmul %523, %511, %cst_273 {dimension_numbers = #tpu.dot_dimension_numbers<[1], [0], [0], [1], [0, 0, 1, 1], [], []>} : vector<16x16xf32>, vector<16x40xf32>, vector<16x40xf32> -> vector<16x40xf32>
    %525 = arith.addf %502, %524 : vector<16x40xf32>
    %c8_i32_274 = arith.constant 8 : i32
    %526 = vector.broadcast %c8_i32_274 : i32 to vector<16x40xi32>
    %527 = arith.cmpi sge, %30, %526 : vector<16x40xi32>
    %c16_i32_275 = arith.constant 16 : i32
    %528 = vector.broadcast %c16_i32_275 : i32 to vector<16x40xi32>
    %529 = arith.cmpi slt, %30, %528 : vector<16x40xi32>
    %530 = arith.andi %527, %529 : vector<16x40xi1>
    %cst_276 = arith.constant 0.000000e+00 : f32
    %531 = vector.broadcast %cst_276 : f32 to vector<16x40xf32>
    %532 = arith.select %530, %492, %531 : vector<16x40xi1>, vector<16x40xf32>
    %cst_277 = arith.constant 0.000000e+00 : f32
    %533 = vector.broadcast %cst_277 : f32 to vector<16x40xf32>
    %534 = arith.select %530, %499, %533 : vector<16x40xi1>, vector<16x40xf32>
    %cst_278 = arith.constant dense<0.000000e+00> : vector<16x16xf32>
    %535 = tpu.matmul %501, %532, %cst_278 {dimension_numbers = #tpu.dot_dimension_numbers<[1], [1], [0], [0], [0, 0, 1, 0], [], []>} : vector<16x40xf32>, vector<16x40xf32>, vector<16x16xf32> -> vector<16x16xf32>
    %536 = arith.addf %535, %29 : vector<16x16xf32>
    %cst_279 = arith.constant dense<0xFF800000> : vector<16xf32>
    %537 = vector.multi_reduction <maximumf>, %536, %cst_279 [1] : vector<16x16xf32> to vector<16xf32>
    %538 = vector.shape_cast %537 : vector<16xf32> to vector<16x1xf32>
    %539 = vector.broadcast %538 : vector<16x1xf32> to vector<16x16xf32>
    %540 = arith.subf %536, %539 : vector<16x16xf32>
    %541 = math.exp %540 : vector<16x16xf32>
    %cst_280 = arith.constant dense<0.000000e+00> : vector<16xf32>
    %542 = vector.multi_reduction <add>, %541, %cst_280 [1] : vector<16x16xf32> to vector<16xf32>
    %543 = vector.shape_cast %542 : vector<16xf32> to vector<16x1xf32>
    %544 = tpu.reciprocal %543 {approx = true} : vector<16x1xf32> -> vector<16x1xf32>
    %545 = vector.broadcast %544 : vector<16x1xf32> to vector<16x16xf32>
    %546 = arith.mulf %541, %545 : vector<16x16xf32>
    %cst_281 = arith.constant dense<0.000000e+00> : vector<16x40xf32>
    %547 = tpu.matmul %546, %534, %cst_281 {dimension_numbers = #tpu.dot_dimension_numbers<[1], [0], [0], [1], [0, 0, 1, 1], [], []>} : vector<16x16xf32>, vector<16x40xf32>, vector<16x40xf32> -> vector<16x40xf32>
    %548 = arith.addf %525, %547 : vector<16x40xf32>
    %c16_i32_282 = arith.constant 16 : i32
    %549 = vector.broadcast %c16_i32_282 : i32 to vector<16x40xi32>
    %550 = arith.cmpi sge, %30, %549 : vector<16x40xi32>
    %c24_i32_283 = arith.constant 24 : i32
    %551 = vector.broadcast %c24_i32_283 : i32 to vector<16x40xi32>
    %552 = arith.cmpi slt, %30, %551 : vector<16x40xi32>
    %553 = arith.andi %550, %552 : vector<16x40xi1>
    %cst_284 = arith.constant 0.000000e+00 : f32
    %554 = vector.broadcast %cst_284 : f32 to vector<16x40xf32>
    %555 = arith.select %553, %492, %554 : vector<16x40xi1>, vector<16x40xf32>
    %cst_285 = arith.constant 0.000000e+00 : f32
    %556 = vector.broadcast %cst_285 : f32 to vector<16x40xf32>
    %557 = arith.select %553, %499, %556 : vector<16x40xi1>, vector<16x40xf32>
    %cst_286 = arith.constant dense<0.000000e+00> : vector<16x16xf32>
    %558 = tpu.matmul %501, %555, %cst_286 {dimension_numbers = #tpu.dot_dimension_numbers<[1], [1], [0], [0], [0, 0, 1, 0], [], []>} : vector<16x40xf32>, vector<16x40xf32>, vector<16x16xf32> -> vector<16x16xf32>
    %559 = arith.addf %558, %29 : vector<16x16xf32>
    %cst_287 = arith.constant dense<0xFF800000> : vector<16xf32>
    %560 = vector.multi_reduction <maximumf>, %559, %cst_287 [1] : vector<16x16xf32> to vector<16xf32>
    %561 = vector.shape_cast %560 : vector<16xf32> to vector<16x1xf32>
    %562 = vector.broadcast %561 : vector<16x1xf32> to vector<16x16xf32>
    %563 = arith.subf %559, %562 : vector<16x16xf32>
    %564 = math.exp %563 : vector<16x16xf32>
    %cst_288 = arith.constant dense<0.000000e+00> : vector<16xf32>
    %565 = vector.multi_reduction <add>, %564, %cst_288 [1] : vector<16x16xf32> to vector<16xf32>
    %566 = vector.shape_cast %565 : vector<16xf32> to vector<16x1xf32>
    %567 = tpu.reciprocal %566 {approx = true} : vector<16x1xf32> -> vector<16x1xf32>
    %568 = vector.broadcast %567 : vector<16x1xf32> to vector<16x16xf32>
    %569 = arith.mulf %564, %568 : vector<16x16xf32>
    %cst_289 = arith.constant dense<0.000000e+00> : vector<16x40xf32>
    %570 = tpu.matmul %569, %557, %cst_289 {dimension_numbers = #tpu.dot_dimension_numbers<[1], [0], [0], [1], [0, 0, 1, 1], [], []>} : vector<16x16xf32>, vector<16x40xf32>, vector<16x40xf32> -> vector<16x40xf32>
    %571 = arith.addf %548, %570 : vector<16x40xf32>
    %c24_i32_290 = arith.constant 24 : i32
    %572 = vector.broadcast %c24_i32_290 : i32 to vector<16x40xi32>
    %573 = arith.cmpi sge, %30, %572 : vector<16x40xi32>
    %c32_i32_291 = arith.constant 32 : i32
    %574 = vector.broadcast %c32_i32_291 : i32 to vector<16x40xi32>
    %575 = arith.cmpi slt, %30, %574 : vector<16x40xi32>
    %576 = arith.andi %573, %575 : vector<16x40xi1>
    %cst_292 = arith.constant 0.000000e+00 : f32
    %577 = vector.broadcast %cst_292 : f32 to vector<16x40xf32>
    %578 = arith.select %576, %492, %577 : vector<16x40xi1>, vector<16x40xf32>
    %cst_293 = arith.constant 0.000000e+00 : f32
    %579 = vector.broadcast %cst_293 : f32 to vector<16x40xf32>
    %580 = arith.select %576, %499, %579 : vector<16x40xi1>, vector<16x40xf32>
    %cst_294 = arith.constant dense<0.000000e+00> : vector<16x16xf32>
    %581 = tpu.matmul %501, %578, %cst_294 {dimension_numbers = #tpu.dot_dimension_numbers<[1], [1], [0], [0], [0, 0, 1, 0], [], []>} : vector<16x40xf32>, vector<16x40xf32>, vector<16x16xf32> -> vector<16x16xf32>
    %582 = arith.addf %581, %29 : vector<16x16xf32>
    %cst_295 = arith.constant dense<0xFF800000> : vector<16xf32>
    %583 = vector.multi_reduction <maximumf>, %582, %cst_295 [1] : vector<16x16xf32> to vector<16xf32>
    %584 = vector.shape_cast %583 : vector<16xf32> to vector<16x1xf32>
    %585 = vector.broadcast %584 : vector<16x1xf32> to vector<16x16xf32>
    %586 = arith.subf %582, %585 : vector<16x16xf32>
    %587 = math.exp %586 : vector<16x16xf32>
    %cst_296 = arith.constant dense<0.000000e+00> : vector<16xf32>
    %588 = vector.multi_reduction <add>, %587, %cst_296 [1] : vector<16x16xf32> to vector<16xf32>
    %589 = vector.shape_cast %588 : vector<16xf32> to vector<16x1xf32>
    %590 = tpu.reciprocal %589 {approx = true} : vector<16x1xf32> -> vector<16x1xf32>
    %591 = vector.broadcast %590 : vector<16x1xf32> to vector<16x16xf32>
    %592 = arith.mulf %587, %591 : vector<16x16xf32>
    %cst_297 = arith.constant dense<0.000000e+00> : vector<16x40xf32>
    %593 = tpu.matmul %592, %580, %cst_297 {dimension_numbers = #tpu.dot_dimension_numbers<[1], [0], [0], [1], [0, 0, 1, 1], [], []>} : vector<16x16xf32>, vector<16x40xf32>, vector<16x40xf32> -> vector<16x40xf32>
    %594 = arith.addf %571, %593 : vector<16x40xf32>
    %c32_i32_298 = arith.constant 32 : i32
    %595 = vector.broadcast %c32_i32_298 : i32 to vector<16x40xi32>
    %596 = arith.cmpi sge, %30, %595 : vector<16x40xi32>
    %c40_i32_299 = arith.constant 40 : i32
    %597 = vector.broadcast %c40_i32_299 : i32 to vector<16x40xi32>
    %598 = arith.cmpi slt, %30, %597 : vector<16x40xi32>
    %599 = arith.andi %596, %598 : vector<16x40xi1>
    %cst_300 = arith.constant 0.000000e+00 : f32
    %600 = vector.broadcast %cst_300 : f32 to vector<16x40xf32>
    %601 = arith.select %599, %492, %600 : vector<16x40xi1>, vector<16x40xf32>
    %cst_301 = arith.constant 0.000000e+00 : f32
    %602 = vector.broadcast %cst_301 : f32 to vector<16x40xf32>
    %603 = arith.select %599, %499, %602 : vector<16x40xi1>, vector<16x40xf32>
    %cst_302 = arith.constant dense<0.000000e+00> : vector<16x16xf32>
    %604 = tpu.matmul %501, %601, %cst_302 {dimension_numbers = #tpu.dot_dimension_numbers<[1], [1], [0], [0], [0, 0, 1, 0], [], []>} : vector<16x40xf32>, vector<16x40xf32>, vector<16x16xf32> -> vector<16x16xf32>
    %605 = arith.addf %604, %29 : vector<16x16xf32>
    %cst_303 = arith.constant dense<0xFF800000> : vector<16xf32>
    %606 = vector.multi_reduction <maximumf>, %605, %cst_303 [1] : vector<16x16xf32> to vector<16xf32>
    %607 = vector.shape_cast %606 : vector<16xf32> to vector<16x1xf32>
    %608 = vector.broadcast %607 : vector<16x1xf32> to vector<16x16xf32>
    %609 = arith.subf %605, %608 : vector<16x16xf32>
    %610 = math.exp %609 : vector<16x16xf32>
    %cst_304 = arith.constant dense<0.000000e+00> : vector<16xf32>
    %611 = vector.multi_reduction <add>, %610, %cst_304 [1] : vector<16x16xf32> to vector<16xf32>
    %612 = vector.shape_cast %611 : vector<16xf32> to vector<16x1xf32>
    %613 = tpu.reciprocal %612 {approx = true} : vector<16x1xf32> -> vector<16x1xf32>
    %614 = vector.broadcast %613 : vector<16x1xf32> to vector<16x16xf32>
    %615 = arith.mulf %610, %614 : vector<16x16xf32>
    %cst_305 = arith.constant dense<0.000000e+00> : vector<16x40xf32>
    %616 = tpu.matmul %615, %603, %cst_305 {dimension_numbers = #tpu.dot_dimension_numbers<[1], [0], [0], [1], [0, 0, 1, 1], [], []>} : vector<16x16xf32>, vector<16x40xf32>, vector<16x40xf32> -> vector<16x40xf32>
    %617 = arith.addf %594, %616 : vector<16x40xf32>
    %c2_306 = arith.constant 2 : index
    %c3_307 = arith.constant 3 : index
    %c0_308 = arith.constant 0 : index
    %c0_309 = arith.constant 0 : index
    %618 = vector.load %arg5[%c2_306, %c3_307, %c0_308, %c0_309] : memref<3x4x40x40xf32, #tpu.memory_space<vmem>>, vector<1x1x40x40xf32>
    %619 = vector.shape_cast %618 : vector<1x1x40x40xf32> to vector<40x40xf32>
    %cst_310 = arith.constant dense<0.000000e+00> : vector<16x40xf32>
    %620 = tpu.matmul %617, %619, %cst_310 {dimension_numbers = #tpu.dot_dimension_numbers<[1], [0], [0], [1], [0, 0, 1, 1], [], []>} : vector<16x40xf32>, vector<40x40xf32>, vector<16x40xf32> -> vector<16x40xf32>
    %c2_311 = arith.constant 2 : index
    %c5_312 = arith.constant 5 : index
    %c0_313 = arith.constant 0 : index
    %621 = vector.load %arg6[%c2_311, %c5_312, %c0_313] : memref<3x9x40xf32, #tpu.memory_space<vmem>>, vector<1x1x40xf32>
    %622 = vector.shape_cast %621 : vector<1x1x40xf32> to vector<1x40xf32>
    %623 = vector.broadcast %622 : vector<1x40xf32> to vector<16x40xf32>
    %624 = arith.addf %620, %623 : vector<16x40xf32>
    %625 = arith.addf %454, %624 : vector<16x40xf32>
    %c2_314 = arith.constant 2 : index
    %c6_315 = arith.constant 6 : index
    %c0_316 = arith.constant 0 : index
    %626 = vector.load %arg6[%c2_314, %c6_315, %c0_316] : memref<3x9x40xf32, #tpu.memory_space<vmem>>, vector<1x1x40xf32>
    %627 = vector.shape_cast %626 : vector<1x1x40xf32> to vector<1x40xf32>
    %c2_317 = arith.constant 2 : index
    %c7_318 = arith.constant 7 : index
    %c0_319 = arith.constant 0 : index
    %628 = vector.load %arg6[%c2_317, %c7_318, %c0_319] : memref<3x9x40xf32, #tpu.memory_space<vmem>>, vector<1x1x40xf32>
    %629 = vector.shape_cast %628 : vector<1x1x40xf32> to vector<1x40xf32>
    %cst_320 = arith.constant dense<0.000000e+00> : vector<16xf32>
    %630 = vector.multi_reduction <add>, %625, %cst_320 [1] : vector<16x40xf32> to vector<16xf32>
    %631 = vector.shape_cast %630 : vector<16xf32> to vector<16x1xf32>
    %cst_321 = arith.constant 4.000000e+01 : f32
    %632 = vector.broadcast %cst_321 : f32 to vector<16x1xf32>
    %633 = arith.divf %631, %632 : vector<16x1xf32>
    %634 = vector.broadcast %633 : vector<16x1xf32> to vector<16x40xf32>
    %635 = arith.subf %625, %634 : vector<16x40xf32>
    %636 = arith.mulf %635, %635 : vector<16x40xf32>
    %cst_322 = arith.constant dense<0.000000e+00> : vector<16xf32>
    %637 = vector.multi_reduction <add>, %636, %cst_322 [1] : vector<16x40xf32> to vector<16xf32>
    %638 = vector.shape_cast %637 : vector<16xf32> to vector<16x1xf32>
    %cst_323 = arith.constant 4.000000e+01 : f32
    %639 = vector.broadcast %cst_323 : f32 to vector<16x1xf32>
    %640 = arith.divf %638, %639 : vector<16x1xf32>
    %cst_324 = arith.constant 9.99999974E-6 : f32
    %641 = vector.broadcast %cst_324 : f32 to vector<16x1xf32>
    %642 = arith.addf %640, %641 : vector<16x1xf32>
    %643 = math.rsqrt %642 : vector<16x1xf32>
    %644 = vector.broadcast %643 : vector<16x1xf32> to vector<16x40xf32>
    %645 = arith.mulf %635, %644 : vector<16x40xf32>
    %646 = vector.broadcast %627 : vector<1x40xf32> to vector<16x40xf32>
    %647 = arith.mulf %645, %646 : vector<16x40xf32>
    %648 = vector.broadcast %629 : vector<1x40xf32> to vector<16x40xf32>
    %649 = arith.addf %647, %648 : vector<16x40xf32>
    %c2_325 = arith.constant 2 : index
    %c0_326 = arith.constant 0 : index
    %c0_327 = arith.constant 0 : index
    %650 = vector.load %arg7[%c2_325, %c0_326, %c0_327] : memref<3x40x160xf32, #tpu.memory_space<vmem>>, vector<1x40x160xf32>
    %651 = vector.shape_cast %650 : vector<1x40x160xf32> to vector<40x160xf32>
    %cst_328 = arith.constant dense<0.000000e+00> : vector<16x160xf32>
    %652 = tpu.matmul %649, %651, %cst_328 {dimension_numbers = #tpu.dot_dimension_numbers<[1], [0], [0], [1], [0, 0, 1, 1], [], []>} : vector<16x40xf32>, vector<40x160xf32>, vector<16x160xf32> -> vector<16x160xf32>
    %c2_329 = arith.constant 2 : index
    %c0_330 = arith.constant 0 : index
    %c0_331 = arith.constant 0 : index
    %653 = vector.load %arg8[%c2_329, %c0_330, %c0_331] : memref<3x1x160xf32, #tpu.memory_space<vmem>>, vector<1x1x160xf32>
    %654 = vector.shape_cast %653 : vector<1x1x160xf32> to vector<1x160xf32>
    %655 = vector.broadcast %654 : vector<1x160xf32> to vector<16x160xf32>
    %656 = arith.addf %652, %655 : vector<16x160xf32>
    %cst_332 = arith.constant 0.000000e+00 : f32
    %657 = vector.broadcast %cst_332 : f32 to vector<16x160xf32>
    %658 = arith.maximumf %656, %657 : vector<16x160xf32>
    %c2_333 = arith.constant 2 : index
    %c0_334 = arith.constant 0 : index
    %c0_335 = arith.constant 0 : index
    %659 = vector.load %arg9[%c2_333, %c0_334, %c0_335] : memref<3x160x40xf32, #tpu.memory_space<vmem>>, vector<1x160x40xf32>
    %660 = vector.shape_cast %659 : vector<1x160x40xf32> to vector<160x40xf32>
    %cst_336 = arith.constant dense<0.000000e+00> : vector<16x40xf32>
    %661 = tpu.matmul %658, %660, %cst_336 {dimension_numbers = #tpu.dot_dimension_numbers<[1], [0], [0], [1], [0, 0, 1, 1], [], []>} : vector<16x160xf32>, vector<160x40xf32>, vector<16x40xf32> -> vector<16x40xf32>
    %662 = arith.addf %625, %661 : vector<16x40xf32>
    %c2_337 = arith.constant 2 : index
    %c8_338 = arith.constant 8 : index
    %c0_339 = arith.constant 0 : index
    %663 = vector.load %arg6[%c2_337, %c8_338, %c0_339] : memref<3x9x40xf32, #tpu.memory_space<vmem>>, vector<1x1x40xf32>
    %664 = vector.shape_cast %663 : vector<1x1x40xf32> to vector<1x40xf32>
    %665 = vector.broadcast %664 : vector<1x40xf32> to vector<16x40xf32>
    %666 = arith.addf %662, %665 : vector<16x40xf32>
    %c0_340 = arith.constant 0 : index
    %c0_341 = arith.constant 0 : index
    %667 = vector.load %arg10[%c0_340, %c0_341] : memref<2x40xf32, #tpu.memory_space<vmem>>, vector<1x40xf32>
    %c1_342 = arith.constant 1 : index
    %c0_343 = arith.constant 0 : index
    %668 = vector.load %arg10[%c1_342, %c0_343] : memref<2x40xf32, #tpu.memory_space<vmem>>, vector<1x40xf32>
    %cst_344 = arith.constant dense<0.000000e+00> : vector<16xf32>
    %669 = vector.multi_reduction <add>, %666, %cst_344 [1] : vector<16x40xf32> to vector<16xf32>
    %670 = vector.shape_cast %669 : vector<16xf32> to vector<16x1xf32>
    %cst_345 = arith.constant 4.000000e+01 : f32
    %671 = vector.broadcast %cst_345 : f32 to vector<16x1xf32>
    %672 = arith.divf %670, %671 : vector<16x1xf32>
    %673 = vector.broadcast %672 : vector<16x1xf32> to vector<16x40xf32>
    %674 = arith.subf %666, %673 : vector<16x40xf32>
    %675 = arith.mulf %674, %674 : vector<16x40xf32>
    %cst_346 = arith.constant dense<0.000000e+00> : vector<16xf32>
    %676 = vector.multi_reduction <add>, %675, %cst_346 [1] : vector<16x40xf32> to vector<16xf32>
    %677 = vector.shape_cast %676 : vector<16xf32> to vector<16x1xf32>
    %cst_347 = arith.constant 4.000000e+01 : f32
    %678 = vector.broadcast %cst_347 : f32 to vector<16x1xf32>
    %679 = arith.divf %677, %678 : vector<16x1xf32>
    %cst_348 = arith.constant 9.99999974E-6 : f32
    %680 = vector.broadcast %cst_348 : f32 to vector<16x1xf32>
    %681 = arith.addf %679, %680 : vector<16x1xf32>
    %682 = math.rsqrt %681 : vector<16x1xf32>
    %683 = vector.broadcast %682 : vector<16x1xf32> to vector<16x40xf32>
    %684 = arith.mulf %674, %683 : vector<16x40xf32>
    %685 = vector.broadcast %667 : vector<1x40xf32> to vector<16x40xf32>
    %686 = arith.mulf %684, %685 : vector<16x40xf32>
    %687 = vector.broadcast %668 : vector<1x40xf32> to vector<16x40xf32>
    %688 = arith.addf %686, %687 : vector<16x40xf32>
    %689 = math.tanh %688 : vector<16x40xf32>
    %690 = vector.extract_strided_slice %688 {offsets = [0, 0], sizes = [8, 40], strides = [1, 1]} : vector<16x40xf32> to vector<8x40xf32>
    %c0_349 = arith.constant 0 : index
    %c0_350 = arith.constant 0 : index
    %c0_351 = arith.constant 0 : index
    %691 = vector.load %arg12[%c0_349, %c0_350, %c0_351] : memref<8x2x40xf32, #tpu.memory_space<vmem>>, vector<8x1x40xf32>
    %692 = vector.shape_cast %691 : vector<8x1x40xf32> to vector<8x40xf32>
    %693 = vector.shape_cast %690 : vector<8x40xf32> to vector<8x1x40xf32>
    tpu.vector_store %arg12[%c0_349, %c0_350, %c0_351], %693 {strides = array<i32>} : memref<8x2x40xf32, #tpu.memory_space<vmem>>, vector<8x1x40xf32>,
    %694 = vector.extract_strided_slice %689 {offsets = [0, 0], sizes = [8, 40], strides = [1, 1]} : vector<16x40xf32> to vector<8x40xf32>
    %cst_352 = arith.constant dense<0.000000e+00> : vector<40xf32>
    %695 = vector.multi_reduction <add>, %694, %cst_352 [0] : vector<8x40xf32> to vector<40xf32>
    %696 = vector.shape_cast %695 : vector<40xf32> to vector<1x40xf32>
    %cst_353 = arith.constant 8.000000e+00 : f32
    %697 = vector.broadcast %cst_353 : f32 to vector<1x40xf32>
    %698 = arith.divf %696, %697 : vector<1x40xf32>
    %c0_354 = arith.constant 0 : index
    %c0_355 = arith.constant 0 : index
    %699 = vector.load %arg11[%c0_354, %c0_355] : memref<2x40xf32, #tpu.memory_space<vmem>>, vector<1x40xf32>
    tpu.vector_store %arg11[%c0_354, %c0_355], %698 {strides = array<i32>} : memref<2x40xf32, #tpu.memory_space<vmem>>, vector<1x40xf32>,
    %700 = vector.extract_strided_slice %688 {offsets = [8, 0], sizes = [8, 40], strides = [1, 1]} : vector<16x40xf32> to vector<8x40xf32>
    %c0_356 = arith.constant 0 : index
    %c1_357 = arith.constant 1 : index
    %c0_358 = arith.constant 0 : index
    %701 = vector.load %arg12[%c0_356, %c1_357, %c0_358] : memref<8x2x40xf32, #tpu.memory_space<vmem>>, vector<8x1x40xf32>
    %702 = vector.shape_cast %701 : vector<8x1x40xf32> to vector<8x40xf32>
    %703 = vector.shape_cast %700 : vector<8x40xf32> to vector<8x1x40xf32>
    tpu.vector_store %arg12[%c0_356, %c1_357, %c0_358], %703 {strides = array<i32>} : memref<8x2x40xf32, #tpu.memory_space<vmem>>, vector<8x1x40xf32>,
    %704 = vector.extract_strided_slice %689 {offsets = [8, 0], sizes = [8, 40], strides = [1, 1]} : vector<16x40xf32> to vector<8x40xf32>
    %cst_359 = arith.constant dense<0.000000e+00> : vector<40xf32>
    %705 = vector.multi_reduction <add>, %704, %cst_359 [0] : vector<8x40xf32> to vector<40xf32>
    %706 = vector.shape_cast %705 : vector<40xf32> to vector<1x40xf32>
    %cst_360 = arith.constant 8.000000e+00 : f32
    %707 = vector.broadcast %cst_360 : f32 to vector<1x40xf32>
    %708 = arith.divf %706, %707 : vector<1x40xf32>
    %c1_361 = arith.constant 1 : index
    %c0_362 = arith.constant 0 : index
    %709 = vector.load %arg11[%c1_361, %c0_362] : memref<2x40xf32, #tpu.memory_space<vmem>>, vector<1x40xf32>
    tpu.vector_store %arg11[%c1_361, %c0_362], %708 {strides = array<i32>} : memref<2x40xf32, #tpu.memory_space<vmem>>, vector<1x40xf32>,
    return
  }
}

</mosaic_0001>

<bundles_post_ra>
// kernel: a_encoder_forward.1
= control target key start
LH: loop header
LB: loop body
LE: loop exit
PB: predicated region body
PF: predicated region fallthrough
CT: control target
= control target key end

     0   :  { %18 = vsyncpa [#allocation3], 0  ;;  %v6697_v2 = vmov 1   ;;  %v6698_v3 = vmov 0   ;;  %vm110_vm0 = vcmask 1041408   ;;  %vm105_vm1 = vcmask 605184   ;;  %s8343_s0 = inlined_call_operand.vmem [shape: f32[16,74], index: 0, kind: input, shape index: {}]   ;;  %s8344_s1 = inlined_call_operand.vmem [shape: f32[3,74,40], index: 1, kind: input, shape index: {}]   ;;  %s8345_s2 = inlined_call_operand.vmem [shape: f32[8,40], index: 2, kind: input, shape index: {}]   ;;  %s8346_s3 = inlined_call_operand.vmem [shape: f32[16,2], index: 3, kind: input, shape index: {}]   ;;  %s8347_s4 = inlined_call_operand.vmem [shape: f32[16,16], index: 4, kind: input, shape index: {}]   ;;  %s8348_s5 = inlined_call_operand.vmem [shape: f32[3,4,40,40], index: 5, kind: input, shape index: {}]   ;;  %s8349_s6 = inlined_call_operand.vmem [shape: f32[3,9,40], index: 6, kind: input, shape index: {}]   ;;  %s8350_s7 = inlined_call_operand.vmem [shape: f32[3,40,160], index: 7, kind: input, shape index: {}]   ;;  %s8351_s8 = inlined_call_operand.vmem [shape: f32[3,1,160], index: 8, kind: input, shape index: {}]   ;;  %s8352_s9 = inlined_call_operand.vmem [shape: f32[3,160,40], index: 9, kind: input, shape index: {}]   ;;  %s8353_s10 = inlined_call_operand.vmem [shape: f32[2,40], index: 10, kind: input, shape index: {}]   ;;  %s8354_s11 = inlined_call_operand.hbm [shape: f32[2,40], index: 11, kind: output, shape index: {0}]   ;;  %s8355_s12 = inlined_call_operand.hbm [shape: f32[8,2,40], index: 12, kind: output, shape index: {1}]  }
   0x1   :  { %v44_v0 = vld [vmem:[%s8346_s3] sm:$0xff]  ;;  %v5471_v1 = vld [vmem:[%s8344_s1 + $0x98] sm:$0x3]  ;;  %6495 = vset.pattern.permute.xlu1 %v6697_v2  ;;  %6494 = vset.pattern.permute.xlu0 %v6698_v3  ;;  %v5470_v4 = vld [vmem:[%s8344_s1 + $0x90] sm:$0xff]  ;;  %vm67_vm2 = vcmask 1046528   ;;  %vm48_vm3 = vcmask 1040384  }
   0x2   :  { %75 = vperm.xlu1 %6495, %v44_v0   ;;  %57 = vperm.xlu0 %6494, %v44_v0   ;;  %v45_v5 = vld [vmem:[%s8346_s3 + $0x8] sm:$0xff]  ;;  %v6788_v6 = vld [vmem:[%s8343_s0] sm:$0xff]  ;;  %v5485_v17 = vld [vmem:[%s8344_s1 + $0xd8] sm:$0xff] }
   0x3   :  { %6051 = vmatprep.subr.msk.mxu1 %vm110_vm0, %v5471_v1  ;;  %v6793_v7 = vld [vmem:[%s8343_s0 + $0x8] sm:$0xff]  ;;  %6071 = vmatprep.mubr.msk.f32.mxu1 %vm105_vm1, %v6788_v6  ;;  %v68_v10 = vrot.slane %v6788_v6, 1  ;;  %v5486_v12 = vld [vmem:[%s8344_s1 + $0xe0] sm:$0xff]  ;;  %v49_v13 = vrot.slane %v6788_v6, 7  ;;  %v5467_v19 = vld [vmem:[%s8344_s1 + $0x78] sm:$0xff] }
   0x4   :  { %6052 = vmatpush3.msk.msra.mxu1 %vm110_vm0, %v5471_v1  ;;  %v5469_v8 = vld [vmem:[%s8344_s1 + $0x88] sm:$0xff]  ;;  %v69_v11 = vrot.slane %v6793_v7, 1  ;;  %v50_v14 = vrot.slane %v6793_v7, 7  ;;  %v5468_v15 = vld [vmem:[%s8344_s1 + $0x80] sm:$0xff]  ;;  %v5484_v20 = vld [vmem:[%s8344_s1 + $0xd0] sm:$0xff] }
   0x5   :  { %6053 = vmatprep.subr.mxu1 %v5470_v4  ;;  %v5487_v9 = vld [vmem:[%s8344_s1 + $0xe8] sm:$0x3]  ;;  %v5466_v21 = vld [vmem:[%s8344_s1 + $0x70] sm:$0xff] }
   0x6   :  { %79 = vperm.xlu1 %6495, %v45_v5   ;;  %62 = vperm.xlu0 %6494, %v45_v5   ;;  %v6817_v16 = vsel %vm67_vm2, %v68_v10, %v69_v11  ;;  %v6826_v18 = vsel %vm48_vm3, %v49_v13, %v50_v14 }
   0x7   :  { %6054 = vmatpush3.msra.mxu1 %v5470_v4  ;;  %6097 = vmatprep.subr.msk.mxu0 %vm110_vm0, %v5487_v9 }
   0x8   :  { %6055 = vmatprep.subr.mxu1 %v5469_v8  ;;  %6098 = vmatpush3.msk.msra.mxu0 %vm110_vm0, %v5487_v9 }
   0x9   :  { %6056 = vmatpush3.msra.mxu1 %v5469_v8  ;;  %6099 = vmatprep.subr.mxu0 %v5486_v12 }
   0xa   :  { %6057 = vmatprep.subr.mxu1 %v5468_v15  ;;  %6100 = vmatpush3.msra.mxu0 %v5486_v12 }
   0xb   :  { %6058 = vmatpush3.msra.mxu1 %v5468_v15  ;;  %6101 = vmatprep.subr.mxu0 %v5485_v17 }
   0xc   :  { %19 = vsyncpa [#allocation5], 0  ;;  %6059 = vmatprep.subr.mxu1 %v5467_v19  ;;  %6102 = vmatpush3.msra.mxu0 %v5485_v17  ;;  %v5483_v22 = vld [vmem:[%s8344_s1 + $0xc8] sm:$0xff]  ;;  %v5482_v24 = vld [vmem:[%s8344_s1 + $0xc0] sm:$0xff]  ;;  %v54_v42 = vsel %vm48_vm3, %v6788_v6, %v49_v13  ;;  %v73_v47 = vsel %vm67_vm2, %v69_v11, %v6793_v7  ;;  %vm381_vm4 = vcmask 326656   ;;  %vm780_vm2 = vcmask 130048  }
   0xd   :  { %6060 = vmatpush3.msra.mxu1 %v5467_v19  ;;  %v5465_v23 = vld [vmem:[%s8344_s1 + $0x68] sm:$0xff]  ;;  %6103 = vmatprep.subr.mxu0 %v5484_v20  ;;  %v5464_v25 = vld [vmem:[%s8344_s1 + $0x60] sm:$0xff]  ;;  %v5481_v26 = vld [vmem:[%s8344_s1 + $0xb8] sm:$0xff]  ;;  %vm1917_vm3 = vcmask 261120  }
   0xe   :  { %6061 = vmatprep.subr.mxu1 %v5466_v21  ;;  %6104 = vmatpush3.msra.mxu0 %v5484_v20  ;;  %v5463_v27 = vld [vmem:[%s8344_s1 + $0x58] sm:$0xff]  ;;  %v5480_v28 = vld [vmem:[%s8344_s1 + $0xb0] sm:$0xff]  ;;  %v5479_v30 = vld [vmem:[%s8344_s1 + $0xa8] sm:$0xff] }
   0xf   :  { %6062 = vmatpush3.msra.mxu1 %v5466_v21  ;;  %6105 = vmatprep.subr.mxu0 %v5483_v22  ;;  %v5462_v29 = vld [vmem:[%s8344_s1 + $0x50] sm:$0xff]  ;;  %v93_v31 = vld [vmem:[%s8344_s1 + $0x48] sm:$0x3]  ;;  %v92_v32 = vld [vmem:[%s8344_s1 + $0x40] sm:$0xff] }
  0x10   :  { %6063 = vmatprep.subr.mxu1 %v5465_v23  ;;  %6106 = vmatpush3.msra.mxu0 %v5483_v22  ;;  %v5478_v33 = vld [vmem:[%s8344_s1 + $0xa0] sm:$0xff]  ;;  %v91_v34 = vld [vmem:[%s8344_s1 + $0x38] sm:$0xff]  ;;  %v90_v35 = vld [vmem:[%s8344_s1 + $0x30] sm:$0xff] }
  0x11   :  { %6064 = vmatpush3.msra.mxu1 %v5465_v23  ;;  %6107 = vmatprep.subr.mxu0 %v5482_v24  ;;  %v89_v36 = vld [vmem:[%s8344_s1 + $0x28] sm:$0xff]  ;;  %v88_v37 = vld [vmem:[%s8344_s1 + $0x20] sm:$0xff]  ;;  %v87_v38 = vld [vmem:[%s8344_s1 + $0x18] sm:$0xff] }
  0x12   :  { %6065 = vmatprep.subr.mxu1 %v5464_v25  ;;  %6108 = vmatpush3.msra.mxu0 %v5482_v24  ;;  %v86_v39 = vld [vmem:[%s8344_s1 + $0x10] sm:$0xff]  ;;  %v85_v40 = vld [vmem:[%s8344_s1 + $0x8] sm:$0xff]  ;;  %v84_v41 = vld [vmem:[%s8344_s1] sm:$0xff] }
  0x13   :  { %6066 = vmatpush3.msra.mxu1 %v5464_v25  ;;  %6109 = vmatprep.subr.mxu0 %v5481_v26  ;;  %v370_v60 = vld [vmem:[%s8345_s2] sm:$0xff]  ;;  %v424_v17 = vld [vmem:[%s8348_s5 + $0x18] sm:$0xff]  ;;  %v423_v19 = vld [vmem:[%s8348_s5 + $0x10] sm:$0xff] }
  0x14   :  { %6067 = vmatprep.subr.mxu1 %v5463_v27  ;;  %6110 = vmatpush3.msra.mxu0 %v5481_v26  ;;  %v425_v15 = vld [vmem:[%s8348_s5 + $0x20] sm:$0xff]  ;;  %v422_v21 = vld [vmem:[%s8348_s5 + $0x8] sm:$0xff]  ;;  %v5505_v22 = vld [vmem:[%s8348_s5 + $0x58] sm:$0xff] }
  0x15   :  { %6068 = vmatpush3.msra.mxu1 %v5463_v27  ;;  %6111 = vmatprep.subr.mxu0 %v5480_v28  ;;  %v5506_v20 = vld [vmem:[%s8348_s5 + $0x60] sm:$0xff]  ;;  %v5504_v24 = vld [vmem:[%s8348_s5 + $0x50] sm:$0xff]  ;;  %v5500_v25 = vld [vmem:[%s8348_s5 + $0x48] sm:$0xff] }
  0x16   :  { %6069 = vmatprep.subr.mxu1 %v5462_v29  ;;  %6112 = vmatpush3.msra.mxu0 %v5480_v28  ;;  %v421_v23 = vld [vmem:[%s8348_s5] sm:$0xff] }
  0x17   :  { %6070 = vmatpush3.msra.mxu1 %v5462_v29  ;;  %6113 = vmatprep.subr.mxu0 %v5479_v30 }
  0x18   :  { %6072 = vmatmul.mubr.msk.f32.vlgmr.msra.gmra.mxu1 %vm105_vm1, %v6793_v7  ;;  %6074 = vmatprep.subr.msk.mxu1 %vm110_vm0, %v93_v31 }
  0x19   :  { %6075 = vmatpush3.msk.msra.mxu1 %vm110_vm0, %v93_v31  ;;  %6114 = vmatpush3.msra.mxu0 %v5479_v30 }
  0x1a   :  { %6076 = vmatprep.subr.mxu1 %v92_v32  ;;  %6115 = vmatprep.subr.mxu0 %v5478_v33 }
  0x1b   :  { %6077 = vmatpush3.msra.mxu1 %v92_v32  ;;  %6116 = vmatpush3.msra.mxu0 %v5478_v33  ;;  %v5491_v33 = vld [vmem:[%s8349_s6] ss:$0 sm:$0xff] }
  0x1c   :  { %6078 = vmatprep.subr.mxu1 %v91_v34  ;;  %6496 = vset.pattern.permute.xlu0 %v6697_v2 }
  0x1d   :  { %6079 = vmatpush3.msra.mxu1 %v91_v34 }
  0x1e   :  { %6080 = vmatprep.subr.mxu1 %v90_v35 }
  0x1f   :  { %6081 = vmatpush3.msra.mxu1 %v90_v35  ;;  %v5492_v35 = vld [vmem:[%s8349_s6 + $0x1] ss:$0 sm:$0xff] }
  0x20   :  { %6082 = vmatprep.subr.mxu1 %v89_v36 }
  0x21   :  { %6083 = vmatpush3.msra.mxu1 %v89_v36 }
  0x22   :  { %6084 = vmatprep.subr.mxu1 %v88_v37 }
  0x23   :  { %6085 = vmatpush3.msra.mxu1 %v88_v37 }
  0x24   :  { %6086 = vmatprep.subr.mxu1 %v87_v38 }
  0x25   :  { %6087 = vmatpush3.msra.mxu1 %v87_v38 }
  0x26   :  { %6088 = vmatprep.subr.mxu1 %v86_v39 }
  0x27   :  { %6089 = vmatpush3.msra.mxu1 %v86_v39 }
  0x28   :  { %6090 = vmatprep.subr.mxu1 %v85_v40 }
  0x29   :  { %6091 = vmatpush3.msra.mxu1 %v85_v40 }
  0x2a   :  { %6092 = vmatprep.subr.mxu1 %v84_v41 }
  0x2b   :  { %6093 = vmatpush3.msra.mxu1 %v84_v41 }
  0x2c   :  { %6120 = vmatprep.subr.mxu1 %v425_v15 }
  0x7d   :  { %v76_v43 = vpop.permute.xlu1 %75  ;;  %v58_v44 = vpop.permute.xlu0 %57 }
  0x7e   :  { %v82_v45 = vmul.f32 %v76_v43, %v6817_v16  ;;  %v65_v46 = vmul.f32 %v58_v44, %v54_v42  ;;  %v5508_v16 = vld [vmem:[%s8348_s5 + $0x70] sm:$0xff]  ;;  %v5499_v42 = vld [vmem:[%s8348_s5 + $0x40] sm:$0xff]  ;;  %v5498_v43 = vld [vmem:[%s8348_s5 + $0x38] sm:$0xff] }
  0x7f   :  { %6146 = vmatprep.subr.mxu0 %v5508_v16  ;;  %v5497_v44 = vld [vmem:[%s8348_s5 + $0x30] sm:$0xff] }
  0x80   :  { %6094 = vmatprep.mubr.msk.f32.mxu1 %vm105_vm1, %v65_v46  ;;  %6117 = vmatprep.mubr.msk.f32.mxu0 %vm105_vm1, %v82_v45  ;;  %v5496_v45 = vld [vmem:[%s8348_s5 + $0x28] sm:$0xff]  ;;  %v377_v46 = vlaneseq }
  0x81   :  { %v80_v48 = vpop.permute.xlu1 %79  ;;  %v63_v49 = vpop.permute.xlu0 %62 }
  0x82   :  { %v83_v50 = vmul.f32 %v80_v48, %v73_v47  ;;  %v66_v51 = vmul.f32 %v63_v49, %v6826_v18  ;;  %v5507_v18 = vld [vmem:[%s8348_s5 + $0x68] sm:$0xff]  ;;  %v6989_v47 = vand.u32 127, %v377_v46  ;;  %v5509_v48 = vld [vmem:[%s8349_s6 + $0x4] ss:$0 sm:$0xff] }
  0x84   :  { %6095 = vmatmul.mubr.msk.f32.vlgmr.msra.gmra.mxu1 %vm105_vm1, %v66_v51  ;;  %6118 = vmatmul.mubr.msk.f32.vlgmr.msra.gmra.mxu0 %vm105_vm1, %v83_v50  ;;  %vm803_vm5 = vcmp.ge.s32.totalorder %v6989_v47, 8  ;;  %vm804_vm6 = vcmp.lt.s32.totalorder %v6989_v47, 16  ;;  %vm687_vm8 = vcmp.lt.s32.totalorder %v6989_v47, 8  ;;  %vm1075_vm9 = vcmp.ge.s32.totalorder %v6989_v47, 16 }
  0x85   :  { %6121 = vmatpush3.msra.mxu1 %v425_v15  ;;  %6147 = vmatpush3.msra.mxu0 %v5508_v16  ;;  %vm6996_vm7 = vmand %vm803_vm5, %vm804_vm6  ;;  %vm1076_vm10 = vcmp.lt.s32.totalorder %v6989_v47, 24  ;;  %vm1268_vm12 = vcmp.ge.s32.totalorder %v6989_v47, 24  ;;  %vm1269_vm13 = vcmp.lt.s32.totalorder %v6989_v47, 32  ;;  %vm1461_vm15 = vcmp.ge.s32.totalorder %v6989_v47, 32  ;;  %v7116_v16 = vld [vmem:[%s8347_s4 + $0x8] sm:$0xff] }
  0x86   :  { %6122 = vmatprep.subr.mxu1 %v424_v17  ;;  %6148 = vmatprep.subr.mxu0 %v5507_v18  ;;  %vm7061_vm11 = vmand %vm1075_vm9, %vm1076_vm10  ;;  %vm1462_vm0 = vcmp.lt.s32.totalorder %v6989_v47, 40  ;;  %vm5338_vm5 = vcmask 319488  }
  0x87   :  { %6123 = vmatpush3.msra.mxu1 %v424_v17  ;;  %6149 = vmatpush3.msra.mxu0 %v5507_v18  ;;  %vm7082_vm14 = vmand %vm1268_vm12, %vm1269_vm13 }
  0x88   :  { %6124 = vmatprep.subr.mxu1 %v423_v19  ;;  %6150 = vmatprep.subr.mxu0 %v5506_v20  ;;  %vm7093_vm1 = vmand %vm1461_vm15, %vm1462_vm0 }
  0x89   :  { %6125 = vmatpush3.msra.mxu1 %v423_v19  ;;  %6151 = vmatpush3.msra.mxu0 %v5506_v20  ;;  %v7122_v19 = vld [vmem:[%s8347_s4] sm:$0xff] }
  0x8a   :  { %6126 = vmatprep.subr.mxu1 %v422_v21  ;;  %6152 = vmatprep.subr.mxu0 %v5505_v22 }
  0x8b   :  { %6127 = vmatpush3.msra.mxu1 %v422_v21  ;;  %6153 = vmatpush3.msra.mxu0 %v5505_v22 }
  0x8c   :  { %6128 = vmatprep.subr.mxu1 %v421_v23  ;;  %6154 = vmatprep.subr.mxu0 %v5504_v24 }
  0x8d   :  { %6129 = vmatpush3.msra.mxu1 %v421_v23  ;;  %6155 = vmatpush3.msra.mxu0 %v5504_v24 }
  0x8e   :  { %6133 = vmatprep.subr.mxu1 %v5500_v25 }
  0xd8   :  { %v6073_v52 = vpop.f32.mrf.mxu1 }
  0xda   :  { %v180_v53 = vpop.f32.mrf.mxu1 }
 0x144   :  { %v6096_v54 = vpop.f32.mrf.mxu1  ;;  %v6119_v55 = vpop.f32.mrf.mxu0 }
 0x145   :  { %v270_v56 = vadd.f32 %v6096_v54, %v6073_v52 }
 0x146   :  { %v264_v57 = vpop.f32.mrf.mxu1  ;;  %v359_v61 = vpop.f32.mrf.mxu0 }
 0x147   :  { %v369_v58 = vadd.f32 %v6119_v55, %v270_v56  ;;  %v265_v59 = vadd.f32 %v264_v57, %v180_v53  ;;  %v5493_v53 = vld [vmem:[%s8349_s6 + $0x2] ss:$0 sm:$0xff] }
 0x149   :  { %v372_v62 = vmul.f32 6.3245554, %v369_v58  ;;  %v368_v63 = vadd.f32 %v359_v61, %v265_v59  ;;  %v5501_v59 = vld [vmem:[%s8349_s6 + $0x3] ss:$0 sm:$0xff] }
 0x14b   :  { %v6919_v0 = vadd.f32 %v372_v62, %v370_v60  ;;  %v371_v1 = vmul.f32 6.3245554, %v368_v63 }
 0x14d   :  { %v6921_v2 = vadd.f32 %v371_v1, %v370_v60  ;;  %v385_v3 = vsel %vm381_vm4, %v6919_v0, 0.0 }
 0x14e   :  { %386 = vadd.xlane.f32.xlu1 %v385_v3 }
 0x14f   :  { %v382_v4 = vsel %vm381_vm4, %v6921_v2, 0.0 }
 0x150   :  { %383 = vadd.xlane.f32.xlu0 %v382_v4 }
 0x1d7   :  { %v387_v5 = vpop.xlane.xlu1 %386 }
 0x1d8   :  { %v390_v6 = vmul.f32 0.025, %v387_v5 }
 0x1d9   :  { %v384_v7 = vpop.xlane.xlu0 %383 }
 0x1da   :  { %v389_v8 = vmul.f32 0.025, %v384_v7  ;;  %v392_v9 = vsub.f32 %v6919_v0, %v390_v6 }
 0x1dc   :  { %v391_v10 = vsub.f32 %v6921_v2, %v389_v8  ;;  %v394_v13 = vmul.f32 %v392_v9, %v392_v9 }
 0x1de   :  { %v393_v11 = vmul.f32 %v391_v10, %v391_v10  ;;  %v398_v14 = vsel %vm381_vm4, %v394_v13, 0.0 }
 0x1e0   :  { %v395_v12 = vsel %vm381_vm4, %v393_v11, 0.0 }
 0x1e1   :  { %396 = vadd.xlane.f32.xlu0 %v395_v12 }
 0x1e5   :  { %399 = vadd.xlane.f32.xlu0 %v398_v14 }
 0x26a   :  { %v397_v26 = vpop.xlane.xlu0 %396 }
 0x26b   :  { %v401_v27 = vmul.f32 0.025, %v397_v26 }
 0x26d   :  { %v403_v28 = vadd.f32 1e-05, %v401_v27 }
 0x26e   :  { %v400_v29 = vpop.xlane.xlu0 %399 }
 0x26f   :  { %6497 = vrsqrt.f32 %v403_v28  ;;  %v402_v30 = vmul.f32 0.025, %v400_v29 }
 0x271   :  { %v404_v31 = vadd.f32 1e-05, %v402_v30 }
 0x273   :  { %6499 = vrsqrt.f32 %v404_v31 }
 0x27c   :  { %v6498_v32 = vpop.eup %6497 }
 0x27d   :  { %v407_v34 = vmul.f32 %v6498_v32, %v391_v10 }
 0x27f   :  { %v413_v36 = vmul.f32 %v5491_v33, %v407_v34 }
 0x280   :  { %v6500_v37 = vpop.eup %6499 }
 0x281   :  { %v408_v38 = vmul.f32 %v6500_v37, %v392_v9  ;;  %v419_v39 = vadd.f32 %v5492_v35, %v413_v36 }
 0x283   :  { %v414_v40 = vmul.f32 %v5491_v33, %v408_v38  ;;  %6130 = vmatprep.mubr.msk.f32.mxu1 %vm381_vm4, %v419_v39  ;;  %6156 = vmatprep.mubr.msk.f32.mxu0 %vm381_vm4, %v419_v39 }
 0x285   :  { %v420_v41 = vadd.f32 %v5492_v35, %v414_v40 }
 0x287   :  { %6131 = vmatmul.mubr.msk.f32.vlgmr.msra.gmra.mxu1 %vm381_vm4, %v420_v41  ;;  %6157 = vmatmul.mubr.msk.f32.vlgmr.msra.gmra.mxu0 %vm381_vm4, %v420_v41 }
 0x288   :  { %6134 = vmatpush3.msra.mxu1 %v5500_v25  ;;  %6143 = vmatprep.mubr.msk.f32.mxu1 %vm381_vm4, %v419_v39 }
 0x289   :  { %6135 = vmatprep.subr.mxu1 %v5499_v42 }
 0x28a   :  { %6136 = vmatpush3.msra.mxu1 %v5499_v42 }
 0x28b   :  { %6137 = vmatprep.subr.mxu1 %v5498_v43 }
 0x28c   :  { %6138 = vmatpush3.msra.mxu1 %v5498_v43 }
 0x28d   :  { %6139 = vmatprep.subr.mxu1 %v5497_v44 }
 0x28e   :  { %6140 = vmatpush3.msra.mxu1 %v5497_v44 }
 0x28f   :  { %6141 = vmatprep.subr.mxu1 %v5496_v45 }
 0x290   :  { %6142 = vmatpush3.msra.mxu1 %v5496_v45 }
 0x291   :  { %6144 = vmatmul.mubr.msk.f32.vlgmr.msra.gmra.mxu1 %vm381_vm4, %v420_v41 }
 0x347   :  { %v6132_v49 = vpop.f32.mrf.mxu1  ;;  %v6158_v50 = vpop.f32.mrf.mxu0 }
 0x348   :  { %v7000_v52 = vadd.f32 %v6158_v50, %v5509_v48  ;;  %v509_v4 = vadd.f32 %v6132_v49, %v5493_v53 }
 0x349   :  { %v503_v54 = vpop.f32.mrf.mxu1  ;;  %v675_v55 = vpop.f32.mrf.mxu0 }
 0x34a   :  { %v504_v56 = vadd.f32 %v5493_v53, %v503_v54  ;;  %v7005_v57 = vadd.f32 %v5509_v48, %v675_v55  ;;  %6173 = vmatprep.subr.msk.mxu0 %vm6996_vm7, %v7000_v52  ;;  %v7047_v6 = vmul.f32 0.35355338, %v509_v4 }
 0x34b   :  { %6174 = vmatpush3.msk.msra.mxu0 %vm6996_vm7, %v7000_v52 }
 0x34c   :  { %v7014_v58 = vmul.f32 0.35355338, %v504_v56  ;;  %6175 = vmatprep.subr.msk.mxu0 %vm6996_vm7, %v7005_v57 }
 0x34d   :  { %6176 = vmatpush3.msk.msra.mxu0 %vm6996_vm7, %v7005_v57 }
 0x34e   :  { %6163 = vmatprep.mubr.msk.f32.mxu1 %vm381_vm4, %v7014_v58  ;;  %6180 = vmatprep.subr.msk.mxu0 %vm687_vm8, %v7000_v52 }
 0x351   :  { %v6145_v60 = vpop.f32.mrf.mxu1 }
 0x352   :  { %v7030_v61 = vadd.f32 %v6145_v60, %v5501_v59 }
 0x353   :  { %v589_v62 = vpop.f32.mrf.mxu1 }
 0x354   :  { %v7032_v63 = vadd.f32 %v5501_v59, %v589_v62  ;;  %v690_v1 = vsel %vm687_vm8, %v7030_v61, 0.0  ;;  %v807_v5 = vsel %vm6996_vm7, %v7030_v61, 0.0  ;;  %v1079_v9 = vsel %vm7061_vm11, %v7030_v61, 0.0 }
 0x355   :  { %6159 = vmatprep.subr.msk.mxu1 %vm381_vm4, %v690_v1  ;;  %v7109_v13 = vsel %vm7093_vm1, %v7030_v61, 0.0 }
 0x356   :  { %6160 = vmatpush3.xpose.msk.msra.mxu1 %vm381_vm4, %v690_v1  ;;  %v689_v3 = vsel %vm687_vm8, %v7032_v63, 0.0  ;;  %v806_v7 = vsel %vm6996_vm7, %v7032_v63, 0.0  ;;  %v1078_v10 = vsel %vm7061_vm11, %v7032_v63, 0.0 }
 0x357   :  { %6161 = vmatprep.subr.msk.mxu1 %vm381_vm4, %v689_v3 }
 0x35a   :  { %6162 = vmatpush3.xpose.msk.msra.mxu1 %vm381_vm4, %v689_v3 }
 0x35b   :  { %6166 = vmatprep.subr.msk.mxu1 %vm381_vm4, %v807_v5 }
 0x35d   :  { %6164 = vmatmul.mubr.msk.f32.vlgmr.msra.gmra.mxu1 %vm381_vm4, %v7047_v6 }
 0x35e   :  { %6167 = vmatpush3.xpose.msk.msra.mxu1 %vm381_vm4, %v807_v5  ;;  %6170 = vmatprep.mubr.msk.f32.mxu1 %vm381_vm4, %v7014_v58 }
 0x35f   :  { %6168 = vmatprep.subr.msk.mxu1 %vm381_vm4, %v806_v7 }
 0x362   :  { %6169 = vmatpush3.xpose.msk.msra.mxu1 %vm381_vm4, %v806_v7 }
 0x363   :  { %6187 = vmatprep.subr.msk.mxu1 %vm381_vm4, %v1079_v9 }
 0x365   :  { %6171 = vmatmul.mubr.msk.f32.vlgmr.msra.gmra.mxu1 %vm381_vm4, %v7047_v6 }
 0x366   :  { %6188 = vmatpush3.xpose.msk.msra.mxu1 %vm381_vm4, %v1079_v9  ;;  %6191 = vmatprep.mubr.msk.f32.mxu1 %vm381_vm4, %v7014_v58 }
 0x367   :  { %6189 = vmatprep.subr.msk.mxu1 %vm381_vm4, %v1078_v10 }
 0x36a   :  { %6190 = vmatpush3.xpose.msk.msra.mxu1 %vm381_vm4, %v1078_v10 }
 0x36b   :  { %6208 = vmatprep.subr.msk.mxu1 %vm7082_vm14, %v7000_v52 }
 0x36d   :  { %6192 = vmatmul.mubr.msk.f32.vlgmr.msra.gmra.mxu1 %vm381_vm4, %v7047_v6 }
 0x36e   :  { %6209 = vmatpush3.msk.msra.mxu1 %vm7082_vm14, %v7000_v52 }
 0x36f   :  { %6210 = vmatprep.subr.msk.mxu1 %vm7082_vm14, %v7005_v57 }
 0x370   :  { %6211 = vmatpush3.msk.msra.mxu1 %vm7082_vm14, %v7005_v57 }
 0x371   :  { %6215 = vmatprep.subr.msk.mxu1 %vm381_vm4, %v7109_v13 }
 0x41d   :  { %v6165_v14 = vpop.f32.mrf.mxu1 }
 0x41e   :  { %v777_v21 = vadd.f32 %v6165_v14, %v7116_v16 }
 0x41f   :  { %v771_v15 = vpop.f32.mrf.mxu1 }
 0x420   :  { %v772_v24 = vadd.f32 %v771_v15, %v7122_v19  ;;  %v784_v26 = vsel %vm780_vm2, %v777_v21, -inf }
 0x422   :  { %v781_v29 = vsel %vm780_vm2, %v772_v24, -inf }
 0x425   :  { %v6172_v17 = vpop.f32.mrf.mxu1 }
 0x426   :  { %v888_v18 = vadd.f32 %v6172_v17, %v7116_v16 }
 0x427   :  { %v882_v20 = vpop.f32.mrf.mxu1 }
 0x428   :  { %v883_v22 = vadd.f32 %v882_v20, %v7122_v19  ;;  %v894_v23 = vsel %vm780_vm2, %v888_v18, -inf }
 0x429   :  { %895 = vmax.xlane.f32.xlu0 %v894_v23 }
 0x42a   :  { %v891_v25 = vsel %vm780_vm2, %v883_v22, -inf }
 0x42b   :  { %892 = vmax.xlane.f32.xlu1 %v891_v25 }
 0x42d   :  { %785 = vmax.xlane.f32.xlu0 %v784_v26  ;;  %v6193_v27 = vpop.f32.mrf.mxu1 }
 0x42e   :  { %v1160_v28 = vadd.f32 %v6193_v27, %v7116_v16 }
 0x42f   :  { %v1154_v30 = vpop.f32.mrf.mxu1  ;;  %782 = vmax.xlane.f32.xlu1 %v781_v29 }
 0x430   :  { %v1155_v31 = vadd.f32 %v1154_v30, %v7122_v19  ;;  %v1166_v32 = vsel %vm780_vm2, %v1160_v28, -inf }
 0x431   :  { %1167 = vmax.xlane.f32.xlu0 %v1166_v32 }
 0x432   :  { %v1163_v33 = vsel %vm780_vm2, %v1155_v31, -inf }
 0x433   :  { %1164 = vmax.xlane.f32.xlu1 %v1163_v33 }
 0x4b2   :  { %v896_v34 = vpop.xlane.xlu0 %895 }
 0x4b3   :  { %v898_v35 = vsub.f32 %v888_v18, %v896_v34 }
 0x4b4   :  { %v893_v36 = vpop.xlane.xlu1 %892 }
 0x4b5   :  { %v901_v37 = vmul.f32 1.442695, %v898_v35  ;;  %v897_v38 = vsub.f32 %v883_v22, %v893_v36  ;;  %v1272_v35 = vsel %vm7082_vm14, %v7030_v61, 0.0  ;;  %v1271_v36 = vsel %vm7082_vm14, %v7032_v63, 0.0 }
 0x4b6   :  { %v786_v39 = vpop.xlane.xlu0 %785 }
 0x4b7   :  { %6501 = vpow2.f32 %v901_v37  ;;  %v899_v40 = vmul.f32 1.442695, %v897_v38  ;;  %v788_v41 = vsub.f32 %v777_v21, %v786_v39 }
 0x4b8   :  { %v783_v42 = vpop.xlane.xlu1 %782 }
 0x4b9   :  { %6503 = vpow2.f32 %v899_v40  ;;  %v791_v43 = vmul.f32 1.442695, %v788_v41  ;;  %v787_v44 = vsub.f32 %v772_v24, %v783_v42 }
 0x4ba   :  { %v1168_v45 = vpop.xlane.xlu0 %1167 }
 0x4bb   :  { %6505 = vpow2.f32 %v791_v43  ;;  %v789_v48 = vmul.f32 1.442695, %v787_v44  ;;  %v1170_v49 = vsub.f32 %v1160_v28, %v1168_v45 }
 0x4bc   :  { %v1165_v50 = vpop.xlane.xlu1 %1164 }
 0x4bd   :  { %6507 = vpow2.f32 %v789_v48  ;;  %v1173_v53 = vmul.f32 1.442695, %v1170_v49  ;;  %v1169_v54 = vsub.f32 %v1155_v31, %v1165_v50 }
 0x4bf   :  { %6509 = vpow2.f32 %v1173_v53  ;;  %v1171_v55 = vmul.f32 1.442695, %v1169_v54 }
 0x4c1   :  { %6511 = vpow2.f32 %v1171_v55 }
 0x4c4   :  { %v6502_v56 = vpop.eup %6501 }
 0x4c5   :  { %v906_v59 = vsel %vm780_vm2, %v6502_v56, 0.0 }
 0x4c6   :  { %v6504_v60 = vpop.eup %6503  ;;  %907 = vadd.xlane.f32.xlu0 %v906_v59 }
 0x4c7   :  { %v903_v62 = vsel %vm780_vm2, %v6504_v60, 0.0 }
 0x4c8   :  { %v6506_v1 = vpop.eup %6505  ;;  %904 = vadd.xlane.f32.xlu1 %v903_v62 }
 0x4c9   :  { %v796_v3 = vsel %vm780_vm2, %v6506_v1, 0.0 }
 0x4ca   :  { %v6508_v4 = vpop.eup %6507  ;;  %797 = vadd.xlane.f32.xlu0 %v796_v3 }
 0x4cb   :  { %v793_v5 = vsel %vm780_vm2, %v6508_v4, 0.0 }
 0x4cc   :  { %v6510_v7 = vpop.eup %6509  ;;  %794 = vadd.xlane.f32.xlu1 %v793_v5 }
 0x4cd   :  { %v1178_v9 = vsel %vm780_vm2, %v6510_v7, 0.0 }
 0x4ce   :  { %v6512_v10 = vpop.eup %6511  ;;  %1179 = vadd.xlane.f32.xlu0 %v1178_v9 }
 0x4cf   :  { %v1175_v14 = vsel %vm780_vm2, %v6512_v10, 0.0 }
 0x4d0   :  { %1176 = vadd.xlane.f32.xlu1 %v1175_v14 }
 0x54f   :  { %v908_v15 = vpop.xlane.xlu0 %907 }
 0x550   :  { %6513 = vrcp.f32 %v908_v15 }
 0x551   :  { %v905_v17 = vpop.xlane.xlu1 %904 }
 0x552   :  { %6515 = vrcp.f32 %v905_v17 }
 0x553   :  { %v798_v18 = vpop.xlane.xlu0 %797 }
 0x554   :  { %6517 = vrcp.f32 %v798_v18  ;;  %v1464_v18 = vsel %vm7093_vm1, %v7032_v63, 0.0 }
 0x555   :  { %v795_v20 = vpop.xlane.xlu1 %794 }
 0x556   :  { %6519 = vrcp.f32 %v795_v20 }
 0x557   :  { %v1180_v21 = vpop.xlane.xlu0 %1179 }
 0x558   :  { %6521 = vrcp.f32 %v1180_v21 }
 0x559   :  { %v1177_v22 = vpop.xlane.xlu1 %1176 }
 0x55a   :  { %6523 = vrcp.f32 %v1177_v22 }
 0x55d   :  { %v6514_v23 = vpop.eup %6513 }
 0x55e   :  { %v912_v26 = vmul.f32 %v6514_v23, %v6502_v56 }
 0x55f   :  { %v6516_v24 = vpop.eup %6515 }
 0x560   :  { %v911_v25 = vmul.f32 %v6516_v24, %v6504_v60 }
 0x561   :  { %v6518_v27 = vpop.eup %6517 }
 0x562   :  { %6177 = vmatprep.mubr.msk.f32.mxu0 %vm780_vm2, %v911_v25  ;;  %v802_v30 = vmul.f32 %v6518_v27, %v6506_v1 }
 0x563   :  { %v6520_v28 = vpop.eup %6519  ;;  %6178 = vmatmul.mubr.msk.f32.vlgmr.msra.gmra.mxu0 %vm780_vm2, %v912_v26 }
 0x564   :  { %6181 = vmatpush3.msk.msra.mxu0 %vm687_vm8, %v7000_v52  ;;  %v801_v29 = vmul.f32 %v6520_v28, %v6508_v4 }
 0x565   :  { %6182 = vmatprep.subr.msk.mxu0 %vm687_vm8, %v7005_v57  ;;  %v6522_v31 = vpop.eup %6521 }
 0x566   :  { %6183 = vmatpush3.msk.msra.mxu0 %vm687_vm8, %v7005_v57  ;;  %6184 = vmatprep.mubr.msk.f32.mxu0 %vm780_vm2, %v801_v29  ;;  %v1184_v34 = vmul.f32 %v6522_v31, %v6510_v7 }
 0x567   :  { %v6524_v32 = vpop.eup %6523  ;;  %6194 = vmatprep.subr.msk.mxu0 %vm7061_vm11, %v7000_v52  ;;  %6185 = vmatmul.mubr.msk.f32.vlgmr.msra.gmra.mxu0 %vm780_vm2, %v802_v30 }
 0x568   :  { %6195 = vmatpush3.msk.msra.mxu0 %vm7061_vm11, %v7000_v52  ;;  %v1183_v33 = vmul.f32 %v6524_v32, %v6512_v10 }
 0x569   :  { %6196 = vmatprep.subr.msk.mxu0 %vm7061_vm11, %v7005_v57 }
 0x56a   :  { %6197 = vmatpush3.msk.msra.mxu0 %vm7061_vm11, %v7005_v57  ;;  %6198 = vmatprep.mubr.msk.f32.mxu0 %vm780_vm2, %v1183_v33 }
 0x56b   :  { %6201 = vmatprep.subr.msk.mxu0 %vm381_vm4, %v1272_v35  ;;  %6199 = vmatmul.mubr.msk.f32.vlgmr.msra.gmra.mxu0 %vm780_vm2, %v1184_v34  ;;  %v5556_v34 = vld [vmem:[%s8348_s5 + $0x98] sm:$0xff] }
 0x56c   :  { %6202 = vmatpush3.xpose.msk.msra.mxu0 %vm381_vm4, %v1272_v35  ;;  %6205 = vmatprep.mubr.msk.f32.mxu0 %vm381_vm4, %v7014_v58 }
 0x56d   :  { %6203 = vmatprep.subr.msk.mxu0 %vm381_vm4, %v1271_v36 }
 0x570   :  { %6204 = vmatpush3.xpose.msk.msra.mxu0 %vm381_vm4, %v1271_v36 }
 0x571   :  { %6222 = vmatprep.subr.msk.mxu0 %vm7093_vm1, %v7000_v52 }
 0x573   :  { %6206 = vmatmul.mubr.msk.f32.vlgmr.msra.gmra.mxu0 %vm381_vm4, %v7047_v6 }
 0x574   :  { %6223 = vmatpush3.msk.msra.mxu0 %vm7093_vm1, %v7000_v52 }
 0x575   :  { %6224 = vmatprep.subr.msk.mxu0 %vm7093_vm1, %v7005_v57 }
 0x576   :  { %6225 = vmatpush3.msk.msra.mxu0 %vm7093_vm1, %v7005_v57 }
 0x577   :  { %6229 = vmatprep.subr.mxu0 %v5556_v34 }
 0x623   :  { %v6179_v61 = vpop.f32.mrf.mxu0 }
 0x625   :  { %v985_v37 = vpop.f32.mrf.mxu0 }
 0x627   :  { %v6186_v38 = vpop.f32.mrf.mxu0 }
 0x628   :  { %v1072_v39 = vadd.f32 %v6186_v38, %v6179_v61 }
 0x629   :  { %v1066_v40 = vpop.f32.mrf.mxu0 }
 0x62a   :  { %v1067_v41 = vadd.f32 %v1066_v40, %v985_v37  ;;  %v5555_v40 = vld [vmem:[%s8348_s5 + $0x90] sm:$0xff] }
 0x62b   :  { %v6200_v42 = vpop.f32.mrf.mxu0 }
 0x62c   :  { %v1267_v43 = vadd.f32 %v6200_v42, %v1072_v39  ;;  %v5553_v42 = vld [vmem:[%s8348_s5 + $0x80] sm:$0xff] }
 0x62d   :  { %v1257_v44 = vpop.f32.mrf.mxu0 }
 0x62e   :  { %v1266_v45 = vadd.f32 %v1257_v44, %v1067_v41  ;;  %v5554_v41 = vld [vmem:[%s8348_s5 + $0x88] sm:$0xff] }
 0x633   :  { %v6207_v48 = vpop.f32.mrf.mxu0 }
 0x634   :  { %v1353_v52 = vadd.f32 %v6207_v48, %v7116_v16 }
 0x635   :  { %v1347_v49 = vpop.f32.mrf.mxu0 }
 0x636   :  { %v1348_v50 = vadd.f32 %v1347_v49, %v7122_v19  ;;  %v1359_v53 = vsel %vm780_vm2, %v1353_v52, -inf  ;;  %v5557_v49 = vld [vmem:[%s8349_s6 + $0x5] ss:$0 sm:$0xff] }
 0x637   :  { %1360 = vmax.xlane.f32.xlu0 %v1359_v53 }
 0x638   :  { %v1356_v57 = vsel %vm780_vm2, %v1348_v50, -inf }
 0x639   :  { %1357 = vmax.xlane.f32.xlu1 %v1356_v57 }
 0x6c0   :  { %v1361_v54 = vpop.xlane.xlu0 %1360 }
 0x6c1   :  { %v1363_v55 = vsub.f32 %v1353_v52, %v1361_v54 }
 0x6c2   :  { %v1358_v56 = vpop.xlane.xlu1 %1357 }
 0x6c3   :  { %v1366_v59 = vmul.f32 1.442695, %v1363_v55  ;;  %v1362_v60 = vsub.f32 %v1348_v50, %v1358_v56 }
 0x6c5   :  { %6525 = vpow2.f32 %v1366_v59  ;;  %v1364_v62 = vmul.f32 1.442695, %v1362_v60 }
 0x6c7   :  { %6527 = vpow2.f32 %v1364_v62 }
 0x6d2   :  { %v6526_v1 = vpop.eup %6525 }
 0x6d3   :  { %v1371_v3 = vsel %vm780_vm2, %v6526_v1, 0.0 }
 0x6d4   :  { %v6528_v4 = vpop.eup %6527  ;;  %1372 = vadd.xlane.f32.xlu0 %v1371_v3 }
 0x6d5   :  { %v1368_v5 = vsel %vm780_vm2, %v6528_v4, 0.0 }
 0x6d6   :  { %1369 = vadd.xlane.f32.xlu1 %v1368_v5 }
 0x75d   :  { %v1373_v7 = vpop.xlane.xlu0 %1372 }
 0x75e   :  { %6529 = vrcp.f32 %v1373_v7 }
 0x75f   :  { %v1370_v9 = vpop.xlane.xlu1 %1369 }
 0x760   :  { %6531 = vrcp.f32 %v1370_v9 }
 0x76b   :  { %v6530_v10 = vpop.eup %6529 }
 0x76c   :  { %v1377_v17 = vmul.f32 %v6530_v10, %v6526_v1 }
 0x76d   :  { %v6532_v14 = vpop.eup %6531 }
 0x76e   :  { %v1376_v15 = vmul.f32 %v6532_v14, %v6528_v4  ;;  %v1797_v14 = vld [vmem:[%s8350_s7 + $0x48] sm:$0xff] }
 0x770   :  { %6212 = vmatprep.mubr.msk.f32.mxu1 %vm780_vm2, %v1376_v15  ;;  %v1796_v15 = vld [vmem:[%s8350_s7 + $0x40] sm:$0xff] }
 0x771   :  { %6213 = vmatmul.mubr.msk.f32.vlgmr.msra.gmra.mxu1 %vm780_vm2, %v1377_v17  ;;  %v1795_v17 = vld [vmem:[%s8350_s7 + $0x38] sm:$0xff] }
 0x772   :  { %6216 = vmatpush3.xpose.msk.msra.mxu1 %vm381_vm4, %v7109_v13  ;;  %6219 = vmatprep.mubr.msk.f32.mxu1 %vm381_vm4, %v7014_v58 }
 0x773   :  { %6217 = vmatprep.subr.msk.mxu1 %vm381_vm4, %v1464_v18 }
 0x776   :  { %6218 = vmatpush3.xpose.msk.msra.mxu1 %vm381_vm4, %v1464_v18  ;;  %v1794_v18 = vld [vmem:[%s8350_s7 + $0x30] sm:$0xff] }
 0x777   :  { %1838 = vmatprep.subr.mxu1 %v1797_v14 }
 0x779   :  { %6220 = vmatmul.mubr.msk.f32.vlgmr.msra.gmra.mxu1 %vm381_vm4, %v7047_v6 }
 0x77a   :  { %1839 = vmatpush1.msra.mxu1 %v1796_v15 }
 0x77b   :  { %1840 = vmatprep.subr.mxu1 %v1795_v17 }
 0x77c   :  { %1841 = vmatpush1.msra.mxu1 %v1794_v18 }
 0x831   :  { %v6214_v20 = vpop.f32.mrf.mxu1 }
 0x832   :  { %v1460_v21 = vadd.f32 %v6214_v20, %v1267_v43  ;;  %v5552_v43 = vld [vmem:[%s8348_s5 + $0x78] sm:$0xff]  ;;  %v1793_v20 = vld [vmem:[%s8350_s7 + $0x28] sm:$0xff] }
 0x833   :  { %v1450_v22 = vpop.f32.mrf.mxu1  ;;  %1842 = vmatprep.subr.mxu1 %v1793_v20 }
 0x834   :  { %v1459_v23 = vadd.f32 %v1450_v22, %v1266_v45  ;;  %v1791_v22 = vld [vmem:[%s8350_s7 + $0x18] sm:$0xff] }
 0x839   :  { %v6221_v24 = vpop.f32.mrf.mxu1 }
 0x83a   :  { %v1546_v13 = vadd.f32 %v6221_v24, %v7116_v16  ;;  %v1789_v24 = vld [vmem:[%s8350_s7 + $0x8] sm:$0xff] }
 0x83b   :  { %v1540_v25 = vpop.f32.mrf.mxu1 }
 0x83c   :  { %v1541_v63 = vadd.f32 %v1540_v25, %v7122_v19  ;;  %v1552_v26 = vsel %vm780_vm2, %v1546_v13, -inf  ;;  %v1788_v25 = vld [vmem:[%s8350_s7] sm:$0xff] }
 0x83d   :  { %1553 = vmax.xlane.f32.xlu0 %v1552_v26  ;;  %v1911_v26 = vld [vmem:[%s8352_s9 + $0x70] sm:$0xff] }
 0x83e   :  { %v1549_v58 = vsel %vm780_vm2, %v1541_v63, -inf }
 0x83f   :  { %1550 = vmax.xlane.f32.xlu1 %v1549_v58  ;;  %v1910_v58 = vld [vmem:[%s8352_s9 + $0x68] sm:$0xff] }
 0x8c6   :  { %v1554_v27 = vpop.xlane.xlu0 %1553 }
 0x8c7   :  { %v1556_v28 = vsub.f32 %v1546_v13, %v1554_v27  ;;  %v6699_v13 = vmov 0.0   ;;  %v1909_v27 = vld [vmem:[%s8352_s9 + $0x60] sm:$0xff] }
 0x8c8   :  { %v1551_v29 = vpop.xlane.xlu1 %1550  ;;  %1880 = vmatprep.mubr.f32.mxu1 %v6699_v13 }
 0x8c9   :  { %v1559_v6 = vmul.f32 1.442695, %v1556_v28  ;;  %v1555_v30 = vsub.f32 %v1541_v63, %v1551_v29  ;;  %v1912_v63 = vld [vmem:[%s8352_s9 + $0x78] sm:$0xff]  ;;  %v1907_v29 = vld [vmem:[%s8352_s9 + $0x50] sm:$0xff] }
 0x8ca   :  { %v1908_v28 = vld [vmem:[%s8352_s9 + $0x58] sm:$0xff] }
 0x8cb   :  { %6533 = vpow2.f32 %v1559_v6  ;;  %v1557_v31 = vmul.f32 1.442695, %v1555_v30  ;;  %v1906_v6 = vld [vmem:[%s8352_s9 + $0x48] sm:$0xff]  ;;  %v1905_v30 = vld [vmem:[%s8352_s9 + $0x40] sm:$0xff] }
 0x8cd   :  { %6535 = vpow2.f32 %v1557_v31  ;;  %v1904_v31 = vld [vmem:[%s8352_s9 + $0x38] sm:$0xff] }
 0x8d8   :  { %v6534_v32 = vpop.eup %6533 }
 0x8d9   :  { %v1564_v16 = vsel %vm780_vm2, %v6534_v32, 0.0 }
 0x8da   :  { %v6536_v33 = vpop.eup %6535  ;;  %1565 = vadd.xlane.f32.xlu0 %v1564_v16  ;;  %v1902_v16 = vld [vmem:[%s8352_s9 + $0x28] sm:$0xff] }
 0x8db   :  { %v1561_v19 = vsel %vm780_vm2, %v6536_v33, 0.0 }
 0x8dc   :  { %1562 = vadd.xlane.f32.xlu1 %v1561_v19  ;;  %v1900_v19 = vld [vmem:[%s8352_s9 + $0x18] sm:$0xff] }
 0x963   :  { %v1566_v35 = vpop.xlane.xlu0 %1565 }
 0x964   :  { %6537 = vrcp.f32 %v1566_v35  ;;  %v1898_v35 = vld [vmem:[%s8352_s9 + $0x8] sm:$0xff] }
 0x965   :  { %v1563_v36 = vpop.xlane.xlu1 %1562 }
 0x966   :  { %6539 = vrcp.f32 %v1563_v36  ;;  %v1897_v36 = vld [vmem:[%s8352_s9] sm:$0xff] }
 0x971   :  { %v6538_v61 = vpop.eup %6537 }
 0x972   :  { %v1570_v39 = vmul.f32 %v6538_v61, %v6534_v32  ;;  %v1903_v32 = vld [vmem:[%s8352_s9 + $0x30] sm:$0xff] }
 0x973   :  { %v6540_v37 = vpop.eup %6539 }
 0x974   :  { %v1569_v38 = vmul.f32 %v6540_v37, %v6536_v33  ;;  %v1901_v33 = vld [vmem:[%s8352_s9 + $0x20] sm:$0xff] }
 0x976   :  { %6226 = vmatprep.mubr.msk.f32.mxu0 %vm780_vm2, %v1569_v38 }
 0x977   :  { %6227 = vmatmul.mubr.msk.f32.vlgmr.msra.gmra.mxu0 %vm780_vm2, %v1570_v39 }
 0x978   :  { %6230 = vmatpush3.msra.mxu0 %v5556_v34  ;;  %v1899_v34 = vld [vmem:[%s8352_s9 + $0x10] sm:$0xff] }
 0x979   :  { %6231 = vmatprep.subr.mxu0 %v5555_v40 }
 0x97a   :  { %6232 = vmatpush3.msra.mxu0 %v5555_v40 }
 0x97b   :  { %6233 = vmatprep.subr.mxu0 %v5554_v41 }
 0x97c   :  { %6234 = vmatpush3.msra.mxu0 %v5554_v41 }
 0x97d   :  { %6235 = vmatprep.subr.mxu0 %v5553_v42 }
 0x97e   :  { %6236 = vmatpush3.msra.mxu0 %v5553_v42 }
 0x97f   :  { %6237 = vmatprep.subr.mxu0 %v5552_v43 }
 0x980   :  { %6238 = vmatpush3.msra.mxu0 %v5552_v43 }
 0x981   :  { %1924 = vmatprep.subr.mxu0 %v6699_v13 }
 0xa37   :  { %v6228_v44 = vpop.f32.mrf.mxu0 }
 0xa38   :  { %v1653_v52 = vadd.f32 %v6228_v44, %v1460_v21  ;;  %v1792_v21 = vld [vmem:[%s8350_s7 + $0x20] sm:$0xff] }
 0xa39   :  { %v1643_v45 = vpop.f32.mrf.mxu0  ;;  %1843 = vmatpush1.msra.mxu1 %v1792_v21 }
 0xa3a   :  { %v1652_v48 = vadd.f32 %v1643_v45, %v1459_v23  ;;  %v1790_v23 = vld [vmem:[%s8350_s7 + $0x10] sm:$0xff]  ;;  %1844 = vmatprep.subr.mxu1 %v1791_v22 }
 0xa3b   :  { %1845 = vmatpush1.msra.mxu1 %v1790_v23 }
 0xa3c   :  { %6239 = vmatprep.mubr.msk.f32.mxu0 %vm381_vm4, %v1652_v48  ;;  %1846 = vmatprep.subr.mxu1 %v1789_v24  ;;  %v5560_v48 = vld [vmem:[%s8349_s6 + $0x6] ss:$0 sm:$0xff] }
 0xa3d   :  { %6240 = vmatmul.mubr.msk.f32.vlgmr.msra.gmra.mxu0 %vm381_vm4, %v1653_v52  ;;  %1847 = vmatpush1.msra.mxu1 %v1788_v25  ;;  %v5566_v25 = vld [vmem:[%s8349_s6 + $0x8] ss:$0 sm:$0xff] }
 0xa3e   :  { %1925 = vmatpush1.msra.mxu0 %v1912_v63 }
 0xa3f   :  { %1926 = vmatprep.subr.mxu0 %v6699_v13 }
 0xa40   :  { %1927 = vmatpush1.msra.mxu0 %v1911_v26 }
 0xa41   :  { %1928 = vmatprep.subr.mxu0 %v6699_v13 }
 0xa42   :  { %1929 = vmatpush1.msra.mxu0 %v1910_v58 }
 0xa43   :  { %1930 = vmatprep.subr.mxu0 %v6699_v13 }
 0xa44   :  { %1931 = vmatpush1.msra.mxu0 %v1909_v27 }
 0xa45   :  { %1932 = vmatprep.subr.mxu0 %v6699_v13 }
 0xa46   :  { %1933 = vmatpush1.msra.mxu0 %v1908_v28 }
 0xa47   :  { %1934 = vmatprep.subr.mxu0 %v6699_v13 }
 0xa48   :  { %1935 = vmatpush1.msra.mxu0 %v1907_v29 }
 0xa49   :  { %1936 = vmatprep.subr.mxu0 %v6699_v13 }
 0xa4a   :  { %1937 = vmatpush1.msra.mxu0 %v1906_v6 }
 0xa4b   :  { %1938 = vmatprep.subr.mxu0 %v6699_v13 }
 0xa4c   :  { %1939 = vmatpush1.msra.mxu0 %v1905_v30 }
 0xa4d   :  { %1940 = vmatprep.subr.mxu0 %v6699_v13 }
 0xa4e   :  { %1941 = vmatpush1.msra.mxu0 %v1904_v31 }
 0xa4f   :  { %1942 = vmatprep.subr.mxu0 %v6699_v13 }
 0xa50   :  { %1943 = vmatpush1.msra.mxu0 %v1903_v32 }
 0xa51   :  { %1944 = vmatprep.subr.mxu0 %v6699_v13 }
 0xa52   :  { %1945 = vmatpush1.msra.mxu0 %v1902_v16 }
 0xa53   :  { %1946 = vmatprep.subr.mxu0 %v6699_v13 }
 0xa54   :  { %1947 = vmatpush1.msra.mxu0 %v1901_v33 }
 0xa55   :  { %1948 = vmatprep.subr.mxu0 %v6699_v13 }
 0xa56   :  { %1949 = vmatpush1.msra.mxu0 %v1900_v19 }
 0xa57   :  { %1950 = vmatprep.subr.mxu0 %v6699_v13 }
 0xa58   :  { %1951 = vmatpush1.msra.mxu0 %v1899_v34 }
 0xa59   :  { %1952 = vmatprep.subr.mxu0 %v6699_v13 }
 0xa5a   :  { %1953 = vmatpush1.msra.mxu0 %v1898_v35 }
 0xa5b   :  { %1954 = vmatprep.subr.mxu0 %v6699_v13 }
 0xa5c   :  { %1955 = vmatpush1.msra.mxu0 %v1897_v36 }
 0xa5d   :  { %1980 = vmatprep.subr.mxu0 %v6699_v13 }
 0xafd   :  { %v6241_v50 = vpop.f32.mrf.mxu0 }
 0xafe   :  { %v1743_v53 = vadd.f32 %v6241_v50, %v5557_v49 }
 0xaff   :  { %v1737_v57 = vpop.f32.mrf.mxu0 }
 0xb00   :  { %v7242_v54 = vadd.f32 %v1743_v53, %v6919_v0  ;;  %v1738_v55 = vadd.f32 %v5557_v49, %v1737_v57  ;;  %v5561_v49 = vld [vmem:[%s8349_s6 + $0x7] ss:$0 sm:$0xff] }
 0xb02   :  { %v7245_v56 = vadd.f32 %v1738_v55, %v6921_v2  ;;  %v1753_v59 = vsel %vm381_vm4, %v7242_v54, 0.0  ;;  %v1916_v55 = vld [vmem:[%s8352_s9 + $0x98] sm:$0xff] }
 0xb03   :  { %1754 = vadd.xlane.f32.xlu0 %v1753_v59  ;;  %1981 = vmatpush2.msra.mxu0 %v1916_v55  ;;  %v1915_v59 = vld [vmem:[%s8352_s9 + $0x90] sm:$0xff] }
 0xb04   :  { %v1750_v60 = vsel %vm381_vm4, %v7245_v56, 0.0  ;;  %1982 = vmatprep.subr.mxu0 %v6699_v13  ;;  %v5570_v55 = vld [vmem:[%s8349_s6 + $0x11] ss:$0 sm:$0xff] }
 0xb05   :  { %1751 = vadd.xlane.f32.xlu1 %v1750_v60  ;;  %1983 = vmatpush2.msra.mxu0 %v1915_v59  ;;  %v1914_v60 = vld [vmem:[%s8352_s9 + $0x88] sm:$0xff] }
 0xb06   :  { %1984 = vmatprep.subr.mxu0 %v6699_v13 }
 0xb07   :  { %1985 = vmatpush2.msra.mxu0 %v1914_v60 }
 0xb08   :  { %1986 = vmatprep.subr.mxu0 %v6699_v13 }
 0xb8c   :  { %v1755_v62 = vpop.xlane.xlu0 %1754 }
 0xb8d   :  { %v1757_v1 = vmul.f32 0.025, %v1755_v62  ;;  %v1913_v62 = vld [vmem:[%s8352_s9 + $0x80] sm:$0xff] }
 0xb8e   :  { %v1752_v3 = vpop.xlane.xlu1 %1751  ;;  %1987 = vmatpush2.msra.mxu0 %v1913_v62 }
 0xb8f   :  { %v7252_v4 = vsub.f32 %v7242_v54, %v1757_v1  ;;  %v1756_v0 = vmul.f32 0.025, %v1752_v3  ;;  %v7386_v1 = vshrl.u32 %v377_v46, 7 }
 0xb91   :  { %v7255_v5 = vsub.f32 %v7245_v56, %v1756_v0  ;;  %v1761_v2 = vmul.f32 %v7252_v4, %v7252_v4  ;;  %v7389_v3 = vsub.s32 0, %v7386_v1  ;;  %v7395_v0 = vsub.s32 1, %v7386_v1 }
 0xb93   :  { %v1765_v7 = vsel %vm381_vm4, %v1761_v2, 0.0  ;;  %v1760_v9 = vmul.f32 %v7255_v5, %v7255_v5 }
 0xb94   :  { %1766 = vadd.xlane.f32.xlu0 %v1765_v7 }
 0xb95   :  { %v1762_v10 = vsel %vm381_vm4, %v1760_v9, 0.0 }
 0xb96   :  { %1763 = vadd.xlane.f32.xlu1 %v1762_v10 }
 0xc1d   :  { %v1767_v61 = vpop.xlane.xlu0 %1766 }
 0xc1e   :  { %v1769_v37 = vmul.f32 0.025, %v1767_v61 }
 0xc1f   :  { %v1764_v38 = vpop.xlane.xlu1 %1763 }
 0xc20   :  { %v1771_v39 = vadd.f32 1e-05, %v1769_v37  ;;  %v1768_v40 = vmul.f32 0.025, %v1764_v38  ;;  %v5575_v37 = vld [vmem:[%s8348_s5 + $0xc0] sm:$0xff]  ;;  %v5574_v38 = vld [vmem:[%s8348_s5 + $0xb8] sm:$0xff] }
 0xc21   :  { %6242 = vmatprep.subr.mxu1 %v5575_v37 }
 0xc22   :  { %6541 = vrsqrt.f32 %v1771_v39  ;;  %v1770_v41 = vadd.f32 1e-05, %v1768_v40  ;;  %v5573_v39 = vld [vmem:[%s8348_s5 + $0xb0] sm:$0xff]  ;;  %v5572_v40 = vld [vmem:[%s8348_s5 + $0xa8] sm:$0xff] }
 0xc24   :  { %6543 = vrsqrt.f32 %v1770_v41  ;;  %v5571_v41 = vld [vmem:[%s8348_s5 + $0xa0] sm:$0xff] }
 0xc2f   :  { %v6542_v42 = vpop.eup %6541 }
 0xc30   :  { %v1775_v45 = vmul.f32 %v6542_v42, %v7252_v4  ;;  %v1798_v4 = vld [vmem:[%s8351_s8] sm:$0x3]  ;;  %v5584_v42 = vld [vmem:[%s8348_s5 + $0xe8] sm:$0xff] }
 0xc31   :  { %v6544_v43 = vpop.eup %6543  ;;  %v1807_v2 = vrot.slane %v1798_v4, %v7395_v0 }
 0xc32   :  { %v1774_v44 = vmul.f32 %v6544_v43, %v7255_v5  ;;  %v1781_v53 = vmul.f32 %v5560_v48, %v1775_v45  ;;  %v1803_v5 = vrot.slane %v1798_v4, %v7389_v3 }
 0xc34   :  { %v1780_v52 = vmul.f32 %v5560_v48, %v1774_v44  ;;  %v1787_v57 = vadd.f32 %v5561_v49, %v1781_v53  ;;  %v5569_v53 = vld [vmem:[%s8349_s6 + $0x10] ss:$0 sm:$0xff] }
 0xc36   :  { %v1786_v50 = vadd.f32 %v5561_v49, %v1780_v52 }
 0xc38   :  { %5562 = vmatmul.mubr.msk.f32.vlgmr.msra.gmra.mxu1 %vm381_vm4, %v1786_v50 }
 0xc39   :  { %1886 = vmatprep.mubr.f32.mxu1 %v6699_v13  ;;  %6243 = vmatpush3.msra.mxu1 %v5575_v37 }
 0xc3a   :  { %6244 = vmatprep.subr.mxu1 %v5574_v38 }
 0xc3b   :  { %6245 = vmatpush3.msra.mxu1 %v5574_v38 }
 0xc3c   :  { %5563 = vmatmul.mubr.msk.f32.gmra.mxu1 %vm381_vm4, %v1787_v57  ;;  %6246 = vmatprep.subr.mxu1 %v5573_v39 }
 0xc3d   :  { %6247 = vmatpush3.msra.mxu1 %v5573_v39 }
 0xc3e   :  { %6248 = vmatprep.subr.mxu1 %v5572_v40 }
 0xc3f   :  { %6249 = vmatpush3.msra.mxu1 %v5572_v40 }
 0xc40   :  { %6250 = vmatprep.subr.mxu1 %v5571_v41 }
 0xc41   :  { %6251 = vmatpush3.msra.mxu1 %v5571_v41  ;;  %v7575_v41 = vld [vmem:[%s8347_s4 + $0x8] sm:$0xff] }
 0xc42   :  { %6255 = vmatprep.subr.mxu1 %v5584_v42 }
 0xcf8   :  { %v1882_v7 = vpop.f32.mrf.mxu1 }
 0xcf9   :  { %v1883_v9 = vadd.f32 %v1882_v7, %v1803_v5  ;;  %v5583_v7 = vld [vmem:[%s8348_s5 + $0xe0] sm:$0xff] }
 0xcfa   :  { %v1884_v10 = vpop.f32.mrf.mxu1 }
 0xcfb   :  { %v1885_v14 = vadd.f32 %v1884_v10, %v1807_v2  ;;  %v1893_v17 = vmax.f32 %v1883_v9, 0.0  ;;  %v5582_v9 = vld [vmem:[%s8348_s5 + $0xd8] sm:$0xff]  ;;  %v5581_v10 = vld [vmem:[%s8348_s5 + $0xd0] sm:$0xff] }
 0xcfc   :  { %v1888_v46 = vpop.f32.mrf.mxu1 }
 0xcfd   :  { %v1894_v15 = vmax.f32 %v1885_v14, 0.0  ;;  %v1889_v18 = vadd.f32 %v1888_v46, %v1803_v5  ;;  %v5580_v14 = vld [vmem:[%s8348_s5 + $0xc8] sm:$0xff]  ;;  %v5593_v46 = vld [vmem:[%s8348_s5 + $0x110] sm:$0xff] }
 0xcfe   :  { %v1890_v20 = vpop.f32.mrf.mxu1 }
 0xcff   :  { %v1891_v21 = vadd.f32 %v1890_v20, %v1807_v2  ;;  %5564 = vmatprep.mubr.msk.f32.mxu0 %vm1917_vm3, %v1894_v15  ;;  %v1895_v23 = vmax.f32 %v1889_v18, 0.0  ;;  %v5592_v15 = vld [vmem:[%s8348_s5 + $0x108] sm:$0xff]  ;;  %v5590_v18 = vld [vmem:[%s8348_s5 + $0xf8] sm:$0xff]  ;;  %v5589_v20 = vld [vmem:[%s8348_s5 + $0xf0] sm:$0xff] }
 0xd00   :  { %1989 = vmatmul.mubr.f32.vlgmr.msra.gmra.mxu0 %v1893_v17  ;;  %v5591_v17 = vld [vmem:[%s8348_s5 + $0x100] sm:$0xff] }
 0xd01   :  { %v1896_v22 = vmax.f32 %v1891_v21, 0.0 }
 0xd03   :  { %5565 = vmatprep.mubr.msk.f32.mxu0 %vm1917_vm3, %v1896_v22  ;;  %v5577_v22 = vld [vmem:[%s8349_s6 + $0x12] ss:$0 sm:$0xff] }
 0xd04   :  { %1994 = vmatmul.mubr.f32.gmra.mxu0 %v1895_v23 }
 0xdc0   :  { %v1990_v24 = vpop.f32.mrf.mxu0 }
 0xdc1   :  { %v1999_v63 = vadd.f32 %v1990_v24, %v7245_v56 }
 0xdc2   :  { %v1992_v26 = vpop.f32.mrf.mxu0 }
 0xdc3   :  { %v7405_v58 = vadd.f32 %v5566_v25, %v1999_v63  ;;  %v5586_v63 = vld [vmem:[%s8349_s6 + $0x13] ss:$0 sm:$0xff] }
 0xdc4   :  { %v1995_v27 = vpop.f32.mrf.mxu0 }
 0xdc5   :  { %v2000_v28 = vadd.f32 %v1995_v27, %v7242_v54  ;;  %v2011_v29 = vsel %vm381_vm4, %v7405_v58, 0.0 }
 0xdc6   :  { %2012 = vadd.xlane.f32.xlu1 %v2011_v29  ;;  %v1997_v6 = vpop.f32.mrf.mxu0 }
 0xdc7   :  { %v7410_v30 = vadd.f32 %v5566_v25, %v2000_v28 }
 0xdc9   :  { %v2014_v31 = vsel %vm381_vm4, %v7410_v30, 0.0 }
 0xdca   :  { %2015 = vadd.xlane.f32.xlu0 %v2014_v31 }
 0xe4f   :  { %v2013_v32 = vpop.xlane.xlu1 %2012 }
 0xe50   :  { %v2017_v16 = vmul.f32 0.025, %v2013_v32 }
 0xe52   :  { %v2019_v56 = vsub.f32 %v7405_v58, %v2017_v16 }
 0xe53   :  { %v2016_v33 = vpop.xlane.xlu0 %2015 }
 0xe54   :  { %v2018_v19 = vmul.f32 0.025, %v2016_v33  ;;  %v2021_v34 = vmul.f32 %v2019_v56, %v2019_v56  ;;  %v5595_v33 = vld [vmem:[%s8349_s6 + $0x14] ss:$0 sm:$0xff] }
 0xe56   :  { %v2020_v54 = vsub.f32 %v7410_v30, %v2018_v19  ;;  %v2023_v35 = vsel %vm381_vm4, %v2021_v34, 0.0 }
 0xe57   :  { %2024 = vadd.xlane.f32.xlu1 %v2023_v35 }
 0xe58   :  { %v2022_v36 = vmul.f32 %v2020_v54, %v2020_v54 }
 0xe5a   :  { %v2026_v61 = vsel %vm381_vm4, %v2022_v36, 0.0 }
 0xe5b   :  { %2027 = vadd.xlane.f32.xlu0 %v2026_v61 }
 0xee0   :  { %v2025_v43 = vpop.xlane.xlu1 %2024 }
 0xee1   :  { %v2029_v44 = vmul.f32 0.025, %v2025_v43 }
 0xee3   :  { %v2031_v45 = vadd.f32 1e-05, %v2029_v44 }
 0xee4   :  { %v2028_v48 = vpop.xlane.xlu0 %2027 }
 0xee5   :  { %6545 = vrsqrt.f32 %v2031_v45  ;;  %v2030_v52 = vmul.f32 0.025, %v2028_v48  ;;  %v7582_v48 = vld [vmem:[%s8347_s4] sm:$0xff] }
 0xee7   :  { %v2032_v49 = vadd.f32 1e-05, %v2030_v52 }
 0xee9   :  { %6547 = vrsqrt.f32 %v2032_v49 }
 0xef2   :  { %v6546_v50 = vpop.eup %6545 }
 0xef3   :  { %v2035_v57 = vmul.f32 %v6546_v50, %v2019_v56 }
 0xef5   :  { %v2041_v59 = vmul.f32 %v5569_v53, %v2035_v57 }
 0xef6   :  { %v6548_v60 = vpop.eup %6547 }
 0xef7   :  { %v2036_v62 = vmul.f32 %v6548_v60, %v2020_v54  ;;  %v2047_v4 = vadd.f32 %v5570_v55, %v2041_v59 }
 0xef9   :  { %v2042_v5 = vmul.f32 %v5569_v53, %v2036_v62  ;;  %6252 = vmatprep.mubr.msk.f32.mxu1 %vm381_vm4, %v2047_v4 }
 0xefb   :  { %v2048_v2 = vadd.f32 %v5570_v55, %v2042_v5 }
 0xefd   :  { %6253 = vmatmul.mubr.msk.f32.vlgmr.msra.gmra.mxu1 %vm381_vm4, %v2048_v2 }
 0xefe   :  { %6256 = vmatpush3.msra.mxu1 %v5584_v42  ;;  %6265 = vmatprep.mubr.msk.f32.mxu1 %vm381_vm4, %v2047_v4 }
 0xeff   :  { %6257 = vmatprep.subr.mxu1 %v5583_v7 }
 0xf00   :  { %6258 = vmatpush3.msra.mxu1 %v5583_v7 }
 0xf01   :  { %6259 = vmatprep.subr.mxu1 %v5582_v9 }
 0xf02   :  { %6260 = vmatpush3.msra.mxu1 %v5582_v9 }
 0xf03   :  { %6261 = vmatprep.subr.mxu1 %v5581_v10 }
 0xf04   :  { %6262 = vmatpush3.msra.mxu1 %v5581_v10 }
 0xf05   :  { %6263 = vmatprep.subr.mxu1 %v5580_v14 }
 0xf06   :  { %6264 = vmatpush3.msra.mxu1 %v5580_v14 }
 0xf07   :  { %6266 = vmatmul.mubr.msk.f32.vlgmr.msra.gmra.mxu1 %vm381_vm4, %v2048_v2  ;;  %6268 = vmatprep.subr.mxu1 %v5593_v46 }
 0xf08   :  { %6269 = vmatpush3.msra.mxu1 %v5593_v46  ;;  %6278 = vmatprep.mubr.msk.f32.mxu1 %vm381_vm4, %v2047_v4 }
 0xf09   :  { %6270 = vmatprep.subr.mxu1 %v5592_v15 }
 0xf0a   :  { %6271 = vmatpush3.msra.mxu1 %v5592_v15 }
 0xf0b   :  { %6272 = vmatprep.subr.mxu1 %v5591_v17 }
 0xf0c   :  { %6273 = vmatpush3.msra.mxu1 %v5591_v17 }
 0xf0d   :  { %6274 = vmatprep.subr.mxu1 %v5590_v18 }
 0xf0e   :  { %6275 = vmatpush3.msra.mxu1 %v5590_v18 }
 0xf0f   :  { %6276 = vmatprep.subr.mxu1 %v5589_v20 }
 0xf10   :  { %6277 = vmatpush3.msra.mxu1 %v5589_v20 }
 0xf11   :  { %6279 = vmatmul.mubr.msk.f32.vlgmr.msra.gmra.mxu1 %vm381_vm4, %v2048_v2 }
 0xfbd   :  { %v6254_v21 = vpop.f32.mrf.mxu1 }
 0xfbe   :  { %v2138_v56 = vadd.f32 %v6254_v21, %v5577_v22 }
 0xfbf   :  { %v2132_v23 = vpop.f32.mrf.mxu1 }
 0xfc0   :  { %v2133_v24 = vadd.f32 %v5577_v22, %v2132_v23  ;;  %v7517_v34 = vmul.f32 0.35355338, %v2138_v56 }
 0xfc2   :  { %v7478_v25 = vmul.f32 0.35355338, %v2133_v24 }
 0xfc4   :  { %6285 = vmatprep.mubr.msk.f32.mxu1 %vm381_vm4, %v7478_v25  ;;  %6292 = vmatprep.mubr.msk.f32.mxu0 %vm381_vm4, %v7478_v25 }
 0xfc7   :  { %v6267_v26 = vpop.f32.mrf.mxu1 }
 0xfc8   :  { %v7487_v27 = vadd.f32 %v6267_v26, %v5586_v63 }
 0xfc9   :  { %v2218_v28 = vpop.f32.mrf.mxu1 }
 0xfca   :  { %v7489_v29 = vadd.f32 %v5586_v63, %v2218_v28  ;;  %v2316_v6 = vsel %vm687_vm8, %v7487_v27, 0.0  ;;  %v2429_v31 = vsel %vm6996_vm7, %v7487_v27, 0.0  ;;  %v2698_v19 = vsel %vm7061_vm11, %v7487_v27, 0.0 }
 0xfcb   :  { %6281 = vmatprep.subr.msk.mxu1 %vm381_vm4, %v2316_v6  ;;  %6288 = vmatprep.subr.msk.mxu0 %vm381_vm4, %v2429_v31  ;;  %v7568_v38 = vsel %vm7093_vm1, %v7487_v27, 0.0 }
 0xfcc   :  { %6282 = vmatpush3.xpose.msk.msra.mxu1 %vm381_vm4, %v2316_v6  ;;  %6289 = vmatpush3.xpose.msk.msra.mxu0 %vm381_vm4, %v2429_v31  ;;  %v2315_v32 = vsel %vm687_vm8, %v7489_v29, 0.0  ;;  %v2428_v16 = vsel %vm6996_vm7, %v7489_v29, 0.0  ;;  %v2697_v37 = vsel %vm7061_vm11, %v7489_v29, 0.0 }
 0xfcd   :  { %6283 = vmatprep.subr.msk.mxu1 %vm381_vm4, %v2315_v32  ;;  %6290 = vmatprep.subr.msk.mxu0 %vm381_vm4, %v2428_v16 }
 0xfd0   :  { %6284 = vmatpush3.xpose.msk.msra.mxu1 %vm381_vm4, %v2315_v32  ;;  %6291 = vmatpush3.xpose.msk.msra.mxu0 %vm381_vm4, %v2428_v16 }
 0xfd1   :  { %v6280_v54 = vpop.f32.mrf.mxu1  ;;  %6309 = vmatprep.subr.msk.mxu0 %vm381_vm4, %v2698_v19 }
 0xfd2   :  { %v7520_v35 = vadd.f32 %v6280_v54, %v5595_v33 }
 0xfd3   :  { %v2304_v36 = vpop.f32.mrf.mxu1  ;;  %6286 = vmatmul.mubr.msk.f32.vlgmr.msra.gmra.mxu1 %vm381_vm4, %v7517_v34  ;;  %6293 = vmatmul.mubr.msk.f32.vlgmr.msra.gmra.mxu0 %vm381_vm4, %v7517_v34 }
 0xfd4   :  { %v7526_v61 = vadd.f32 %v5595_v33, %v2304_v36  ;;  %6295 = vmatprep.subr.msk.mxu1 %vm6996_vm7, %v7520_v35  ;;  %6310 = vmatpush3.xpose.msk.msra.mxu0 %vm381_vm4, %v2698_v19 }
 0xfd5   :  { %6313 = vmatprep.mubr.msk.f32.mxu0 %vm381_vm4, %v7478_v25  ;;  %6296 = vmatpush3.msk.msra.mxu1 %vm6996_vm7, %v7520_v35 }
 0xfd6   :  { %6311 = vmatprep.subr.msk.mxu0 %vm381_vm4, %v2697_v37  ;;  %6297 = vmatprep.subr.msk.mxu1 %vm6996_vm7, %v7526_v61 }
 0xfd7   :  { %6298 = vmatpush3.msk.msra.mxu1 %vm6996_vm7, %v7526_v61 }
 0xfd8   :  { %6302 = vmatprep.subr.msk.mxu1 %vm687_vm8, %v7520_v35  ;;  %6312 = vmatpush3.xpose.msk.msra.mxu0 %vm381_vm4, %v2697_v37 }
 0xfd9   :  { %6330 = vmatprep.subr.msk.mxu0 %vm7082_vm14, %v7520_v35 }
 0xfdb   :  { %6314 = vmatmul.mubr.msk.f32.vlgmr.msra.gmra.mxu0 %vm381_vm4, %v7517_v34 }
 0xfdc   :  { %6331 = vmatpush3.msk.msra.mxu0 %vm7082_vm14, %v7520_v35 }
 0xfdd   :  { %6332 = vmatprep.subr.msk.mxu0 %vm7082_vm14, %v7526_v61 }
 0xfde   :  { %6333 = vmatpush3.msk.msra.mxu0 %vm7082_vm14, %v7526_v61 }
 0xfdf   :  { %6337 = vmatprep.subr.msk.mxu0 %vm381_vm4, %v7568_v38 }
0x1093   :  { %v6287_v39 = vpop.f32.mrf.mxu1  ;;  %v6294_v40 = vpop.f32.mrf.mxu0 }
0x1094   :  { %v2510_v42 = vadd.f32 %v7575_v41, %v6294_v40  ;;  %v2403_v45 = vadd.f32 %v7575_v41, %v6287_v39 }
0x1095   :  { %v2397_v43 = vpop.f32.mrf.mxu1  ;;  %v2504_v44 = vpop.f32.mrf.mxu0 }
0x1096   :  { %v2505_v52 = vadd.f32 %v7582_v48, %v2504_v44  ;;  %v2516_v49 = vsel %vm780_vm2, %v2510_v42, -inf  ;;  %v2398_v50 = vadd.f32 %v7582_v48, %v2397_v43  ;;  %v2409_v57 = vsel %vm780_vm2, %v2403_v45, -inf }
0x1097   :  { %2517 = vmax.xlane.f32.xlu0 %v2516_v49 }
0x1098   :  { %v2513_v53 = vsel %vm780_vm2, %v2505_v52, -inf  ;;  %v2406_v60 = vsel %vm780_vm2, %v2398_v50, -inf }
0x1099   :  { %2514 = vmax.xlane.f32.xlu1 %v2513_v53 }
0x109b   :  { %2410 = vmax.xlane.f32.xlu0 %v2409_v57  ;;  %v6315_v55 = vpop.f32.mrf.mxu0 }
0x109c   :  { %v2779_v59 = vadd.f32 %v7575_v41, %v6315_v55 }
0x109d   :  { %v2773_v62 = vpop.f32.mrf.mxu0  ;;  %2407 = vmax.xlane.f32.xlu1 %v2406_v60 }
0x109e   :  { %v2774_v4 = vadd.f32 %v7582_v48, %v2773_v62  ;;  %v2785_v5 = vsel %vm780_vm2, %v2779_v59, -inf }
0x109f   :  { %2786 = vmax.xlane.f32.xlu0 %v2785_v5 }
0x10a0   :  { %v2782_v2 = vsel %vm780_vm2, %v2774_v4, -inf }
0x10a1   :  { %2783 = vmax.xlane.f32.xlu1 %v2782_v2 }
0x1120   :  { %v2518_v7 = vpop.xlane.xlu0 %2517 }
0x1121   :  { %v2520_v9 = vsub.f32 %v2510_v42, %v2518_v7 }
0x1122   :  { %v2515_v10 = vpop.xlane.xlu1 %2514 }
0x1123   :  { %v2523_v14 = vmul.f32 1.442695, %v2520_v9  ;;  %v2519_v46 = vsub.f32 %v2505_v52, %v2515_v10 }
0x1124   :  { %v2411_v15 = vpop.xlane.xlu0 %2410 }
0x1125   :  { %6549 = vpow2.f32 %v2523_v14  ;;  %v2521_v17 = vmul.f32 1.442695, %v2519_v46  ;;  %v2413_v18 = vsub.f32 %v2403_v45, %v2411_v15  ;;  %v2888_v46 = vsel %vm7082_vm14, %v7487_v27, 0.0 }
0x1126   :  { %v2408_v20 = vpop.xlane.xlu1 %2407  ;;  %v2887_v15 = vsel %vm7082_vm14, %v7489_v29, 0.0 }
0x1127   :  { %6551 = vpow2.f32 %v2521_v17  ;;  %v2416_v21 = vmul.f32 1.442695, %v2413_v18  ;;  %v2412_v22 = vsub.f32 %v2398_v50, %v2408_v20 }
0x1128   :  { %v2787_v23 = vpop.xlane.xlu0 %2786 }
0x1129   :  { %6553 = vpow2.f32 %v2416_v21  ;;  %v2414_v24 = vmul.f32 1.442695, %v2412_v22  ;;  %v2789_v63 = vsub.f32 %v2779_v59, %v2787_v23 }
0x112a   :  { %v2784_v26 = vpop.xlane.xlu1 %2783 }
0x112b   :  { %6555 = vpow2.f32 %v2414_v24  ;;  %v2792_v28 = vmul.f32 1.442695, %v2789_v63  ;;  %v2788_v6 = vsub.f32 %v2774_v4, %v2784_v26 }
0x112d   :  { %6557 = vpow2.f32 %v2792_v28  ;;  %v2790_v31 = vmul.f32 1.442695, %v2788_v6 }
0x112f   :  { %6559 = vpow2.f32 %v2790_v31 }
0x1132   :  { %v6550_v32 = vpop.eup %6549 }
0x1133   :  { %v2528_v16 = vsel %vm780_vm2, %v6550_v32, 0.0 }
0x1134   :  { %v6552_v56 = vpop.eup %6551  ;;  %2529 = vadd.xlane.f32.xlu0 %v2528_v16 }
0x1135   :  { %v2525_v33 = vsel %vm780_vm2, %v6552_v56, 0.0 }
0x1136   :  { %v6554_v19 = vpop.eup %6553  ;;  %2526 = vadd.xlane.f32.xlu1 %v2525_v33 }
0x1137   :  { %v2421_v54 = vsel %vm780_vm2, %v6554_v19, 0.0 }
0x1138   :  { %v6556_v36 = vpop.eup %6555  ;;  %2422 = vadd.xlane.f32.xlu0 %v2421_v54 }
0x1139   :  { %v2418_v37 = vsel %vm780_vm2, %v6556_v36, 0.0 }
0x113a   :  { %v6558_v39 = vpop.eup %6557  ;;  %2419 = vadd.xlane.f32.xlu1 %v2418_v37 }
0x113b   :  { %v2797_v40 = vsel %vm780_vm2, %v6558_v39, 0.0 }
0x113c   :  { %v6560_v42 = vpop.eup %6559  ;;  %2798 = vadd.xlane.f32.xlu0 %v2797_v40 }
0x113d   :  { %v2794_v43 = vsel %vm780_vm2, %v6560_v42, 0.0 }
0x113e   :  { %2795 = vadd.xlane.f32.xlu1 %v2794_v43 }
0x11bd   :  { %v2530_v44 = vpop.xlane.xlu0 %2529 }
0x11be   :  { %6561 = vrcp.f32 %v2530_v44 }
0x11bf   :  { %v2527_v45 = vpop.xlane.xlu1 %2526 }
0x11c0   :  { %6563 = vrcp.f32 %v2527_v45 }
0x11c1   :  { %v2423_v52 = vpop.xlane.xlu0 %2422 }
0x11c2   :  { %6565 = vrcp.f32 %v2423_v52 }
0x11c3   :  { %v2420_v49 = vpop.xlane.xlu1 %2419 }
0x11c4   :  { %6567 = vrcp.f32 %v2420_v49 }
0x11c5   :  { %v2799_v50 = vpop.xlane.xlu0 %2798 }
0x11c6   :  { %6569 = vrcp.f32 %v2799_v50 }
0x11c7   :  { %v2796_v53 = vpop.xlane.xlu1 %2795 }
0x11c8   :  { %6571 = vrcp.f32 %v2796_v53  ;;  %v3077_v53 = vsel %vm7093_vm1, %v7489_v29, 0.0 }
0x11cb   :  { %v6562_v57 = vpop.eup %6561 }
0x11cc   :  { %v2534_v60 = vmul.f32 %v6562_v57, %v6550_v32 }
0x11cd   :  { %v6564_v55 = vpop.eup %6563 }
0x11ce   :  { %v2533_v59 = vmul.f32 %v6564_v55, %v6552_v56 }
0x11cf   :  { %v6566_v62 = vpop.eup %6565 }
0x11d0   :  { %6299 = vmatprep.mubr.msk.f32.mxu1 %vm780_vm2, %v2533_v59  ;;  %v2427_v2 = vmul.f32 %v6566_v62, %v6554_v19 }
0x11d1   :  { %v6568_v4 = vpop.eup %6567  ;;  %6300 = vmatmul.mubr.msk.f32.vlgmr.msra.gmra.mxu1 %vm780_vm2, %v2534_v60 }
0x11d2   :  { %6303 = vmatpush3.msk.msra.mxu1 %vm687_vm8, %v7520_v35  ;;  %v2426_v5 = vmul.f32 %v6568_v4, %v6556_v36 }
0x11d3   :  { %6304 = vmatprep.subr.msk.mxu1 %vm687_vm8, %v7526_v61  ;;  %v6570_v7 = vpop.eup %6569 }
0x11d4   :  { %6305 = vmatpush3.msk.msra.mxu1 %vm687_vm8, %v7526_v61  ;;  %6306 = vmatprep.mubr.msk.f32.mxu1 %vm780_vm2, %v2426_v5  ;;  %v2803_v14 = vmul.f32 %v6570_v7, %v6558_v39 }
0x11d5   :  { %v6572_v9 = vpop.eup %6571  ;;  %6316 = vmatprep.subr.msk.mxu1 %vm7061_vm11, %v7520_v35  ;;  %6307 = vmatmul.mubr.msk.f32.vlgmr.msra.gmra.mxu1 %vm780_vm2, %v2427_v2 }
0x11d6   :  { %6317 = vmatpush3.msk.msra.mxu1 %vm7061_vm11, %v7520_v35  ;;  %v2802_v10 = vmul.f32 %v6572_v9, %v6560_v42 }
0x11d7   :  { %6318 = vmatprep.subr.msk.mxu1 %vm7061_vm11, %v7526_v61 }
0x11d8   :  { %6319 = vmatpush3.msk.msra.mxu1 %vm7061_vm11, %v7526_v61  ;;  %6320 = vmatprep.mubr.msk.f32.mxu1 %vm780_vm2, %v2802_v10 }
0x11d9   :  { %6323 = vmatprep.subr.msk.mxu1 %vm381_vm4, %v2888_v46  ;;  %6321 = vmatmul.mubr.msk.f32.vlgmr.msra.gmra.mxu1 %vm780_vm2, %v2803_v14 }
0x11da   :  { %6324 = vmatpush3.xpose.msk.msra.mxu1 %vm381_vm4, %v2888_v46  ;;  %6327 = vmatprep.mubr.msk.f32.mxu1 %vm381_vm4, %v7478_v25 }
0x11db   :  { %6325 = vmatprep.subr.msk.mxu1 %vm381_vm4, %v2887_v15 }
0x11de   :  { %6326 = vmatpush3.xpose.msk.msra.mxu1 %vm381_vm4, %v2887_v15 }
0x11df   :  { %6344 = vmatprep.subr.msk.mxu1 %vm7093_vm1, %v7520_v35 }
0x11e1   :  { %6328 = vmatmul.mubr.msk.f32.vlgmr.msra.gmra.mxu1 %vm381_vm4, %v7517_v34 }
0x11e2   :  { %6345 = vmatpush3.msk.msra.mxu1 %vm7093_vm1, %v7520_v35 }
0x11e3   :  { %6346 = vmatprep.subr.msk.mxu1 %vm7093_vm1, %v7526_v61 }
0x11e4   :  { %6347 = vmatpush3.msk.msra.mxu1 %vm7093_vm1, %v7526_v61 }
0x1291   :  { %v6301_v27 = vpop.f32.mrf.mxu1 }
0x1293   :  { %v2607_v17 = vpop.f32.mrf.mxu1 }
0x1295   :  { %v6308_v18 = vpop.f32.mrf.mxu1 }
0x1296   :  { %v2694_v20 = vadd.f32 %v6308_v18, %v6301_v27  ;;  %v5642_v18 = vld [vmem:[%s8348_s5 + $0x138] sm:$0xff] }
0x1297   :  { %v2688_v21 = vpop.f32.mrf.mxu1  ;;  %6351 = vmatprep.subr.mxu1 %v5642_v18 }
0x1298   :  { %v2689_v22 = vadd.f32 %v2688_v21, %v2607_v17 }
0x1299   :  { %v6322_v23 = vpop.f32.mrf.mxu1 }
0x129a   :  { %v2886_v24 = vadd.f32 %v6322_v23, %v2694_v20 }
0x129b   :  { %v2876_v63 = vpop.f32.mrf.mxu1 }
0x129c   :  { %v2885_v26 = vadd.f32 %v2876_v63, %v2689_v22 }
0x12a1   :  { %v6329_v28 = vpop.f32.mrf.mxu1 }
0x12a2   :  { %v2969_v35 = vadd.f32 %v7575_v41, %v6329_v28  ;;  %v5640_v28 = vld [vmem:[%s8348_s5 + $0x128] sm:$0xff] }
0x12a3   :  { %v2963_v6 = vpop.f32.mrf.mxu1 }
0x12a4   :  { %v2964_v31 = vadd.f32 %v7582_v48, %v2963_v6  ;;  %v2975_v32 = vsel %vm780_vm2, %v2969_v35, -inf  ;;  %v5638_v6 = vld [vmem:[%s8348_s5 + $0x118] sm:$0xff] }
0x12a5   :  { %2976 = vmax.xlane.f32.xlu0 %v2975_v32 }
0x12a6   :  { %v2972_v61 = vsel %vm780_vm2, %v2964_v31, -inf }
0x12a7   :  { %2973 = vmax.xlane.f32.xlu1 %v2972_v61 }
0x132e   :  { %v2977_v16 = vpop.xlane.xlu0 %2976 }
0x132f   :  { %v2979_v56 = vsub.f32 %v2969_v35, %v2977_v16  ;;  %v5639_v35 = vld [vmem:[%s8348_s5 + $0x120] sm:$0xff] }
0x1330   :  { %v2974_v33 = vpop.xlane.xlu1 %2973 }
0x1331   :  { %v2982_v19 = vmul.f32 1.442695, %v2979_v56  ;;  %v2978_v54 = vsub.f32 %v2964_v31, %v2974_v33  ;;  %v5644_v56 = vld [vmem:[%s8349_s6 + $0x15] ss:$0 sm:$0xff] }
0x1333   :  { %6573 = vpow2.f32 %v2982_v19  ;;  %v2980_v36 = vmul.f32 1.442695, %v2978_v54 }
0x1335   :  { %6575 = vpow2.f32 %v2980_v36 }
0x1340   :  { %v6574_v37 = vpop.eup %6573 }
0x1341   :  { %v2987_v39 = vsel %vm780_vm2, %v6574_v37, 0.0 }
0x1342   :  { %v6576_v40 = vpop.eup %6575  ;;  %2988 = vadd.xlane.f32.xlu0 %v2987_v39 }
0x1343   :  { %v2984_v42 = vsel %vm780_vm2, %v6576_v40, 0.0 }
0x1344   :  { %2985 = vadd.xlane.f32.xlu1 %v2984_v42 }
0x13cb   :  { %v2989_v43 = vpop.xlane.xlu0 %2988 }
0x13cc   :  { %6577 = vrcp.f32 %v2989_v43 }
0x13cd   :  { %v2986_v44 = vpop.xlane.xlu1 %2985 }
0x13ce   :  { %6579 = vrcp.f32 %v2986_v44 }
0x13d9   :  { %v6578_v45 = vpop.eup %6577 }
0x13da   :  { %v2993_v50 = vmul.f32 %v6578_v45, %v6574_v37 }
0x13db   :  { %v6580_v52 = vpop.eup %6579 }
0x13dc   :  { %v2992_v49 = vmul.f32 %v6580_v52, %v6576_v40 }
0x13de   :  { %6334 = vmatprep.mubr.msk.f32.mxu0 %vm780_vm2, %v2992_v49 }
0x13df   :  { %6335 = vmatmul.mubr.msk.f32.vlgmr.msra.gmra.mxu0 %vm780_vm2, %v2993_v50 }
0x13e0   :  { %6338 = vmatpush3.xpose.msk.msra.mxu0 %vm381_vm4, %v7568_v38  ;;  %6341 = vmatprep.mubr.msk.f32.mxu0 %vm381_vm4, %v7478_v25 }
0x13e1   :  { %6339 = vmatprep.subr.msk.mxu0 %vm381_vm4, %v3077_v53 }
0x13e4   :  { %6340 = vmatpush3.xpose.msk.msra.mxu0 %vm381_vm4, %v3077_v53 }
0x13e7   :  { %6342 = vmatmul.mubr.msk.f32.vlgmr.msra.gmra.mxu0 %vm381_vm4, %v7517_v34 }
0x13e8   :  { %3495 = vmatprep.mubr.f32.mxu0 %v6699_v13 }
0x149f   :  { %v6336_v57 = vpop.f32.mrf.mxu0 }
0x14a0   :  { %v3076_v55 = vadd.f32 %v6336_v57, %v2886_v24 }
0x14a1   :  { %v3066_v59 = vpop.f32.mrf.mxu0 }
0x14a2   :  { %v3075_v38 = vadd.f32 %v3066_v59, %v2885_v26  ;;  %v5641_v26 = vld [vmem:[%s8348_s5 + $0x130] sm:$0xff] }
0x14a3   :  { %v5659_v59 = vld [vmem:[%s8350_s7 + $0x90] sm:$0xff] }
0x14a7   :  { %v6343_v60 = vpop.f32.mrf.mxu0 }
0x14a8   :  { %v3159_v62 = vadd.f32 %v7575_v41, %v6343_v60  ;;  %v5657_v60 = vld [vmem:[%s8350_s7 + $0x80] sm:$0xff] }
0x14a9   :  { %v3153_v29 = vpop.f32.mrf.mxu0 }
0x14aa   :  { %v3154_v4 = vadd.f32 %v7582_v48, %v3153_v29  ;;  %v3165_v25 = vsel %vm780_vm2, %v3159_v62, -inf  ;;  %v5655_v29 = vld [vmem:[%s8350_s7 + $0x70] sm:$0xff] }
0x14ab   :  { %3166 = vmax.xlane.f32.xlu0 %v3165_v25  ;;  %v5653_v25 = vld [vmem:[%s8350_s7 + $0x60] sm:$0xff] }
0x14ac   :  { %v3162_v5 = vsel %vm780_vm2, %v3154_v4, -inf }
0x14ad   :  { %3163 = vmax.xlane.f32.xlu1 %v3162_v5  ;;  %v5652_v5 = vld [vmem:[%s8350_s7 + $0x58] sm:$0xff] }
0x1534   :  { %v3167_v2 = vpop.xlane.xlu0 %3166 }
0x1535   :  { %v3169_v34 = vsub.f32 %v3159_v62, %v3167_v2  ;;  %v5656_v62 = vld [vmem:[%s8350_s7 + $0x78] sm:$0xff]  ;;  %v5651_v2 = vld [vmem:[%s8350_s7 + $0x50] sm:$0xff] }
0x1536   :  { %v3164_v7 = vpop.xlane.xlu1 %3163 }
0x1537   :  { %v3172_v9 = vmul.f32 1.442695, %v3169_v34  ;;  %v3168_v10 = vsub.f32 %v3154_v4, %v3164_v7  ;;  %v5654_v4 = vld [vmem:[%s8350_s7 + $0x68] sm:$0xff]  ;;  %v5679_v34 = vld [vmem:[%s8352_s9 + $0x118] sm:$0xff]  ;;  %v5678_v7 = vld [vmem:[%s8352_s9 + $0x110] sm:$0xff] }
0x1539   :  { %6581 = vpow2.f32 %v3172_v9  ;;  %v3170_v14 = vmul.f32 1.442695, %v3168_v10  ;;  %v5677_v9 = vld [vmem:[%s8352_s9 + $0x108] sm:$0xff]  ;;  %v5676_v10 = vld [vmem:[%s8352_s9 + $0x100] sm:$0xff] }
0x153b   :  { %6583 = vpow2.f32 %v3170_v14  ;;  %v5675_v14 = vld [vmem:[%s8352_s9 + $0xf8] sm:$0xff] }
0x1546   :  { %v6582_v46 = vpop.eup %6581 }
0x1547   :  { %v3177_v15 = vsel %vm780_vm2, %v6582_v46, 0.0 }
0x1548   :  { %v6584_v27 = vpop.eup %6583  ;;  %3178 = vadd.xlane.f32.xlu0 %v3177_v15  ;;  %v5673_v15 = vld [vmem:[%s8352_s9 + $0xe8] sm:$0xff] }
0x1549   :  { %v3174_v17 = vsel %vm780_vm2, %v6584_v27, 0.0 }
0x154a   :  { %3175 = vadd.xlane.f32.xlu1 %v3174_v17  ;;  %v5671_v17 = vld [vmem:[%s8352_s9 + $0xd8] sm:$0xff] }
0x15d1   :  { %v3179_v20 = vpop.xlane.xlu0 %3178 }
0x15d2   :  { %6585 = vrcp.f32 %v3179_v20  ;;  %v5669_v20 = vld [vmem:[%s8352_s9 + $0xc8] sm:$0xff] }
0x15d3   :  { %v3176_v21 = vpop.xlane.xlu1 %3175 }
0x15d4   :  { %6587 = vrcp.f32 %v3176_v21  ;;  %v5668_v21 = vld [vmem:[%s8352_s9 + $0xc0] sm:$0xff] }
0x15df   :  { %v6586_v22 = vpop.eup %6585 }
0x15e0   :  { %v3183_v63 = vmul.f32 %v6586_v22, %v6582_v46  ;;  %v5674_v46 = vld [vmem:[%s8352_s9 + $0xf0] sm:$0xff]  ;;  %v5667_v22 = vld [vmem:[%s8352_s9 + $0xb8] sm:$0xff] }
0x15e1   :  { %v6588_v23 = vpop.eup %6587 }
0x15e2   :  { %v3182_v24 = vmul.f32 %v6588_v23, %v6584_v27  ;;  %v5672_v27 = vld [vmem:[%s8352_s9 + $0xe0] sm:$0xff]  ;;  %v5666_v23 = vld [vmem:[%s8352_s9 + $0xb0] sm:$0xff] }
0x15e4   :  { %6348 = vmatprep.mubr.msk.f32.mxu1 %vm780_vm2, %v3182_v24  ;;  %v5665_v24 = vld [vmem:[%s8352_s9 + $0xa8] sm:$0xff] }
0x15e5   :  { %6349 = vmatmul.mubr.msk.f32.vlgmr.msra.gmra.mxu1 %vm780_vm2, %v3183_v63  ;;  %v5664_v63 = vld [vmem:[%s8352_s9 + $0xa0] sm:$0xff] }
0x15e6   :  { %6352 = vmatpush3.msra.mxu1 %v5642_v18  ;;  %v5670_v18 = vld [vmem:[%s8352_s9 + $0xd0] sm:$0xff] }
0x15e7   :  { %6353 = vmatprep.subr.mxu1 %v5641_v26 }
0x15e8   :  { %6354 = vmatpush3.msra.mxu1 %v5641_v26 }
0x15e9   :  { %6355 = vmatprep.subr.mxu1 %v5640_v28 }
0x15ea   :  { %6356 = vmatpush3.msra.mxu1 %v5640_v28 }
0x15eb   :  { %6357 = vmatprep.subr.mxu1 %v5639_v35 }
0x15ec   :  { %6358 = vmatpush3.msra.mxu1 %v5639_v35 }
0x15ed   :  { %6359 = vmatprep.subr.mxu1 %v5638_v6 }
0x15ee   :  { %6360 = vmatpush3.msra.mxu1 %v5638_v6 }
0x15ef   :  { %3539 = vmatprep.subr.mxu1 %v6699_v13 }
0x16a5   :  { %v6350_v31 = vpop.f32.mrf.mxu1 }
0x16a6   :  { %v3266_v16 = vadd.f32 %v6350_v31, %v3076_v55  ;;  %v5660_v55 = vld [vmem:[%s8350_s7 + $0x98] sm:$0xff] }
0x16a7   :  { %v3256_v32 = vpop.f32.mrf.mxu1  ;;  %3453 = vmatprep.subr.mxu0 %v5660_v55 }
0x16a8   :  { %v3265_v61 = vadd.f32 %v3256_v32, %v3075_v38  ;;  %3454 = vmatpush1.msra.mxu0 %v5659_v59  ;;  %v5658_v38 = vld [vmem:[%s8350_s7 + $0x88] sm:$0xff] }
0x16a9   :  { %3455 = vmatprep.subr.mxu0 %v5658_v38 }
0x16aa   :  { %6361 = vmatprep.mubr.msk.f32.mxu1 %vm381_vm4, %v3265_v61  ;;  %3456 = vmatpush1.msra.mxu0 %v5657_v60 }
0x16ab   :  { %6362 = vmatmul.mubr.msk.f32.vlgmr.msra.gmra.mxu1 %vm381_vm4, %v3266_v16  ;;  %3457 = vmatprep.subr.mxu0 %v5656_v62 }
0x16ac   :  { %3458 = vmatpush1.msra.mxu0 %v5655_v29  ;;  %3540 = vmatpush1.msra.mxu1 %v5679_v34 }
0x16ad   :  { %3459 = vmatprep.subr.mxu0 %v5654_v4  ;;  %3541 = vmatprep.subr.mxu1 %v6699_v13 }
0x16ae   :  { %3460 = vmatpush1.msra.mxu0 %v5653_v25  ;;  %3542 = vmatpush1.msra.mxu1 %v5678_v7  ;;  %v5687_v7 = vld [vmem:[%s8349_s6 + $0x18] ss:$0 sm:$0xff] }
0x16af   :  { %3461 = vmatprep.subr.mxu0 %v5652_v5  ;;  %3543 = vmatprep.subr.mxu1 %v6699_v13 }
0x16b0   :  { %3462 = vmatpush1.msra.mxu0 %v5651_v2  ;;  %3544 = vmatpush1.msra.mxu1 %v5677_v9 }
0x16b1   :  { %3545 = vmatprep.subr.mxu1 %v6699_v13 }
0x16b2   :  { %3546 = vmatpush1.msra.mxu1 %v5676_v10 }
0x16b3   :  { %3547 = vmatprep.subr.mxu1 %v6699_v13 }
0x16b4   :  { %3548 = vmatpush1.msra.mxu1 %v5675_v14 }
0x16b5   :  { %3549 = vmatprep.subr.mxu1 %v6699_v13 }
0x16b6   :  { %3550 = vmatpush1.msra.mxu1 %v5674_v46 }
0x16b7   :  { %3551 = vmatprep.subr.mxu1 %v6699_v13 }
0x16b8   :  { %3552 = vmatpush1.msra.mxu1 %v5673_v15 }
0x16b9   :  { %3553 = vmatprep.subr.mxu1 %v6699_v13 }
0x16ba   :  { %3554 = vmatpush1.msra.mxu1 %v5672_v27 }
0x16bb   :  { %3555 = vmatprep.subr.mxu1 %v6699_v13 }
0x16bc   :  { %3556 = vmatpush1.msra.mxu1 %v5671_v17 }
0x16bd   :  { %3557 = vmatprep.subr.mxu1 %v6699_v13 }
0x16be   :  { %3558 = vmatpush1.msra.mxu1 %v5670_v18 }
0x16bf   :  { %3559 = vmatprep.subr.mxu1 %v6699_v13 }
0x16c0   :  { %3560 = vmatpush1.msra.mxu1 %v5669_v20 }
0x16c1   :  { %3561 = vmatprep.subr.mxu1 %v6699_v13 }
0x16c2   :  { %3562 = vmatpush1.msra.mxu1 %v5668_v21 }
0x16c3   :  { %3563 = vmatprep.subr.mxu1 %v6699_v13 }
0x16c4   :  { %3564 = vmatpush1.msra.mxu1 %v5667_v22 }
0x16c5   :  { %3565 = vmatprep.subr.mxu1 %v6699_v13 }
0x16c6   :  { %3566 = vmatpush1.msra.mxu1 %v5666_v23 }
0x16c7   :  { %3567 = vmatprep.subr.mxu1 %v6699_v13 }
0x16c8   :  { %3568 = vmatpush1.msra.mxu1 %v5665_v24 }
0x16c9   :  { %3569 = vmatprep.subr.mxu1 %v6699_v13 }
0x16ca   :  { %3570 = vmatpush1.msra.mxu1 %v5664_v63 }
0x16cb   :  { %3595 = vmatprep.subr.mxu1 %v6699_v13 }
0x176b   :  { %v6363_v33 = vpop.f32.mrf.mxu1 }
0x176c   :  { %v3356_v19 = vadd.f32 %v6363_v33, %v5644_v56 }
0x176d   :  { %v3350_v54 = vpop.f32.mrf.mxu1 }
0x176e   :  { %v7703_v36 = vadd.f32 %v3356_v19, %v7410_v30  ;;  %v3351_v37 = vadd.f32 %v5644_v56, %v3350_v54  ;;  %v5649_v19 = vld [vmem:[%s8349_s6 + $0x16] ss:$0 sm:$0xff] }
0x1770   :  { %v7706_v39 = vadd.f32 %v3351_v37, %v7405_v58  ;;  %v3366_v40 = vsel %vm381_vm4, %v7703_v36, 0.0  ;;  %v5650_v37 = vld [vmem:[%s8349_s6 + $0x17] ss:$0 sm:$0xff] }
0x1771   :  { %3367 = vadd.xlane.f32.xlu0 %v3366_v40 }
0x1772   :  { %v3363_v42 = vsel %vm381_vm4, %v7706_v39, 0.0 }
0x1773   :  { %3364 = vadd.xlane.f32.xlu1 %v3363_v42 }
0x17fa   :  { %v3368_v43 = vpop.xlane.xlu0 %3367 }
0x17fb   :  { %v3370_v44 = vmul.f32 0.025, %v3368_v43 }
0x17fc   :  { %v3365_v45 = vpop.xlane.xlu1 %3364 }
0x17fd   :  { %v7713_v52 = vsub.f32 %v7703_v36, %v3370_v44  ;;  %v3369_v30 = vmul.f32 0.025, %v3365_v45  ;;  %v5683_v44 = vld [vmem:[%s8352_s9 + $0x138] sm:$0xff]  ;;  %v5682_v45 = vld [vmem:[%s8352_s9 + $0x130] sm:$0xff] }
0x17fe   :  { %3596 = vmatpush2.msra.mxu1 %v5683_v44  ;;  %v5690_v44 = vld [vmem:[%s8349_s6 + $0x20] ss:$0 sm:$0xff] }
0x17ff   :  { %v7716_v49 = vsub.f32 %v7706_v39, %v3369_v30  ;;  %v3374_v58 = vmul.f32 %v7713_v52, %v7713_v52  ;;  %3597 = vmatprep.subr.mxu1 %v6699_v13  ;;  %v5680_v30 = vld [vmem:[%s8352_s9 + $0x120] sm:$0xff] }
0x1800   :  { %3598 = vmatpush2.msra.mxu1 %v5682_v45 }
0x1801   :  { %v3378_v50 = vsel %vm381_vm4, %v3374_v58, 0.0  ;;  %v3373_v53 = vmul.f32 %v7716_v49, %v7716_v49  ;;  %3599 = vmatprep.subr.mxu1 %v6699_v13 }
0x1802   :  { %3379 = vadd.xlane.f32.xlu0 %v3378_v50 }
0x1803   :  { %v3375_v57 = vsel %vm381_vm4, %v3373_v53, 0.0 }
0x1804   :  { %3376 = vadd.xlane.f32.xlu1 %v3375_v57 }
0x188b   :  { %v3380_v26 = vpop.xlane.xlu0 %3379 }
0x188c   :  { %v3382_v28 = vmul.f32 0.025, %v3380_v26 }
0x188d   :  { %v3377_v35 = vpop.xlane.xlu1 %3376 }
0x188e   :  { %v3384_v6 = vadd.f32 1e-05, %v3382_v28  ;;  %v3381_v31 = vmul.f32 0.025, %v3377_v35 }
0x1890   :  { %6589 = vrsqrt.f32 %v3384_v6  ;;  %v3383_v32 = vadd.f32 1e-05, %v3381_v31  ;;  %v5696_v6 = vld [vmem:[%s8348_s5 + $0x160] sm:$0xff]  ;;  %v5695_v31 = vld [vmem:[%s8348_s5 + $0x158] sm:$0xff] }
0x1891   :  { %6364 = vmatprep.subr.mxu0 %v5696_v6 }
0x1892   :  { %6591 = vrsqrt.f32 %v3383_v32  ;;  %v5694_v32 = vld [vmem:[%s8348_s5 + $0x150] sm:$0xff] }
0x189d   :  { %v6590_v61 = vpop.eup %6589 }
0x189e   :  { %v3388_v33 = vmul.f32 %v6590_v61, %v7713_v52  ;;  %v5681_v52 = vld [vmem:[%s8352_s9 + $0x128] sm:$0xff] }
0x189f   :  { %v6592_v16 = vpop.eup %6591  ;;  %3600 = vmatpush2.msra.mxu1 %v5681_v52  ;;  %v5693_v61 = vld [vmem:[%s8348_s5 + $0x148] sm:$0xff]  ;;  %v5691_v52 = vld [vmem:[%s8349_s6 + $0x21] ss:$0 sm:$0xff] }
0x18a0   :  { %v3387_v56 = vmul.f32 %v6592_v16, %v7716_v49  ;;  %v3394_v42 = vmul.f32 %v5649_v19, %v3388_v33  ;;  %3601 = vmatprep.subr.mxu1 %v6699_v13  ;;  %v5661_v49 = vld [vmem:[%s8351_s8 + $0x2] sm:$0x3] }
0x18a1   :  { %3602 = vmatpush2.msra.mxu1 %v5680_v30  ;;  %v3418_v58 = vrot.slane %v5661_v49, %v7389_v3  ;;  %v3422_v50 = vrot.slane %v5661_v49, %v7395_v0  ;;  %v5692_v16 = vld [vmem:[%s8348_s5 + $0x140] sm:$0xff] }
0x18a2   :  { %v3393_v54 = vmul.f32 %v5649_v19, %v3387_v56  ;;  %v3400_v43 = vadd.f32 %v5650_v37, %v3394_v42  ;;  %v5705_v56 = vld [vmem:[%s8348_s5 + $0x188] sm:$0xff] }
0x18a4   :  { %v3399_v40 = vadd.f32 %v5650_v37, %v3393_v54 }
0x18a6   :  { %5662 = vmatmul.mubr.msk.f32.vlgmr.msra.gmra.mxu0 %vm381_vm4, %v3399_v40 }
0x18a7   :  { %3501 = vmatprep.mubr.f32.mxu0 %v6699_v13  ;;  %6365 = vmatpush3.msra.mxu0 %v5696_v6 }
0x18a8   :  { %6366 = vmatprep.subr.mxu0 %v5695_v31 }
0x18a9   :  { %6367 = vmatpush3.msra.mxu0 %v5695_v31 }
0x18aa   :  { %5663 = vmatmul.mubr.msk.f32.gmra.mxu0 %vm381_vm4, %v3400_v43  ;;  %6368 = vmatprep.subr.mxu0 %v5694_v32 }
0x18ab   :  { %6369 = vmatpush3.msra.mxu0 %v5694_v32 }
0x18ac   :  { %6370 = vmatprep.subr.mxu0 %v5693_v61 }
0x18ad   :  { %6371 = vmatpush3.msra.mxu0 %v5693_v61 }
0x18ae   :  { %6372 = vmatprep.subr.mxu0 %v5692_v16 }
0x18af   :  { %6373 = vmatpush3.msra.mxu0 %v5692_v16 }
0x18b0   :  { %6377 = vmatprep.subr.mxu0 %v5705_v56 }
0x1966   :  { %v3497_v53 = vpop.f32.mrf.mxu0 }
0x1967   :  { %v3498_v57 = vadd.f32 %v3497_v53, %v3418_v58 }
0x1968   :  { %v3499_v55 = vpop.f32.mrf.mxu0 }
0x1969   :  { %v3500_v59 = vadd.f32 %v3499_v55, %v3422_v50  ;;  %v3508_v62 = vmax.f32 %v3498_v57, 0.0  ;;  %v5704_v55 = vld [vmem:[%s8348_s5 + $0x180] sm:$0xff] }
0x196a   :  { %v3503_v38 = vpop.f32.mrf.mxu0 }
0x196b   :  { %v3509_v60 = vmax.f32 %v3500_v59, 0.0  ;;  %v3504_v29 = vadd.f32 %v3503_v38, %v3418_v58  ;;  %v5703_v59 = vld [vmem:[%s8348_s5 + $0x178] sm:$0xff]  ;;  %v5702_v38 = vld [vmem:[%s8348_s5 + $0x170] sm:$0xff] }
0x196c   :  { %v3505_v4 = vpop.f32.mrf.mxu0 }
0x196d   :  { %v3506_v25 = vadd.f32 %v3505_v4, %v3422_v50  ;;  %5684 = vmatprep.mubr.msk.f32.mxu1 %vm1917_vm3, %v3509_v60  ;;  %v3510_v2 = vmax.f32 %v3504_v29, 0.0  ;;  %v5701_v60 = vld [vmem:[%s8348_s5 + $0x168] sm:$0xff]  ;;  %v5712_v4 = vld [vmem:[%s8348_s5 + $0x1a0] sm:$0xff] }
0x196e   :  { %3604 = vmatmul.mubr.f32.vlgmr.msra.gmra.mxu1 %v3508_v62  ;;  %v5714_v62 = vld [vmem:[%s8348_s5 + $0x1b0] sm:$0xff]  ;;  %v5713_v29 = vld [vmem:[%s8348_s5 + $0x1a8] sm:$0xff] }
0x196f   :  { %v3511_v5 = vmax.f32 %v3506_v25, 0.0  ;;  %v5711_v25 = vld [vmem:[%s8348_s5 + $0x198] sm:$0xff] }
0x1971   :  { %5685 = vmatprep.mubr.msk.f32.mxu1 %vm1917_vm3, %v3511_v5  ;;  %v5710_v5 = vld [vmem:[%s8348_s5 + $0x190] sm:$0xff] }
0x1972   :  { %3609 = vmatmul.mubr.f32.gmra.mxu1 %v3510_v2 }
0x1a2e   :  { %v3605_v34 = vpop.f32.mrf.mxu1 }
0x1a2f   :  { %v3614_v9 = vadd.f32 %v3605_v34, %v7706_v39  ;;  %v5698_v34 = vld [vmem:[%s8349_s6 + $0x22] ss:$0 sm:$0xff] }
0x1a30   :  { %v3607_v10 = vpop.f32.mrf.mxu1 }
0x1a31   :  { %v7855_v14 = vadd.f32 %v5687_v7, %v3614_v9 }
0x1a32   :  { %v3610_v46 = vpop.f32.mrf.mxu1 }
0x1a33   :  { %v3615_v15 = vadd.f32 %v3610_v46, %v7703_v36  ;;  %v3626_v27 = vsel %vm381_vm4, %v7855_v14, 0.0  ;;  %v5707_v46 = vld [vmem:[%s8349_s6 + $0x23] ss:$0 sm:$0xff] }
0x1a34   :  { %3627 = vadd.xlane.f32.xlu1 %v3626_v27  ;;  %v3612_v17 = vpop.f32.mrf.mxu1 }
0x1a35   :  { %v7860_v18 = vadd.f32 %v5687_v7, %v3615_v15 }
0x1a37   :  { %v3629_v20 = vsel %vm381_vm4, %v7860_v18, 0.0 }
0x1a38   :  { %3630 = vadd.xlane.f32.xlu0 %v3629_v20 }
0x1abd   :  { %v3628_v21 = vpop.xlane.xlu1 %3627 }
0x1abe   :  { %v3632_v22 = vmul.f32 0.025, %v3628_v21 }
0x1ac0   :  { %v3634_v39 = vsub.f32 %v7855_v14, %v3632_v22 }
0x1ac1   :  { %v3631_v23 = vpop.xlane.xlu0 %3630 }
0x1ac2   :  { %v3633_v24 = vmul.f32 0.025, %v3631_v23  ;;  %v3636_v63 = vmul.f32 %v3634_v39, %v3634_v39 }
0x1ac4   :  { %v3635_v36 = vsub.f32 %v7860_v18, %v3633_v24  ;;  %v3638_v26 = vsel %vm381_vm4, %v3636_v63, 0.0  ;;  %v5716_v63 = vld [vmem:[%s8349_s6 + $0x24] ss:$0 sm:$0xff] }
0x1ac5   :  { %3639 = vadd.xlane.f32.xlu1 %v3638_v26 }
0x1ac6   :  { %v3637_v28 = vmul.f32 %v3635_v36, %v3635_v36 }
0x1ac8   :  { %v3641_v35 = vsel %vm381_vm4, %v3637_v28, 0.0 }
0x1ac9   :  { %3642 = vadd.xlane.f32.xlu0 %v3641_v35 }
0x1b4e   :  { %v3640_v33 = vpop.xlane.xlu1 %3639 }
0x1b4f   :  { %v3644_v19 = vmul.f32 0.025, %v3640_v33 }
0x1b51   :  { %v3646_v54 = vadd.f32 1e-05, %v3644_v19 }
0x1b52   :  { %v3643_v37 = vpop.xlane.xlu0 %3642 }
0x1b53   :  { %6593 = vrsqrt.f32 %v3646_v54  ;;  %v3645_v40 = vmul.f32 0.025, %v3643_v37  ;;  %v8026_v54 = vld [vmem:[%s8347_s4 + $0x8] sm:$0xff] }
0x1b55   :  { %v3647_v42 = vadd.f32 1e-05, %v3645_v40 }
0x1b57   :  { %6595 = vrsqrt.f32 %v3647_v42 }
0x1b60   :  { %v6594_v43 = vpop.eup %6593 }
0x1b61   :  { %v3650_v45 = vmul.f32 %v6594_v43, %v3634_v39  ;;  %v8034_v43 = vld [vmem:[%s8347_s4] sm:$0xff] }
0x1b63   :  { %v3656_v30 = vmul.f32 %v5690_v44, %v3650_v45 }
0x1b64   :  { %v6596_v49 = vpop.eup %6595 }
0x1b65   :  { %v3651_v58 = vmul.f32 %v6596_v49, %v3635_v36  ;;  %v3662_v50 = vadd.f32 %v5691_v52, %v3656_v30 }
0x1b67   :  { %v3657_v53 = vmul.f32 %v5690_v44, %v3651_v58  ;;  %6374 = vmatprep.mubr.msk.f32.mxu0 %vm381_vm4, %v3662_v50 }
0x1b69   :  { %v3663_v57 = vadd.f32 %v5691_v52, %v3657_v53 }
0x1b6b   :  { %6375 = vmatmul.mubr.msk.f32.vlgmr.msra.gmra.mxu0 %vm381_vm4, %v3663_v57 }
0x1b6c   :  { %6378 = vmatpush3.msra.mxu0 %v5705_v56  ;;  %6387 = vmatprep.mubr.msk.f32.mxu0 %vm381_vm4, %v3662_v50 }
0x1b6d   :  { %6379 = vmatprep.subr.mxu0 %v5704_v55 }
0x1b6e   :  { %6380 = vmatpush3.msra.mxu0 %v5704_v55 }
0x1b6f   :  { %6381 = vmatprep.subr.mxu0 %v5703_v59 }
0x1b70   :  { %6382 = vmatpush3.msra.mxu0 %v5703_v59 }
0x1b71   :  { %6383 = vmatprep.subr.mxu0 %v5702_v38 }
0x1b72   :  { %6384 = vmatpush3.msra.mxu0 %v5702_v38 }
0x1b73   :  { %6385 = vmatprep.subr.mxu0 %v5701_v60 }
0x1b74   :  { %6386 = vmatpush3.msra.mxu0 %v5701_v60 }
0x1b75   :  { %6388 = vmatmul.mubr.msk.f32.vlgmr.msra.gmra.mxu0 %vm381_vm4, %v3663_v57  ;;  %6390 = vmatprep.subr.mxu0 %v5714_v62 }
0x1b76   :  { %6391 = vmatpush3.msra.mxu0 %v5714_v62  ;;  %6400 = vmatprep.mubr.msk.f32.mxu0 %vm381_vm4, %v3662_v50 }
0x1b77   :  { %6392 = vmatprep.subr.mxu0 %v5713_v29 }
0x1b78   :  { %6393 = vmatpush3.msra.mxu0 %v5713_v29 }
0x1b79   :  { %6394 = vmatprep.subr.mxu0 %v5712_v4 }
0x1b7a   :  { %6395 = vmatpush3.msra.mxu0 %v5712_v4 }
0x1b7b   :  { %6396 = vmatprep.subr.mxu0 %v5711_v25 }
0x1b7c   :  { %6397 = vmatpush3.msra.mxu0 %v5711_v25 }
0x1b7d   :  { %6398 = vmatprep.subr.mxu0 %v5710_v5 }
0x1b7e   :  { %6399 = vmatpush3.msra.mxu0 %v5710_v5 }
0x1b7f   :  { %6401 = vmatmul.mubr.msk.f32.vlgmr.msra.gmra.mxu0 %vm381_vm4, %v3663_v57 }
0x1c2b   :  { %v6376_v2 = vpop.f32.mrf.mxu0 }
0x1c2c   :  { %v3753_v24 = vadd.f32 %v6376_v2, %v5698_v34 }
0x1c2d   :  { %v3747_v7 = vpop.f32.mrf.mxu0 }
0x1c2e   :  { %v3748_v9 = vadd.f32 %v5698_v34, %v3747_v7  ;;  %v7967_v26 = vmul.f32 0.35355338, %v3753_v24 }
0x1c30   :  { %v7928_v10 = vmul.f32 0.35355338, %v3748_v9 }
0x1c32   :  { %6407 = vmatprep.mubr.msk.f32.mxu0 %vm381_vm4, %v7928_v10  ;;  %6414 = vmatprep.mubr.msk.f32.mxu1 %vm381_vm4, %v7928_v10 }
0x1c35   :  { %v6389_v15 = vpop.f32.mrf.mxu0 }
0x1c36   :  { %v7937_v27 = vadd.f32 %v6389_v15, %v5707_v46 }
0x1c37   :  { %v3833_v17 = vpop.f32.mrf.mxu0 }
0x1c38   :  { %v7939_v20 = vadd.f32 %v5707_v46, %v3833_v17  ;;  %v3931_v21 = vsel %vm687_vm8, %v7937_v27, 0.0  ;;  %v4044_v22 = vsel %vm6996_vm7, %v7937_v27, 0.0  ;;  %v4313_v36 = vsel %vm7061_vm11, %v7937_v27, 0.0 }
0x1c39   :  { %6403 = vmatprep.subr.msk.mxu0 %vm381_vm4, %v3931_v21  ;;  %6410 = vmatprep.subr.msk.mxu1 %vm381_vm4, %v4044_v22  ;;  %v8018_v51 = vsel %vm7093_vm1, %v7937_v27, 0.0 }
0x1c3a   :  { %6404 = vmatpush3.xpose.msk.msra.mxu0 %vm381_vm4, %v3931_v21  ;;  %6411 = vmatpush3.xpose.msk.msra.mxu1 %vm381_vm4, %v4044_v22  ;;  %v3930_v39 = vsel %vm687_vm8, %v7939_v20, 0.0  ;;  %v4043_v23 = vsel %vm6996_vm7, %v7939_v20, 0.0  ;;  %v4312_v32 = vsel %vm7061_vm11, %v7939_v20, 0.0 }
0x1c3b   :  { %6405 = vmatprep.subr.msk.mxu0 %vm381_vm4, %v3930_v39  ;;  %6412 = vmatprep.subr.msk.mxu1 %vm381_vm4, %v4043_v23 }
0x1c3e   :  { %6406 = vmatpush3.xpose.msk.msra.mxu0 %vm381_vm4, %v3930_v39  ;;  %6413 = vmatpush3.xpose.msk.msra.mxu1 %vm381_vm4, %v4043_v23 }
0x1c3f   :  { %v6402_v28 = vpop.f32.mrf.mxu0  ;;  %6431 = vmatprep.subr.msk.mxu1 %vm381_vm4, %v4313_v36 }
0x1c40   :  { %v7970_v35 = vadd.f32 %v6402_v28, %v5716_v63 }
0x1c41   :  { %v3919_v6 = vpop.f32.mrf.mxu0  ;;  %6408 = vmatmul.mubr.msk.f32.vlgmr.msra.gmra.mxu0 %vm381_vm4, %v7967_v26  ;;  %6415 = vmatmul.mubr.msk.f32.vlgmr.msra.gmra.mxu1 %vm381_vm4, %v7967_v26 }
0x1c42   :  { %v7976_v31 = vadd.f32 %v5716_v63, %v3919_v6  ;;  %6417 = vmatprep.subr.msk.mxu0 %vm6996_vm7, %v7970_v35  ;;  %6432 = vmatpush3.xpose.msk.msra.mxu1 %vm381_vm4, %v4313_v36 }
0x1c43   :  { %6435 = vmatprep.mubr.msk.f32.mxu1 %vm381_vm4, %v7928_v10  ;;  %6418 = vmatpush3.msk.msra.mxu0 %vm6996_vm7, %v7970_v35 }
0x1c44   :  { %6433 = vmatprep.subr.msk.mxu1 %vm381_vm4, %v4312_v32  ;;  %6419 = vmatprep.subr.msk.mxu0 %vm6996_vm7, %v7976_v31 }
0x1c45   :  { %6420 = vmatpush3.msk.msra.mxu0 %vm6996_vm7, %v7976_v31 }
0x1c46   :  { %6424 = vmatprep.subr.msk.mxu0 %vm687_vm8, %v7970_v35  ;;  %6434 = vmatpush3.xpose.msk.msra.mxu1 %vm381_vm4, %v4312_v32 }
0x1c47   :  { %6452 = vmatprep.subr.msk.mxu1 %vm7082_vm14, %v7970_v35 }
0x1c49   :  { %6436 = vmatmul.mubr.msk.f32.vlgmr.msra.gmra.mxu1 %vm381_vm4, %v7967_v26 }
0x1c4a   :  { %6453 = vmatpush3.msk.msra.mxu1 %vm7082_vm14, %v7970_v35 }
0x1c4b   :  { %6454 = vmatprep.subr.msk.mxu1 %vm7082_vm14, %v7976_v31 }
0x1c4c   :  { %6455 = vmatpush3.msk.msra.mxu1 %vm7082_vm14, %v7976_v31 }
0x1c4d   :  { %6459 = vmatprep.subr.msk.mxu1 %vm381_vm4, %v8018_v51 }
0x1d01   :  { %v6409_v61 = vpop.f32.mrf.mxu0  ;;  %v6416_v16 = vpop.f32.mrf.mxu1 }
0x1d02   :  { %v4125_v56 = vadd.f32 %v7575_v41, %v6416_v16  ;;  %v4018_v37 = vadd.f32 %v8026_v54, %v6409_v61 }
0x1d03   :  { %v4012_v33 = vpop.f32.mrf.mxu0  ;;  %v4119_v19 = vpop.f32.mrf.mxu1 }
0x1d04   :  { %v4120_v40 = vadd.f32 %v7582_v48, %v4119_v19  ;;  %v4131_v42 = vsel %vm780_vm2, %v4125_v56, -inf  ;;  %v4013_v41 = vadd.f32 %v8034_v43, %v4012_v33  ;;  %v4024_v45 = vsel %vm780_vm2, %v4018_v37, -inf }
0x1d05   :  { %4132 = vmax.xlane.f32.xlu0 %v4131_v42 }
0x1d06   :  { %v4128_v44 = vsel %vm780_vm2, %v4120_v40, -inf  ;;  %v4021_v48 = vsel %vm780_vm2, %v4013_v41, -inf }
0x1d07   :  { %4129 = vmax.xlane.f32.xlu1 %v4128_v44 }
0x1d09   :  { %4025 = vmax.xlane.f32.xlu0 %v4024_v45  ;;  %v6437_v52 = vpop.f32.mrf.mxu1 }
0x1d0a   :  { %v4394_v30 = vadd.f32 %v8026_v54, %v6437_v52 }
0x1d0b   :  { %v4388_v49 = vpop.f32.mrf.mxu1  ;;  %4022 = vmax.xlane.f32.xlu1 %v4021_v48 }
0x1d0c   :  { %v4389_v58 = vadd.f32 %v8034_v43, %v4388_v49  ;;  %v4400_v50 = vsel %vm780_vm2, %v4394_v30, -inf }
0x1d0d   :  { %4401 = vmax.xlane.f32.xlu0 %v4400_v50 }
0x1d0e   :  { %v4397_v53 = vsel %vm780_vm2, %v4389_v58, -inf }
0x1d0f   :  { %4398 = vmax.xlane.f32.xlu1 %v4397_v53 }
0x1d8e   :  { %v4133_v57 = vpop.xlane.xlu0 %4132 }
0x1d8f   :  { %v4135_v55 = vsub.f32 %v4125_v56, %v4133_v57 }
0x1d90   :  { %v4130_v59 = vpop.xlane.xlu1 %4129 }
0x1d91   :  { %v4138_v38 = vmul.f32 1.442695, %v4135_v55  ;;  %v4134_v60 = vsub.f32 %v4120_v40, %v4130_v59  ;;  %v4503_v59 = vsel %vm7082_vm14, %v7937_v27, 0.0 }
0x1d92   :  { %v4026_v62 = vpop.xlane.xlu0 %4025 }
0x1d93   :  { %6597 = vpow2.f32 %v4138_v38  ;;  %v4136_v29 = vmul.f32 1.442695, %v4134_v60  ;;  %v4028_v4 = vsub.f32 %v4018_v37, %v4026_v62  ;;  %v4502_v38 = vsel %vm7082_vm14, %v7939_v20, 0.0 }
0x1d94   :  { %v4023_v25 = vpop.xlane.xlu1 %4022 }
0x1d95   :  { %6599 = vpow2.f32 %v4136_v29  ;;  %v4031_v5 = vmul.f32 1.442695, %v4028_v4  ;;  %v4027_v2 = vsub.f32 %v4013_v41, %v4023_v25 }
0x1d96   :  { %v4402_v34 = vpop.xlane.xlu0 %4401 }
0x1d97   :  { %6601 = vpow2.f32 %v4031_v5  ;;  %v4029_v7 = vmul.f32 1.442695, %v4027_v2  ;;  %v4404_v9 = vsub.f32 %v4394_v30, %v4402_v34 }
0x1d98   :  { %v4399_v46 = vpop.xlane.xlu1 %4398 }
0x1d99   :  { %6603 = vpow2.f32 %v4029_v7  ;;  %v4407_v15 = vmul.f32 1.442695, %v4404_v9  ;;  %v4403_v17 = vsub.f32 %v4389_v58, %v4399_v46 }
0x1d9b   :  { %6605 = vpow2.f32 %v4407_v15  ;;  %v4405_v21 = vmul.f32 1.442695, %v4403_v17 }
0x1d9d   :  { %6607 = vpow2.f32 %v4405_v21 }
0x1da0   :  { %v6598_v22 = vpop.eup %6597 }
0x1da1   :  { %v4143_v39 = vsel %vm780_vm2, %v6598_v22, 0.0 }
0x1da2   :  { %v6600_v23 = vpop.eup %6599  ;;  %4144 = vadd.xlane.f32.xlu0 %v4143_v39 }
0x1da3   :  { %v4140_v24 = vsel %vm780_vm2, %v6600_v23, 0.0 }
0x1da4   :  { %v6602_v63 = vpop.eup %6601  ;;  %4141 = vadd.xlane.f32.xlu1 %v4140_v24 }
0x1da5   :  { %v4036_v36 = vsel %vm780_vm2, %v6602_v63, 0.0 }
0x1da6   :  { %v6604_v28 = vpop.eup %6603  ;;  %4037 = vadd.xlane.f32.xlu0 %v4036_v36 }
0x1da7   :  { %v4033_v6 = vsel %vm780_vm2, %v6604_v28, 0.0 }
0x1da8   :  { %v6606_v32 = vpop.eup %6605  ;;  %4034 = vadd.xlane.f32.xlu1 %v4033_v6 }
0x1da9   :  { %v4412_v61 = vsel %vm780_vm2, %v6606_v32, 0.0 }
0x1daa   :  { %v6608_v16 = vpop.eup %6607  ;;  %4413 = vadd.xlane.f32.xlu0 %v4412_v61 }
0x1dab   :  { %v4409_v56 = vsel %vm780_vm2, %v6608_v16, 0.0 }
0x1dac   :  { %4410 = vadd.xlane.f32.xlu1 %v4409_v56 }
0x1e2b   :  { %v4145_v33 = vpop.xlane.xlu0 %4144 }
0x1e2c   :  { %6609 = vrcp.f32 %v4145_v33 }
0x1e2d   :  { %v4142_v19 = vpop.xlane.xlu1 %4141 }
0x1e2e   :  { %6611 = vrcp.f32 %v4142_v19  ;;  %v4692_v19 = vsel %vm7093_vm1, %v7939_v20, 0.0 }
0x1e2f   :  { %v4038_v37 = vpop.xlane.xlu0 %4037 }
0x1e30   :  { %6613 = vrcp.f32 %v4038_v37 }
0x1e31   :  { %v4035_v40 = vpop.xlane.xlu1 %4034 }
0x1e32   :  { %6615 = vrcp.f32 %v4035_v40 }
0x1e33   :  { %v4414_v42 = vpop.xlane.xlu0 %4413 }
0x1e34   :  { %6617 = vrcp.f32 %v4414_v42 }
0x1e35   :  { %v4411_v41 = vpop.xlane.xlu1 %4410 }
0x1e36   :  { %6619 = vrcp.f32 %v4411_v41 }
0x1e39   :  { %v6610_v44 = vpop.eup %6609 }
0x1e3a   :  { %v4149_v30 = vmul.f32 %v6610_v44, %v6598_v22 }
0x1e3b   :  { %v6612_v45 = vpop.eup %6611 }
0x1e3c   :  { %v4148_v52 = vmul.f32 %v6612_v45, %v6600_v23 }
0x1e3d   :  { %v6614_v48 = vpop.eup %6613 }
0x1e3e   :  { %6421 = vmatprep.mubr.msk.f32.mxu0 %vm780_vm2, %v4148_v52  ;;  %v4042_v50 = vmul.f32 %v6614_v48, %v6602_v63 }
0x1e3f   :  { %v6616_v49 = vpop.eup %6615  ;;  %6422 = vmatmul.mubr.msk.f32.vlgmr.msra.gmra.mxu0 %vm780_vm2, %v4149_v30 }
0x1e40   :  { %6425 = vmatpush3.msk.msra.mxu0 %vm687_vm8, %v7970_v35  ;;  %v4041_v58 = vmul.f32 %v6616_v49, %v6604_v28 }
0x1e41   :  { %6426 = vmatprep.subr.msk.mxu0 %vm687_vm8, %v7976_v31  ;;  %v6618_v53 = vpop.eup %6617 }
0x1e42   :  { %6427 = vmatpush3.msk.msra.mxu0 %vm687_vm8, %v7976_v31  ;;  %6428 = vmatprep.mubr.msk.f32.mxu0 %vm780_vm2, %v4041_v58  ;;  %v4418_v47 = vmul.f32 %v6618_v53, %v6606_v32 }
0x1e43   :  { %v6620_v57 = vpop.eup %6619  ;;  %6438 = vmatprep.subr.msk.mxu0 %vm7061_vm11, %v7970_v35  ;;  %6429 = vmatmul.mubr.msk.f32.vlgmr.msra.gmra.mxu0 %vm780_vm2, %v4042_v50 }
0x1e44   :  { %6439 = vmatpush3.msk.msra.mxu0 %vm7061_vm11, %v7970_v35  ;;  %v4417_v55 = vmul.f32 %v6620_v57, %v6608_v16  ;;  %v5763_v57 = vld [vmem:[%s8348_s5 + $0x1d8] sm:$0xff] }
0x1e45   :  { %6440 = vmatprep.subr.msk.mxu0 %vm7061_vm11, %v7976_v31 }
0x1e46   :  { %6441 = vmatpush3.msk.msra.mxu0 %vm7061_vm11, %v7976_v31  ;;  %6442 = vmatprep.mubr.msk.f32.mxu0 %vm780_vm2, %v4417_v55 }
0x1e47   :  { %6445 = vmatprep.subr.msk.mxu0 %vm381_vm4, %v4503_v59  ;;  %6443 = vmatmul.mubr.msk.f32.vlgmr.msra.gmra.mxu0 %vm780_vm2, %v4418_v47 }
0x1e48   :  { %6446 = vmatpush3.xpose.msk.msra.mxu0 %vm381_vm4, %v4503_v59  ;;  %6449 = vmatprep.mubr.msk.f32.mxu0 %vm381_vm4, %v7928_v10 }
0x1e49   :  { %6447 = vmatprep.subr.msk.mxu0 %vm381_vm4, %v4502_v38 }
0x1e4c   :  { %6448 = vmatpush3.xpose.msk.msra.mxu0 %vm381_vm4, %v4502_v38 }
0x1e4d   :  { %6466 = vmatprep.subr.msk.mxu0 %vm7093_vm1, %v7970_v35 }
0x1e4f   :  { %6450 = vmatmul.mubr.msk.f32.vlgmr.msra.gmra.mxu0 %vm381_vm4, %v7967_v26 }
0x1e50   :  { %6467 = vmatpush3.msk.msra.mxu0 %vm7093_vm1, %v7970_v35 }
0x1e51   :  { %6468 = vmatprep.subr.msk.mxu0 %vm7093_vm1, %v7976_v31 }
0x1e52   :  { %6469 = vmatpush3.msk.msra.mxu0 %vm7093_vm1, %v7976_v31 }
0x1e53   :  { %6473 = vmatprep.subr.mxu0 %v5763_v57 }
0x1eff   :  { %v6423_v8 = vpop.f32.mrf.mxu0 }
0x1f01   :  { %v4222_v11 = vpop.f32.mrf.mxu0 }
0x1f03   :  { %v6430_v27 = vpop.f32.mrf.mxu0 }
0x1f04   :  { %v4309_v60 = vadd.f32 %v6430_v27, %v6423_v8  ;;  %v5762_v27 = vld [vmem:[%s8348_s5 + $0x1d0] sm:$0xff] }
0x1f05   :  { %v4303_v62 = vpop.f32.mrf.mxu0 }
0x1f06   :  { %v4304_v29 = vadd.f32 %v4303_v62, %v4222_v11  ;;  %v5760_v62 = vld [vmem:[%s8348_s5 + $0x1c0] sm:$0xff] }
0x1f07   :  { %v6444_v4 = vpop.f32.mrf.mxu0 }
0x1f08   :  { %v4501_v25 = vadd.f32 %v6444_v4, %v4309_v60  ;;  %v5761_v60 = vld [vmem:[%s8348_s5 + $0x1c8] sm:$0xff] }
0x1f09   :  { %v4491_v5 = vpop.f32.mrf.mxu0 }
0x1f0a   :  { %v4500_v2 = vadd.f32 %v4491_v5, %v4304_v29  ;;  %v5759_v29 = vld [vmem:[%s8348_s5 + $0x1b8] sm:$0xff] }
0x1f0f   :  { %v6451_v34 = vpop.f32.mrf.mxu0 }
0x1f10   :  { %v4584_v35 = vadd.f32 %v8026_v54, %v6451_v34  ;;  %v5765_v34 = vld [vmem:[%s8349_s6 + $0x25] ss:$0 sm:$0xff] }
0x1f11   :  { %v4578_v7 = vpop.f32.mrf.mxu0 }
0x1f12   :  { %v4579_v9 = vadd.f32 %v8034_v43, %v4578_v7  ;;  %v4590_v46 = vsel %vm780_vm2, %v4584_v35, -inf }
0x1f13   :  { %4591 = vmax.xlane.f32.xlu0 %v4590_v46 }
0x1f14   :  { %v4587_v31 = vsel %vm780_vm2, %v4579_v9, -inf }
0x1f15   :  { %4588 = vmax.xlane.f32.xlu1 %v4587_v31 }
0x1f9c   :  { %v4592_v15 = vpop.xlane.xlu0 %4591 }
0x1f9d   :  { %v4594_v17 = vsub.f32 %v4584_v35, %v4592_v15 }
0x1f9e   :  { %v4589_v21 = vpop.xlane.xlu1 %4588 }
0x1f9f   :  { %v4597_v22 = vmul.f32 1.442695, %v4594_v17  ;;  %v4593_v39 = vsub.f32 %v4579_v9, %v4589_v21 }
0x1fa1   :  { %6621 = vpow2.f32 %v4597_v22  ;;  %v4595_v23 = vmul.f32 1.442695, %v4593_v39 }
0x1fa3   :  { %6623 = vpow2.f32 %v4595_v23 }
0x1fae   :  { %v6622_v24 = vpop.eup %6621 }
0x1faf   :  { %v4602_v63 = vsel %vm780_vm2, %v6622_v24, 0.0 }
0x1fb0   :  { %v6624_v36 = vpop.eup %6623  ;;  %4603 = vadd.xlane.f32.xlu0 %v4602_v63 }
0x1fb1   :  { %v4599_v28 = vsel %vm780_vm2, %v6624_v36, 0.0 }
0x1fb2   :  { %4600 = vadd.xlane.f32.xlu1 %v4599_v28 }
0x2039   :  { %v4604_v6 = vpop.xlane.xlu0 %4603 }
0x203a   :  { %6625 = vrcp.f32 %v4604_v6 }
0x203b   :  { %v4601_v32 = vpop.xlane.xlu1 %4600 }
0x203c   :  { %6627 = vrcp.f32 %v4601_v32  ;;  %v5781_v32 = vld [vmem:[%s8350_s7 + $0xe8] sm:$0xff] }
0x2047   :  { %v6626_v61 = vpop.eup %6625 }
0x2048   :  { %v4608_v33 = vmul.f32 %v6626_v61, %v6622_v24  ;;  %v5780_v61 = vld [vmem:[%s8350_s7 + $0xe0] sm:$0xff] }
0x2049   :  { %v6628_v16 = vpop.eup %6627 }
0x204a   :  { %v4607_v56 = vmul.f32 %v6628_v16, %v6624_v36  ;;  %v5779_v16 = vld [vmem:[%s8350_s7 + $0xd8] sm:$0xff] }
0x204c   :  { %6456 = vmatprep.mubr.msk.f32.mxu1 %vm780_vm2, %v4607_v56  ;;  %v5778_v56 = vld [vmem:[%s8350_s7 + $0xd0] sm:$0xff] }
0x204d   :  { %6457 = vmatmul.mubr.msk.f32.vlgmr.msra.gmra.mxu1 %vm780_vm2, %v4608_v33  ;;  %v5777_v33 = vld [vmem:[%s8350_s7 + $0xc8] sm:$0xff] }
0x204e   :  { %6460 = vmatpush3.xpose.msk.msra.mxu1 %vm381_vm4, %v8018_v51  ;;  %6463 = vmatprep.mubr.msk.f32.mxu1 %vm381_vm4, %v7928_v10 }
0x204f   :  { %6461 = vmatprep.subr.msk.mxu1 %vm381_vm4, %v4692_v19 }
0x2052   :  { %6462 = vmatpush3.xpose.msk.msra.mxu1 %vm381_vm4, %v4692_v19  ;;  %v5776_v19 = vld [vmem:[%s8350_s7 + $0xc0] sm:$0xff] }
0x2053   :  { %5068 = vmatprep.subr.mxu1 %v5781_v32 }
0x2055   :  { %6464 = vmatmul.mubr.msk.f32.vlgmr.msra.gmra.mxu1 %vm381_vm4, %v7967_v26 }
0x2056   :  { %5110 = vmatprep.mubr.f32.mxu1 %v6699_v13  ;;  %5069 = vmatpush1.msra.mxu1 %v5780_v61 }
0x2057   :  { %5070 = vmatprep.subr.mxu1 %v5779_v16 }
0x2058   :  { %5071 = vmatpush1.msra.mxu1 %v5778_v56 }
0x2059   :  { %5072 = vmatprep.subr.mxu1 %v5777_v33 }
0x205a   :  { %5073 = vmatpush1.msra.mxu1 %v5776_v19 }
0x210d   :  { %v6458_v37 = vpop.f32.mrf.mxu1 }
0x210e   :  { %v4691_v40 = vadd.f32 %v6458_v37, %v4501_v25  ;;  %v5775_v37 = vld [vmem:[%s8350_s7 + $0xb8] sm:$0xff] }
0x210f   :  { %v4681_v42 = vpop.f32.mrf.mxu1  ;;  %5074 = vmatprep.subr.mxu1 %v5775_v37 }
0x2110   :  { %v4690_v51 = vadd.f32 %v4681_v42, %v4500_v2  ;;  %v5773_v42 = vld [vmem:[%s8350_s7 + $0xa8] sm:$0xff] }
0x2115   :  { %v6465_v41 = vpop.f32.mrf.mxu1 }
0x2116   :  { %v4774_v12 = vadd.f32 %v8026_v54, %v6465_v41  ;;  %v5800_v41 = vld [vmem:[%s8352_s9 + $0x1b8] sm:$0xff] }
0x2117   :  { %v4768_v20 = vpop.f32.mrf.mxu1 }
0x2118   :  { %v4769_v44 = vadd.f32 %v8034_v43, %v4768_v20  ;;  %v4780_v10 = vsel %vm780_vm2, %v4774_v12, -inf  ;;  %v5798_v20 = vld [vmem:[%s8352_s9 + $0x1a8] sm:$0xff] }
0x2119   :  { %4781 = vmax.xlane.f32.xlu0 %v4780_v10  ;;  %v5796_v10 = vld [vmem:[%s8352_s9 + $0x198] sm:$0xff] }
0x211a   :  { %v4777_v45 = vsel %vm780_vm2, %v4769_v44, -inf }
0x211b   :  { %4778 = vmax.xlane.f32.xlu1 %v4777_v45  ;;  %v5795_v45 = vld [vmem:[%s8352_s9 + $0x190] sm:$0xff] }
0x21a2   :  { %v4782_v52 = vpop.xlane.xlu0 %4781 }
0x21a3   :  { %v4784_v26 = vsub.f32 %v4774_v12, %v4782_v52  ;;  %v5799_v12 = vld [vmem:[%s8352_s9 + $0x1b0] sm:$0xff]  ;;  %v5794_v52 = vld [vmem:[%s8352_s9 + $0x188] sm:$0xff] }
0x21a4   :  { %v4779_v30 = vpop.xlane.xlu1 %4778 }
0x21a5   :  { %v4787_v48 = vmul.f32 1.442695, %v4784_v26  ;;  %v4783_v49 = vsub.f32 %v4769_v44, %v4779_v30  ;;  %v5797_v44 = vld [vmem:[%s8352_s9 + $0x1a0] sm:$0xff]  ;;  %v5792_v30 = vld [vmem:[%s8352_s9 + $0x178] sm:$0xff] }
0x21a6   :  { %v5793_v26 = vld [vmem:[%s8352_s9 + $0x180] sm:$0xff] }
0x21a7   :  { %6629 = vpow2.f32 %v4787_v48  ;;  %v4785_v58 = vmul.f32 1.442695, %v4783_v49  ;;  %v5791_v48 = vld [vmem:[%s8352_s9 + $0x170] sm:$0xff]  ;;  %v5790_v49 = vld [vmem:[%s8352_s9 + $0x168] sm:$0xff] }
0x21a9   :  { %6631 = vpow2.f32 %v4785_v58  ;;  %v5789_v58 = vld [vmem:[%s8352_s9 + $0x160] sm:$0xff] }
0x21b4   :  { %v6630_v50 = vpop.eup %6629 }
0x21b5   :  { %v4792_v54 = vsel %vm780_vm2, %v6630_v50, 0.0 }
0x21b6   :  { %v6632_v53 = vpop.eup %6631  ;;  %4793 = vadd.xlane.f32.xlu0 %v4792_v54  ;;  %v5787_v54 = vld [vmem:[%s8352_s9 + $0x150] sm:$0xff] }
0x21b7   :  { %v4789_v43 = vsel %vm780_vm2, %v6632_v53, 0.0 }
0x21b8   :  { %4790 = vadd.xlane.f32.xlu1 %v4789_v43  ;;  %v5785_v43 = vld [vmem:[%s8352_s9 + $0x140] sm:$0xff] }
0x223f   :  { %v4794_v55 = vpop.xlane.xlu0 %4793 }
0x2240   :  { %6633 = vrcp.f32 %v4794_v55 }
0x2241   :  { %v4791_v47 = vpop.xlane.xlu1 %4790 }
0x2242   :  { %6635 = vrcp.f32 %v4791_v47 }
0x224d   :  { %v6634_v59 = vpop.eup %6633 }
0x224e   :  { %v4798_v11 = vmul.f32 %v6634_v59, %v6630_v50  ;;  %v5788_v50 = vld [vmem:[%s8352_s9 + $0x158] sm:$0xff] }
0x224f   :  { %v6636_v38 = vpop.eup %6635 }
0x2250   :  { %v4797_v8 = vmul.f32 %v6636_v38, %v6632_v53  ;;  %v5786_v53 = vld [vmem:[%s8352_s9 + $0x148] sm:$0xff] }
0x2252   :  { %6470 = vmatprep.mubr.msk.f32.mxu0 %vm780_vm2, %v4797_v8 }
0x2253   :  { %6471 = vmatmul.mubr.msk.f32.vlgmr.msra.gmra.mxu0 %vm780_vm2, %v4798_v11 }
0x2254   :  { %6474 = vmatpush3.msra.mxu0 %v5763_v57 }
0x2255   :  { %6475 = vmatprep.subr.mxu0 %v5762_v27 }
0x2256   :  { %6476 = vmatpush3.msra.mxu0 %v5762_v27 }
0x2257   :  { %6477 = vmatprep.subr.mxu0 %v5761_v60 }
0x2258   :  { %6478 = vmatpush3.msra.mxu0 %v5761_v60 }
0x2259   :  { %6479 = vmatprep.subr.mxu0 %v5760_v62 }
0x225a   :  { %6480 = vmatpush3.msra.mxu0 %v5760_v62 }
0x225b   :  { %6481 = vmatprep.subr.mxu0 %v5759_v29 }
0x225c   :  { %6482 = vmatpush3.msra.mxu0 %v5759_v29  ;;  %v5770_v29 = vld [vmem:[%s8349_s6 + $0x26] ss:$0 sm:$0xff] }
0x225d   :  { %5154 = vmatprep.subr.mxu0 %v6699_v13 }
0x2313   :  { %v6472_v4 = vpop.f32.mrf.mxu0 }
0x2314   :  { %v4881_v2 = vadd.f32 %v6472_v4, %v4691_v40  ;;  %v5774_v40 = vld [vmem:[%s8350_s7 + $0xb0] sm:$0xff] }
0x2315   :  { %v4871_v25 = vpop.f32.mrf.mxu0  ;;  %5075 = vmatpush1.msra.mxu1 %v5774_v40 }
0x2316   :  { %v4880_v5 = vadd.f32 %v4871_v25, %v4690_v51  ;;  %v5772_v51 = vld [vmem:[%s8350_s7 + $0xa0] sm:$0xff]  ;;  %5076 = vmatprep.subr.mxu1 %v5773_v42 }
0x2317   :  { %5077 = vmatpush1.msra.mxu1 %v5772_v51  ;;  %v5771_v25 = vld [vmem:[%s8349_s6 + $0x27] ss:$0 sm:$0xff] }
0x2318   :  { %6483 = vmatprep.mubr.msk.f32.mxu0 %vm381_vm4, %v4880_v5 }
0x2319   :  { %6484 = vmatmul.mubr.msk.f32.vlgmr.msra.gmra.mxu0 %vm381_vm4, %v4881_v2 }
0x231a   :  { %5155 = vmatpush1.msra.mxu0 %v5800_v41 }
0x231b   :  { %5156 = vmatprep.subr.mxu0 %v6699_v13 }
0x231c   :  { %5157 = vmatpush1.msra.mxu0 %v5799_v12 }
0x231d   :  { %5158 = vmatprep.subr.mxu0 %v6699_v13 }
0x231e   :  { %5159 = vmatpush1.msra.mxu0 %v5798_v20 }
0x231f   :  { %5160 = vmatprep.subr.mxu0 %v6699_v13 }
0x2320   :  { %5161 = vmatpush1.msra.mxu0 %v5797_v44 }
0x2321   :  { %5162 = vmatprep.subr.mxu0 %v6699_v13 }
0x2322   :  { %5163 = vmatpush1.msra.mxu0 %v5796_v10 }
0x2323   :  { %5164 = vmatprep.subr.mxu0 %v6699_v13 }
0x2324   :  { %5165 = vmatpush1.msra.mxu0 %v5795_v45 }
0x2325   :  { %5166 = vmatprep.subr.mxu0 %v6699_v13 }
0x2326   :  { %5167 = vmatpush1.msra.mxu0 %v5794_v52 }
0x2327   :  { %5168 = vmatprep.subr.mxu0 %v6699_v13 }
0x2328   :  { %5169 = vmatpush1.msra.mxu0 %v5793_v26 }
0x2329   :  { %5170 = vmatprep.subr.mxu0 %v6699_v13 }
0x232a   :  { %5171 = vmatpush1.msra.mxu0 %v5792_v30 }
0x232b   :  { %5172 = vmatprep.subr.mxu0 %v6699_v13 }
0x232c   :  { %5173 = vmatpush1.msra.mxu0 %v5791_v48 }
0x232d   :  { %5174 = vmatprep.subr.mxu0 %v6699_v13 }
0x232e   :  { %5175 = vmatpush1.msra.mxu0 %v5790_v49 }
0x232f   :  { %5176 = vmatprep.subr.mxu0 %v6699_v13 }
0x2330   :  { %5177 = vmatpush1.msra.mxu0 %v5789_v58 }
0x2331   :  { %5178 = vmatprep.subr.mxu0 %v6699_v13 }
0x2332   :  { %5179 = vmatpush1.msra.mxu0 %v5788_v50 }
0x2333   :  { %5180 = vmatprep.subr.mxu0 %v6699_v13 }
0x2334   :  { %5181 = vmatpush1.msra.mxu0 %v5787_v54 }
0x2335   :  { %5182 = vmatprep.subr.mxu0 %v6699_v13 }
0x2336   :  { %5183 = vmatpush1.msra.mxu0 %v5786_v53 }
0x2337   :  { %5184 = vmatprep.subr.mxu0 %v6699_v13 }
0x2338   :  { %5185 = vmatpush1.msra.mxu0 %v5785_v43  ;;  %v6700_v43 = vmov 1966171168  }
0x2339   :  { %5210 = vmatprep.subr.mxu0 %v6699_v13 }
0x23d9   :  { %v6485_v35 = vpop.f32.mrf.mxu0 }
0x23da   :  { %v4971_v7 = vadd.f32 %v6485_v35, %v5765_v34  ;;  %v5804_v35 = vld [vmem:[%s8352_s9 + $0x1d8] sm:$0xff] }
0x23db   :  { %v4965_v9 = vpop.f32.mrf.mxu0  ;;  %5211 = vmatpush2.msra.mxu0 %v5804_v35 }
0x23dc   :  { %v8153_v46 = vadd.f32 %v4971_v7, %v7860_v18  ;;  %v4966_v31 = vadd.f32 %v5765_v34, %v4965_v9  ;;  %5212 = vmatprep.subr.mxu0 %v6699_v13  ;;  %v5803_v7 = vld [vmem:[%s8352_s9 + $0x1d0] sm:$0xff]  ;;  %v5802_v9 = vld [vmem:[%s8352_s9 + $0x1c8] sm:$0xff] }
0x23dd   :  { %5213 = vmatpush2.msra.mxu0 %v5803_v7 }
0x23de   :  { %v8156_v15 = vadd.f32 %v4966_v31, %v7855_v14  ;;  %v4981_v17 = vsel %vm381_vm4, %v8153_v46, 0.0  ;;  %5214 = vmatprep.subr.mxu0 %v6699_v13  ;;  %v5801_v31 = vld [vmem:[%s8352_s9 + $0x1c0] sm:$0xff] }
0x23df   :  { %4982 = vadd.xlane.f32.xlu0 %v4981_v17  ;;  %5215 = vmatpush2.msra.mxu0 %v5802_v9  ;;  %v5782_v17 = vld [vmem:[%s8351_s8 + $0x4] sm:$0x3] }
0x23e0   :  { %v4978_v21 = vsel %vm381_vm4, %v8156_v15, 0.0  ;;  %5216 = vmatprep.subr.mxu0 %v6699_v13 }
0x23e1   :  { %4979 = vadd.xlane.f32.xlu1 %v4978_v21  ;;  %5217 = vmatpush2.msra.mxu0 %v5801_v31  ;;  %v5033_v21 = vrot.slane %v5782_v17, %v7389_v3 }
0x2468   :  { %v4983_v22 = vpop.xlane.xlu0 %4982 }
0x2469   :  { %v4985_v39 = vmul.f32 0.025, %v4983_v22  ;;  %v5037_v22 = vrot.slane %v5782_v17, %v7395_v0  ;;  %v5808_v0 = vld [vmem:[%s8349_s6 + $0x28] ss:$0 sm:$0xff] }
0x246a   :  { %v4980_v23 = vpop.xlane.xlu1 %4979 }
0x246b   :  { %v8163_v24 = vsub.f32 %v8153_v46, %v4985_v39  ;;  %v4984_v18 = vmul.f32 0.025, %v4980_v23 }
0x246d   :  { %v8166_v63 = vsub.f32 %v8156_v15, %v4984_v18  ;;  %v4989_v14 = vmul.f32 %v8163_v24, %v8163_v24 }
0x246f   :  { %v4993_v36 = vsel %vm381_vm4, %v4989_v14, 0.0  ;;  %v4988_v28 = vmul.f32 %v8166_v63, %v8166_v63 }
0x2470   :  { %4994 = vadd.xlane.f32.xlu0 %v4993_v36 }
0x2471   :  { %v4990_v6 = vsel %vm381_vm4, %v4988_v28, 0.0 }
0x2472   :  { %4991 = vadd.xlane.f32.xlu1 %v4990_v6 }
0x24f9   :  { %v4995_v57 = vpop.xlane.xlu0 %4994 }
0x24fa   :  { %v4997_v55 = vmul.f32 0.025, %v4995_v57  ;;  %v5283_v57 = vunpack.c.l.s4 %v6700_v43 }
0x24fb   :  { %v4992_v47 = vpop.xlane.xlu1 %4991 }
0x24fc   :  { %v4999_v59 = vadd.f32 1e-05, %v4997_v55  ;;  %v4996_v38 = vmul.f32 0.025, %v4992_v47  ;;  %v5284_v55 = vunpack.c.0.s8 %v5283_v57 }
0x24fe   :  { %6637 = vrsqrt.f32 %v4999_v59  ;;  %v4998_v8 = vadd.f32 1e-05, %v4996_v38  ;;  %v5809_v59 = vld [vmem:[%s8353_s10] ss:$0 sm:$0xff] }
0x2500   :  { %6639 = vrsqrt.f32 %v4998_v8  ;;  %v5810_v8 = vld [vmem:[%s8353_s10 + $0x1] ss:$0 sm:$0xff]  ;;  %s6701_s10 = smov [#allocation4]  }
0x2501   :  { %s5447_s21 = sshll.u32 %s6701_s10, 4  ;;  %s5448_s21 = int_to_ptr.vmem [resolvable:$true] %s5447_s21 }
0x2502   :  { %s6653_s22 = scalar_lea.vmem %s5448_s21, 256  ;;  %p6658_p1 = scmp.lt.s32.totalorder %s5448_s21, %s5448_s21 }
0x2503   :  { %p6654_p0 = scmp.ne.s32.totalorder %s5448_s21, %s6653_s22  ;;  %p6659_p2 = scmp.lt.s32.totalorder %s6653_s22, %s6653_s22 }
0x2505   :  { %p6660_p3 = por %p6659_p2, %p6658_p1 }
0x2507   :  { %p6661_p4 = pnand %p6660_p3, %p6654_p0 }
0x250b   :  { %v6638_v11 = vpop.eup %6637 }
0x250c   :  { %v5003_v62 = vmul.f32 %v6638_v11, %v8163_v24  ;;  %v5287_v11 = vsub.s32 %v5284_v55, %v7386_v1 }
0x250d   :  { %v6640_v27 = vpop.eup %6639 }
0x250e   :  { %v5002_v60 = vmul.f32 %v6640_v27, %v8166_v63  ;;  %v5009_v2 = vmul.f32 %v5770_v29, %v5003_v62 }
0x2510   :  { %v5008_v4 = vmul.f32 %v5770_v29, %v5002_v60  ;;  %v5015_v34 = vadd.f32 %v5771_v25, %v5009_v2 }
0x2512   :  { %v5014_v5 = vadd.f32 %v5771_v25, %v5008_v4 }
0x2514   :  { %5783 = vmatmul.mubr.msk.f32.vlgmr.msra.gmra.mxu1 %vm381_vm4, %v5014_v5 }
0x2515   :  { %5116 = vmatprep.mubr.f32.mxu1 %v6699_v13 }
0x2518   :  { %5784 = vmatmul.mubr.msk.f32.gmra.mxu1 %vm381_vm4, %v5015_v34 }
0x25d4   :  { %v5112_v39 = vpop.f32.mrf.mxu1 }
0x25d5   :  { %v5113_v23 = vadd.f32 %v5112_v39, %v5033_v21 }
0x25d6   :  { %v5114_v24 = vpop.f32.mrf.mxu1 }
0x25d7   :  { %v5115_v18 = vadd.f32 %v5114_v24, %v5037_v22  ;;  %v5123_v13 = vmax.f32 %v5113_v23, 0.0 }
0x25d8   :  { %v5118_v63 = vpop.f32.mrf.mxu1 }
0x25d9   :  { %v5124_v14 = vmax.f32 %v5115_v18, 0.0  ;;  %v5119_v36 = vadd.f32 %v5118_v63, %v5033_v21 }
0x25da   :  { %v5120_v28 = vpop.f32.mrf.mxu1 }
0x25db   :  { %v5121_v6 = vadd.f32 %v5120_v28, %v5037_v22  ;;  %5805 = vmatprep.mubr.msk.f32.mxu0 %vm1917_vm3, %v5124_v14  ;;  %v5125_v61 = vmax.f32 %v5119_v36, 0.0 }
0x25dc   :  { %5219 = vmatmul.mubr.f32.vlgmr.msra.gmra.mxu0 %v5123_v13 }
0x25dd   :  { %v5126_v32 = vmax.f32 %v5121_v6, 0.0 }
0x25df   :  { %5806 = vmatprep.mubr.msk.f32.mxu0 %vm1917_vm3, %v5126_v32 }
0x25e0   :  { %5224 = vmatmul.mubr.f32.gmra.mxu0 %v5125_v61 }
0x269c   :  { %v5220_v3 = vpop.f32.mrf.mxu0 }
0x269d   :  { %v5229_v16 = vadd.f32 %v5220_v3, %v8156_v15 }
0x269e   :  { %v5222_v56 = vpop.f32.mrf.mxu0 }
0x269f   :  { %v5236_v33 = vadd.f32 %v5808_v0, %v5229_v16 }
0x26a0   :  { %v5225_v19 = vpop.f32.mrf.mxu0 }
0x26a1   :  { %v5230_v37 = vadd.f32 %v5225_v19, %v8153_v46  ;;  %v5240_v40 = vsel %vm381_vm4, %v5236_v33, 0.0 }
0x26a2   :  { %5241 = vadd.xlane.f32.xlu1 %v5240_v40  ;;  %v5227_v42 = vpop.f32.mrf.mxu0 }
0x26a3   :  { %v5237_v51 = vadd.f32 %v5808_v0, %v5230_v37 }
0x26a5   :  { %v5243_v41 = vsel %vm381_vm4, %v5237_v51, 0.0 }
0x26a6   :  { %5244 = vadd.xlane.f32.xlu0 %v5243_v41 }
0x272b   :  { %v5242_v12 = vpop.xlane.xlu1 %5241 }
0x272c   :  { %v5246_v20 = vmul.f32 0.025, %v5242_v12 }
0x272e   :  { %v5248_v44 = vsub.f32 %v5236_v33, %v5246_v20 }
0x272f   :  { %v5245_v10 = vpop.xlane.xlu0 %5244 }
0x2730   :  { %v5247_v45 = vmul.f32 0.025, %v5245_v10  ;;  %v5250_v52 = vmul.f32 %v5248_v44, %v5248_v44 }
0x2732   :  { %v5249_v15 = vsub.f32 %v5237_v51, %v5247_v45  ;;  %v5252_v26 = vsel %vm381_vm4, %v5250_v52, 0.0 }
0x2733   :  { %5253 = vadd.xlane.f32.xlu1 %v5252_v26 }
0x2734   :  { %v5251_v30 = vmul.f32 %v5249_v15, %v5249_v15 }
0x2736   :  { %v5255_v46 = vsel %vm381_vm4, %v5251_v30, 0.0 }
0x2737   :  { %5256 = vadd.xlane.f32.xlu0 %v5255_v46 }
0x27bc   :  { %v5254_v48 = vpop.xlane.xlu1 %5253 }
0x27bd   :  { %v5258_v49 = vmul.f32 0.025, %v5254_v48 }
0x27bf   :  { %v5260_v58 = vadd.f32 1e-05, %v5258_v49 }
0x27c0   :  { %v5257_v50 = vpop.xlane.xlu0 %5256 }
0x27c1   :  { %6641 = vrsqrt.f32 %v5260_v58  ;;  %v5259_v54 = vmul.f32 0.025, %v5257_v50 }
0x27c3   :  { %v5261_v53 = vadd.f32 1e-05, %v5259_v54 }
0x27c5   :  { %6643 = vrsqrt.f32 %v5261_v53 }
0x27ce   :  { %v6642_v47 = vpop.eup %6641 }
0x27cf   :  { %v5264_v38 = vmul.f32 %v6642_v47, %v5248_v44 }
0x27d1   :  { %v5270_v27 = vmul.f32 %v5809_v59, %v5264_v38 }
0x27d2   :  { %v6644_v60 = vpop.eup %6643 }
0x27d3   :  { %v5276_v62 = vadd.f32 %v5810_v8, %v5270_v27  ;;  %v5265_v29 = vmul.f32 %v6644_v60, %v5249_v15 }
0x27d5   :  { %v5281_v4 = vcombine.high %v5276_v62, %v5276_v62  ;;  %v5288_v25 = vrot.slane %v5276_v62, %v5287_v11  ;;  %v5271_v5 = vmul.f32 %v5809_v59, %v5265_v29  ;;  %6645 = vtanh.f32 %v5276_v62 }
0x27d7   :  { %v5295_v2 = vrot.slane %v5281_v4, %v5287_v11  ;;  %v5296_v34 = vcombine.high %v5288_v25, %v5288_v25  ;;  %v5304_v35 = vrot.slane %v5288_v25, %v5287_v11  ;;  %v5277_v7 = vadd.f32 %v5810_v8, %v5271_v5 }
0x27d9   :  { %v5297_v9 = vcombine.high %v5295_v2, %v5295_v2  ;;  %v5311_v31 = vrot.slane %v5295_v2, %v5287_v11  ;;  %v5318_v17 = vrot.slane %v5296_v34, %v5287_v11  ;;  %v5326_v21 = vcombine.high %v5304_v35, %v5304_v35  ;;  %5339 = vst.msk [vmem:[#allocation4] sm:$0x1] %vm5338_vm5, %v5304_v35 }
0x27da   :  { %v5358_v1 = vcombine.high %v5277_v7, %v5277_v7  ;;  %v5365_v22 = vrot.slane %v5277_v7, %v5287_v11  ;;  %6647 = vtanh.f32 %v5277_v7 }
0x27db   :  { %v5325_v39 = vrot.slane %v5297_v9, %v5287_v11  ;;  %v5327_v23 = vcombine.high %v5311_v31, %v5311_v31  ;;  %v5328_v24 = vcombine.high %v5318_v17, %v5318_v17  ;;  %5340 = vst.msk [vmem:[#allocation4 + $0x2] sm:$0x1] %vm5338_vm5, %v5318_v17  ;;  %5341 = vst.msk [vmem:[#allocation4 + $0x4] sm:$0x1] %vm5338_vm5, %v5326_v21 }
0x27dc   :  { %5343 = vst.msk [vmem:[#allocation4 + $0x8] sm:$0x1] %vm5338_vm5, %v5311_v31  ;;  %v5372_v18 = vrot.slane %v5358_v1, %v5287_v11  ;;  %v5373_v63 = vcombine.high %v5365_v22, %v5365_v22  ;;  %v5381_v14 = vrot.slane %v5365_v22, %v5287_v11 }
0x27dd   :  { %v5329_v13 = vcombine.high %v5325_v39, %v5325_v39  ;;  %5342 = vst.msk [vmem:[#allocation4 + $0x6] sm:$0x1] %vm5338_vm5, %v5328_v24  ;;  %5344 = vst.msk [vmem:[#allocation4 + $0xa] sm:$0x1] %vm5338_vm5, %v5325_v39 }
0x27de   :  { %5345 = vst.msk [vmem:[#allocation4 + $0xc] sm:$0x1] %vm5338_vm5, %v5327_v23  ;;  %v5374_v36 = vcombine.high %v5372_v18, %v5372_v18  ;;  %v5388_v28 = vrot.slane %v5372_v18, %v5287_v11  ;;  %v5395_v6 = vrot.slane %v5373_v63, %v5287_v11  ;;  %v5403_v32 = vcombine.high %v5381_v14, %v5381_v14 }
0x27df   :  { %5415 = vst.msk [vmem:[#allocation4 + $0x1] sm:$0x1] %vm5338_vm5, %v5381_v14  ;;  %5346 = vst.msk [vmem:[#allocation4 + $0xe] sm:$0x1] %vm5338_vm5, %v5329_v13 }
0x27e0   :  { %v5402_v61 = vrot.slane %v5374_v36, %v5287_v11  ;;  %v5404_v3 = vcombine.high %v5388_v28, %v5388_v28  ;;  %v5405_v0 = vcombine.high %v5395_v6, %v5395_v6  ;;  %5416 = vst.msk [vmem:[#allocation4 + $0x3] sm:$0x1] %vm5338_vm5, %v5395_v6  ;;  %5417 = vst.msk [vmem:[#allocation4 + $0x5] sm:$0x1] %vm5338_vm5, %v5403_v32 }
0x27e1   :  { %5419 = vst.msk [vmem:[#allocation4 + $0x9] sm:$0x1] %vm5338_vm5, %v5388_v28 }
0x27e2   :  { %v6646_v16 = vpop.eup %6645  ;;  %v5406_v56 = vcombine.high %v5402_v61, %v5402_v61  ;;  %5418 = vst.msk [vmem:[#allocation4 + $0x7] sm:$0x1] %vm5338_vm5, %v5405_v0  ;;  %5420 = vst.msk [vmem:[#allocation4 + $0xb] sm:$0x1] %vm5338_vm5, %v5402_v61 }
0x27e3   :  { %5421 = vst.msk [vmem:[#allocation4 + $0xd] sm:$0x1] %vm5338_vm5, %v5404_v3  ;;  %v5347_v33 = vsel %vm381_vm4, %v6646_v16, 0.0 }
0x27e4   :  { %5422 = vst.msk [vmem:[#allocation4 + $0xf] sm:$0x1] %vm5338_vm5, %v5406_v56  ;;  %v5348_v19 = vrot.slane %v5347_v33, 4 }
0x27e5   :  { %6664 = shalt.err (!%p6661_p4)
}
0x27e6   :  { %s6702_s23 = smov 32   ;;  %s6703_s24 = smov 2   ;;  %v5349_v37 = vadd.f32 %v5348_v19, %v5347_v33 }
0x27e7   :  { %5453 = dma.vmem_to_hbm [thread:$0]  %s5448_s21, 256, %s8355_s12, [#allocation5], %s6702_s23, %s6702_s23, %s6703_s24   ;;  %v6648_v40 = vpop.eup %6647 }
0x27e8   :  { %v5350_v42 = vrot.slane %v5349_v37, 2  ;;  %v5423_v51 = vsel %vm381_vm4, %v6648_v40, 0.0  ;;  %s6704_s26 = smov [#allocation2]  }
0x27e9   :  { %v5424_v41 = vrot.slane %v5423_v51, 4  ;;  %s5438_s7 = sshll.u32 %s6704_s26, 4  ;;  %s5439_s7 = int_to_ptr.vmem [resolvable:$true] %s5438_s7 }
0x27ea   :  { %v5351_v12 = vadd.f32 %v5350_v42, %v5349_v37  ;;  %s6673_s12 = scalar_lea.vmem %s5439_s7, 32  ;;  %p6678_p6 = scmp.lt.s32.totalorder %s5439_s7, %s5439_s7 }
0x27eb   :  { %v5425_v20 = vadd.f32 %v5424_v41, %v5423_v51  ;;  %p6674_p5 = scmp.ne.s32.totalorder %s5439_s7, %s6673_s12  ;;  %p6679_p7 = scmp.lt.s32.totalorder %s6673_s12, %s6673_s12 }
0x27ec   :  { %v5352_v44 = vrot.slane %v5351_v12, 1 }
0x27ed   :  { %v5426_v10 = vrot.slane %v5425_v20, 2  ;;  %p6680_p8 = por %p6679_p7, %p6678_p6 }
0x27ee   :  { %v5353_v45 = vadd.f32 %v5352_v44, %v5351_v12 }
0x27ef   :  { %v5427_v52 = vadd.f32 %v5426_v10, %v5425_v20  ;;  %p6681_p9 = pnand %p6680_p8, %p6674_p5 }
0x27f0   :  { %v5355_v15 = vmul.f32 0.125, %v5353_v45 }
0x27f1   :  { %v5428_v26 = vrot.slane %v5427_v52, 1 }
0x27f2   :  { %5356 = vst.msk [vmem:[#allocation2] sm:$0x1] %vm5338_vm5, %v5355_v15 }
0x27f3   :  { %v5429_v30 = vadd.f32 %v5428_v26, %v5427_v52 }
0x27f5   :  { %v5430_v46 = vmul.f32 0.125, %v5429_v30 }
0x27f7   :  { %5431 = vst.msk [vmem:[#allocation2 + $0x1] sm:$0x1] %vm5338_vm5, %v5430_v46 }
0x27f8   :  { %6684 = shalt.err (!%p6681_p9)
}
0x27f9   :  { %5441 = dma.vmem_to_hbm [thread:$0]  %s5439_s7, 32, %s8354_s11, [#allocation3]  }
0x27fa   :  { %6693 = dma.done.wait [#allocation3], 32  }
0x27fb   :  { %6694 = vsyncadd [#allocation3], 4294967264 }
0x27fc   :  { %6695 = dma.done.wait [#allocation5], 256  }
0x27fd   :  { %6696 = vsyncadd [#allocation5], 4294967040 }
0x27fe   :  { %5460 = vsyncpa [#allocation3], 1 }
0x27ff   :  { %5461 = vsyncpa [#allocation5], 1 }

</bundles_post_ra>
